<compile_context>
chip_gen: v7x
topology: tpu7x:2x2x1
jax: 0.10.0
libtpu: 0.0.40
codegen_flags: <defaults>
</compile_context>

<pallas_src>
import numpy as np
import jax
import jax.numpy as jnp
from jax.experimental import pallas as pl
from jax.experimental.pallas import tpu as pltpu


_LANE = 128
_CHUNK = 16            # sublane rows per inner step of kernel 1 (two f32 vregs/channel)
_COEF_ROW_CAP = 1024   # kernel-1 row tile (multiple of _CHUNK): ~8 MiB of blocks/step
_TH_CAP = 256          # kernel-2 spatial row tile (multiple of 64)
_TW_CAP = 512          # kernel-2 spatial col tile (multiple of 256), lane-dense stores
_STRIP = 64            # kernel-2 rows produced per fused matmul+mul+store
_VMEM_LIMIT = 48 * 1024 * 1024   # well above actual use, under v7x's 64 MiB physical


# --------------------------------------------------------------------------
# Kernel 1: attention coefficients (quarter resolution)
# --------------------------------------------------------------------------
def _coef_kernel(x_ref, g_ref, wa_ref, wg_ref, wp_ref, bag_ref, bp_ref,
                 psi_ref):
    # x_ref: (A, rows, 128), g_ref: (G, rows, 128), psi_ref: (A, rows, 128)
    # wa: (A, G), wg: (G, G), wp: (G, A), bag: (G,), bp: (A,)  -- all in SMEM.
    A = x_ref.shape[0]
    rows = x_ref.shape[1]
    G = g_ref.shape[0]

    # Hoist every SMEM scalar read out of the pixel loop: ~140 scalar loads are
    # issued once per grid step instead of once per chunk, so the 2-wide scalar
    # slot can never bind against the ~160 VALU ops of the inner body.
    wa = [[wa_ref[a, o] for o in range(G)] for a in range(A)]
    wg = [[wg_ref[k, o] for o in range(G)] for k in range(G)]
    wps = [[wp_ref[o, c] for c in range(A)] for o in range(G)]
    bag = [bag_ref[o] for o in range(G)]
    bp = [bp_ref[c] for c in range(A)]

    @pl.loop(0, rows // _CHUNK)
    def _(i):
        r = pl.ds(pl.multiple_of(i * _CHUNK, _CHUNK), _CHUNK)
        x = [x_ref[a, r, :] for a in range(A)]        # A x (CHUNK, 128) vregs
        g = [g_ref[k, r, :] for k in range(G)]        # G x (CHUNK, 128)
        # relu(x.Wa + g.Wg + b_ag) -> accumulate directly into the A output
        # accumulators (never keep the full hidden vector alive): ~36 live
        # vregs at _CHUNK=16, two independent FMA chains per channel.
        acc = [None] * A
        for o in range(G):
            t = x[0] * wa[0][o]
            for a in range(1, A):
                t = t + x[a] * wa[a][o]
            for k in range(G):
                t = t + g[k] * wg[k][o]
            p_o = jnp.maximum(t + bag[o], 0.0)
            for c in range(A):
                term = p_o * wps[o][c]
                acc[c] = term if acc[c] is None else acc[c] + term
        for c in range(A):
            psi_ref[c, r, :] = jax.nn.sigmoid(acc[c] + bp[c])


def attention_gate_coefficients(att_sub, gate_rs, params):
    """att_sub (N,A,H2,W2), gate_rs (N,G,H2,W2) -> psi (N,A,H2,W2), all f32."""
    w_att, w_gate, w_psi, b_ag, b_psi = params
    N, A, H2, W2 = att_sub.shape
    G = gate_rs.shape[1]
    P = H2 * W2

    # Flatten pixels; pad to a multiple of (CHUNK * 128) only when needed so the
    # pixel tiles are lane-dense (16, 128) vreg tiles.  For realistic sizes the
    # pixel count is already aligned and the pad / final slice disappear, and
    # XLA fuses the ::2 subsample + reshape (+ pad) into a single pass.
    blk = _CHUNK * _LANE
    Pp = ((P + blk - 1) // blk) * blk
    x = att_sub.reshape(N, A, P)
    g = gate_rs.reshape(N, G, P)
    if Pp != P:
        pad = ((0, 0), (0, 0), (0, Pp - P))
        x = jnp.pad(x, pad)
        g = jnp.pad(g, pad)
    S = Pp // _LANE                         # pixel rows of 128 (multiple of 16)
    rows = min(S, _COEF_ROW_CAP)            # row tile (multiple of 16)
    x = x.reshape(N, A, S, _LANE)
    g = g.reshape(N, G, S, _LANE)

    def tensor_spec(C):
        return pl.BlockSpec((None, C, rows, _LANE), lambda n, s: (n, 0, s, 0))

    smem_spec = pl.BlockSpec(memory_space=pltpu.MemorySpace.SMEM)

    psi4 = pl.pallas_call(
        _coef_kernel,
        out_shape=jax.ShapeDtypeStruct((N, A, S, _LANE), jnp.float32),
        grid=(N, pl.cdiv(S, rows)),
        in_specs=[tensor_spec(A), tensor_spec(G),
                  smem_spec, smem_spec, smem_spec, smem_spec, smem_spec],
        out_specs=tensor_spec(A),
        compiler_params=pltpu.CompilerParams(
            dimension_semantics=("parallel", "parallel"),
            vmem_limit_bytes=_VMEM_LIMIT),
    )(x, g, w_att, w_gate, w_psi, b_ag, b_psi)

    psi = psi4.reshape(N, A, Pp)
    if Pp != P:
        psi = psi[:, :, :P]
    return psi.reshape(N, A, H2, W2)


# --------------------------------------------------------------------------
# Kernel 2: fused 2x-nearest-upsample + gating multiply (full resolution)
# --------------------------------------------------------------------------
def _pick_strip(th):
    for d in (_STRIP, 32, 16, 8):
        if th % d == 0:
            return d
    return th


def _mul_kernel(psi_ref, att_ref, ew_ref, ehr_ref, y_ref):
    # psi_ref: (A, hp, wp) f32 low-res;  att_ref / y_ref: (A, th, tw) full-res.
    # ew_ref: (wp, tw) bf16 width-expansion; ehr_ref: (th, 3*hp) bf16 = [e_h|e_h|e_h].
    A, hp, wp = psi_ref.shape
    th, tw = att_ref.shape[1], att_ref.shape[2]
    strip = _pick_strip(th)
    n_strips = th // strip

    e_w = ew_ref[...]
    for c in range(A):
        p = psi_ref[c]                                    # (hp, wp) f32
        # 3-way bf16 split; hi + mid + lo reproduces p to ~1 ulp, so the 0/1
        # selection matmuls below reproduce psi (do not reduce to a 2-way split).
        hi = p.astype(jnp.bfloat16)
        r1 = p - hi.astype(jnp.float32)
        mid = r1.astype(jnp.bfloat16)
        lo = (r1 - mid.astype(jnp.float32)).astype(jnp.bfloat16)
        parts = jnp.concatenate([hi, mid, lo], axis=0)    # (3*hp, wp) bf16
        # One MXU call expands the width for all three parts; the f32->bf16
        # cast is lossless (each element is a copy of one bf16 part value).
        q = jnp.dot(parts, e_w, preferred_element_type=jnp.float32)
        q = q.astype(jnp.bfloat16)                        # (3*hp, tw)
        # Height expansion + hi/mid/lo summation (inside the MXU f32
        # accumulator) + gating multiply + store, fused per row strip so the
        # live f32 intermediate is bounded (~32 vregs) and never spills.
        if n_strips == 1:
            up = jnp.dot(ehr_ref[...], q, preferred_element_type=jnp.float32)
            y_ref[c] = (up * att_ref[c]).astype(y_ref.dtype)
        else:
            @pl.loop(0, n_strips)
            def _(s):
                r0 = pl.multiple_of(s * strip, strip)
                r = pl.ds(r0, strip)
                up = jnp.dot(ehr_ref[r, :], q, preferred_element_type=jnp.float32)
                y_ref[c, r, :] = (up * att_ref[c, r, :]).astype(y_ref.dtype)


def _spatial_tile(full, cap, mult):
    # Untiled when it fits (or when odd, so the tile-local h//2 map stays exact).
    if full <= cap or full % 2:
        return full
    return (cap // mult) * mult


def gated_multiply_upsampled(psi, att_in):
    """y[n,c,h,w] = psi[n,c,h//2,w//2] * att_in[n,c,h,w]."""
    N, A, H, W = att_in.shape
    H2, W2 = psi.shape[2], psi.shape[3]

    th = _spatial_tile(H, _TH_CAP, 64)     # th % 64 == 0 when tiled
    tw = _spatial_tile(W, _TW_CAP, 256)    # tw % 256 == 0 when tiled (lane-dense y)
    hp = H2 if th == H else th // 2
    wp = W2 if tw == W else tw // 2

    # 0/1 expansion matrices for the 2x nearest upsample, built ONCE at trace
    # time as numpy constants (exact in bf16) and fed with a constant index_map
    # instead of being rebuilt with iota/where every grid step.
    e_w_np = (np.arange(tw)[None, :] // 2 == np.arange(wp)[:, None])
    e_h_np = (np.arange(th)[:, None] // 2 == np.arange(hp)[None, :])
    e_w = jnp.asarray(e_w_np, jnp.bfloat16)                               # (wp, tw)
    e_h_rep = jnp.asarray(np.concatenate([e_h_np] * 3, axis=1), jnp.bfloat16)  # (th, 3*hp)

    att_spec = pl.BlockSpec((None, A, th, tw), lambda n, i, j: (n, 0, i, j))
    psi_spec = pl.BlockSpec((None, A, hp, wp), lambda n, i, j: (n, 0, i, j))
    ew_spec = pl.BlockSpec((wp, tw), lambda n, i, j: (0, 0))
    ehr_spec = pl.BlockSpec((th, 3 * hp), lambda n, i, j: (0, 0))

    return pl.pallas_call(
        _mul_kernel,
        out_shape=jax.ShapeDtypeStruct((N, A, H, W), att_in.dtype),
        grid=(N, pl.cdiv(H, th), pl.cdiv(W, tw)),
        in_specs=[psi_spec, att_spec, ew_spec, ehr_spec],
        out_specs=att_spec,
        compiler_params=pltpu.CompilerParams(
            dimension_semantics=("parallel", "parallel", "parallel"),
            vmem_limit_bytes=_VMEM_LIMIT),
    )(psi, att_in, e_w, e_h_rep)


# --------------------------------------------------------------------------
# Forward (NCHW native, no transposes)
# --------------------------------------------------------------------------
def _nearest_resize_nchw(x, out_h, out_w):
    """PyTorch-style nearest resize: src = floor(dst * in / out)."""
    _, _, in_h, in_w = x.shape
    if (in_h, in_w) == (out_h, out_w):
        return x
    hi = (jnp.arange(out_h) * in_h) // out_h
    wi = (jnp.arange(out_w) * in_w) // out_w
    return x[:, :, hi][:, :, :, wi]


def attention_gate_forward(att_in, gate, params):
    """Attentiongate_block.forward.  att_in (N,A,H,W), gate (N,G,Hg,Wg) -> (N,A,H,W)."""
    # Att's second conv has k=1, s=2, p=0: it only reads every other pixel and
    # everything before it is pointwise, so subsample first (exact).
    att_sub = att_in[:, :, ::2, ::2]                       # (N, A, H2, W2)
    H2, W2 = att_sub.shape[2], att_sub.shape[3]

    # sizechange(gate, att_out): the Gate conv + BN are pointwise, so resizing
    # before the conv is exact and stays on the small array.
    # TODO(synk): `sizechange` is undefined in the source module; assumed to be
    # nearest-neighbour spatial interpolation (F.interpolate, mode='nearest').
    gate_rs = _nearest_resize_nchw(gate, H2, W2)           # (N, G, H2, W2)

    psi = attention_gate_coefficients(att_sub, gate_rs, params)   # (N, A, H2, W2)

    # `if psi_out.size() != gate.size(): sizechange(...)` is a spatial no-op
    # (psi and gate share (H2, W2)).  upsample(2) + sizechange(y, att_in)
    # compose to y[h, w] = psi[h // 2, w // 2]; fused into kernel 2.
    return gated_multiply_upsampled(psi, att_in)


# --------------------------------------------------------------------------
# Deterministic synthetic parameters (Conv bias + eval-mode BN), plus folding
# --------------------------------------------------------------------------
def make_raw_params(key, A, G, eps=1e-5):
    def layer(k, cin, cout):
        ks = jax.random.split(k, 6)
        w = 0.3 * jax.random.normal(ks[0], (cin, cout), jnp.float32)
        b = 0.1 * jax.random.normal(ks[1], (cout,), jnp.float32)
        gamma = 1.0 + 0.1 * jax.random.normal(ks[2], (cout,), jnp.float32)
        beta = 0.1 * jax.random.normal(ks[3], (cout,), jnp.float32)
        mean = 0.1 * jax.random.normal(ks[4], (cout,), jnp.float32)
        var = 0.5 + jnp.abs(0.5 * jax.random.normal(ks[5], (cout,), jnp.float32))
        scale = gamma / jnp.sqrt(var + eps)
        shift = beta + (b - mean) * scale
        return w, scale, shift

    k1, k2, k3, k4 = jax.random.split(key, 4)
    return dict(att1=layer(k1, A, G),    # Conv2d(A->G, 1x1) + BN
                att2=layer(k2, G, G),    # Conv2d(G->G, 1x1, stride 2) + BN
                gate=layer(k3, G, G),    # ConvTranspose2d(G->G, 1x1) + BN
                psi=layer(k4, G, A))     # ConvTranspose2d(G->A, 1x1) + BN + Sigmoid


def fold_params(raw):
    """Fold BN scales into weights; collapse Att's two affine stages into one."""
    hp = jax.lax.Precision.HIGHEST
    w1, s1, t1 = raw["att1"]
    w2, s2, t2 = raw["att2"]
    wg, sg, tg = raw["gate"]
    wp, sp, tp = raw["psi"]
    w2s = w2 * s2[None, :]
    w_att = jnp.dot(w1 * s1[None, :], w2s, precision=hp)       # (A, G)
    b_att = jnp.dot(t1, w2s, precision=hp) + t2                # (G,)
    w_gate = wg * sg[None, :]                                  # (G, G)
    w_psi = wp * sp[None, :]                                   # (G, A)
    return (w_att, w_gate, w_psi, b_att + tg, tp)


# --------------------------------------------------------------------------
# Pure-JAX reference (PyTorch op order, unfolded params) for correctness
# --------------------------------------------------------------------------
def reference_forward(att_in, gate, raw):
    hp = jax.lax.Precision.HIGHEST
    w1, s1, t1 = raw["att1"]
    w2, s2, t2 = raw["att2"]
    wg, sg, tg = raw["gate"]
    wp, sp, tp = raw["psi"]
    N, A, H, W = att_in.shape

    x = jnp.transpose(att_in, (0, 2, 3, 1))                    # NHWC
    g = jnp.transpose(gate, (0, 2, 3, 1))

    t = jnp.matmul(x, w1, precision=hp) * s1 + t1              # Att conv1 + BN
    att_out = jnp.matmul(t[:, ::2, ::2, :], w2, precision=hp) * s2 + t2   # conv2(s=2) + BN
    gg = jnp.matmul(g, wg, precision=hp) * sg + tg             # Gate conv + BN
    hh, ww = att_out.shape[1], att_out.shape[2]
    hidx = (jnp.arange(hh) * gg.shape[1]) // hh
    widx = (jnp.arange(ww) * gg.shape[2]) // ww
    gg = gg[:, hidx][:, :, widx]                               # sizechange(gate, att_out)
    p = jnp.maximum(att_out + gg, 0.0)
    psi = jax.nn.sigmoid(jnp.matmul(p, wp, precision=hp) * sp + tp)
    up = jnp.repeat(jnp.repeat(psi, 2, axis=1), 2, axis=2)     # upsample(2, nearest)
    hidx = (jnp.arange(H) * up.shape[1]) // H
    widx = (jnp.arange(W) * up.shape[2]) // W
    up = up[:, hidx][:, :, widx]                               # sizechange(y, att_in)
    y = up * x
    return jnp.transpose(y, (0, 3, 1, 2))


if __name__ == "__main__":
    A, G = 4, 8                    # att_channels, gating_channels
    N, H, W = 2, 16, 16
    Hg, Wg = 8, 8

    key = jax.random.PRNGKey(0)
    k1, k2, k3 = jax.random.split(key, 3)
    att_in = jax.random.normal(k1, (N, A, H, W), jnp.float32)
    gate = jax.random.normal(k2, (N, G, Hg, Wg), jnp.float32)
    raw = make_raw_params(k3, A, G)
    params = fold_params(raw)

    fwd = jax.jit(attention_gate_forward)
    y = jax.block_until_ready(fwd(att_in, gate, params))

    y_ref = reference_forward(att_in, gate, raw)
    assert y.shape == att_in.shape
    err = float(jnp.max(jnp.abs(y - y_ref)))
    assert jnp.allclose(y, y_ref, atol=2e-5, rtol=2e-5), (
        f"mismatch vs reference (max abs err {err})")
    print("KERNEL_OK")
</pallas_src>

<mosaic_0001>
module attributes {stable_mosaic.version = 11 : i64} {
  func.func @_coef_kernel(%arg0: i32, %arg1: i32, %arg2: memref<1x4x16x128xf32, #tpu.memory_space<vmem>>, %arg3: memref<1x8x16x128xf32, #tpu.memory_space<vmem>>, %arg4: memref<4x8xf32, #tpu.memory_space<smem>>, %arg5: memref<8x8xf32, #tpu.memory_space<smem>>, %arg6: memref<8x4xf32, #tpu.memory_space<smem>>, %arg7: memref<8xf32, #tpu.memory_space<smem>>, %arg8: memref<4xf32, #tpu.memory_space<smem>>, %arg9: memref<1x4x16x128xf32, #tpu.memory_space<vmem>>) attributes {dimension_semantics = [#tpu.dimension_semantics<parallel>, #tpu.dimension_semantics<parallel>], iteration_bounds = array<i64: 2, 1>, scalar_prefetch = 0 : i64, scratch_operands = 0 : i64, tpu.core_type = #tpu.core_type<tc>, window_params = [{transform_indices = @transform_0, window_bounds = array<i64: 1, 4, 16, 128>}, {transform_indices = @transform_1, window_bounds = array<i64: 1, 8, 16, 128>}, {transform_indices = @transform_2, window_bounds = array<i64: 4, 8>}, {transform_indices = @transform_3, window_bounds = array<i64: 8, 8>}, {transform_indices = @transform_4, window_bounds = array<i64: 8, 4>}, {transform_indices = @transform_5, window_bounds = array<i64: 8>}, {transform_indices = @transform_6, window_bounds = array<i64: 4>}, {transform_indices = @transform_7, window_bounds = array<i64: 1, 4, 16, 128>}]} {
    %c0 = arith.constant 0 : index
    %c0_0 = arith.constant 0 : index
    %0 = memref.load %arg4[%c0, %c0_0] : memref<4x8xf32, #tpu.memory_space<smem>>
    %c0_1 = arith.constant 0 : index
    %c1 = arith.constant 1 : index
    %1 = memref.load %arg4[%c0_1, %c1] : memref<4x8xf32, #tpu.memory_space<smem>>
    %c0_2 = arith.constant 0 : index
    %c2 = arith.constant 2 : index
    %2 = memref.load %arg4[%c0_2, %c2] : memref<4x8xf32, #tpu.memory_space<smem>>
    %c0_3 = arith.constant 0 : index
    %c3 = arith.constant 3 : index
    %3 = memref.load %arg4[%c0_3, %c3] : memref<4x8xf32, #tpu.memory_space<smem>>
    %c0_4 = arith.constant 0 : index
    %c4 = arith.constant 4 : index
    %4 = memref.load %arg4[%c0_4, %c4] : memref<4x8xf32, #tpu.memory_space<smem>>
    %c0_5 = arith.constant 0 : index
    %c5 = arith.constant 5 : index
    %5 = memref.load %arg4[%c0_5, %c5] : memref<4x8xf32, #tpu.memory_space<smem>>
    %c0_6 = arith.constant 0 : index
    %c6 = arith.constant 6 : index
    %6 = memref.load %arg4[%c0_6, %c6] : memref<4x8xf32, #tpu.memory_space<smem>>
    %c0_7 = arith.constant 0 : index
    %c7 = arith.constant 7 : index
    %7 = memref.load %arg4[%c0_7, %c7] : memref<4x8xf32, #tpu.memory_space<smem>>
    %c1_8 = arith.constant 1 : index
    %c0_9 = arith.constant 0 : index
    %8 = memref.load %arg4[%c1_8, %c0_9] : memref<4x8xf32, #tpu.memory_space<smem>>
    %c1_10 = arith.constant 1 : index
    %c1_11 = arith.constant 1 : index
    %9 = memref.load %arg4[%c1_10, %c1_11] : memref<4x8xf32, #tpu.memory_space<smem>>
    %c1_12 = arith.constant 1 : index
    %c2_13 = arith.constant 2 : index
    %10 = memref.load %arg4[%c1_12, %c2_13] : memref<4x8xf32, #tpu.memory_space<smem>>
    %c1_14 = arith.constant 1 : index
    %c3_15 = arith.constant 3 : index
    %11 = memref.load %arg4[%c1_14, %c3_15] : memref<4x8xf32, #tpu.memory_space<smem>>
    %c1_16 = arith.constant 1 : index
    %c4_17 = arith.constant 4 : index
    %12 = memref.load %arg4[%c1_16, %c4_17] : memref<4x8xf32, #tpu.memory_space<smem>>
    %c1_18 = arith.constant 1 : index
    %c5_19 = arith.constant 5 : index
    %13 = memref.load %arg4[%c1_18, %c5_19] : memref<4x8xf32, #tpu.memory_space<smem>>
    %c1_20 = arith.constant 1 : index
    %c6_21 = arith.constant 6 : index
    %14 = memref.load %arg4[%c1_20, %c6_21] : memref<4x8xf32, #tpu.memory_space<smem>>
    %c1_22 = arith.constant 1 : index
    %c7_23 = arith.constant 7 : index
    %15 = memref.load %arg4[%c1_22, %c7_23] : memref<4x8xf32, #tpu.memory_space<smem>>
    %c2_24 = arith.constant 2 : index
    %c0_25 = arith.constant 0 : index
    %16 = memref.load %arg4[%c2_24, %c0_25] : memref<4x8xf32, #tpu.memory_space<smem>>
    %c2_26 = arith.constant 2 : index
    %c1_27 = arith.constant 1 : index
    %17 = memref.load %arg4[%c2_26, %c1_27] : memref<4x8xf32, #tpu.memory_space<smem>>
    %c2_28 = arith.constant 2 : index
    %c2_29 = arith.constant 2 : index
    %18 = memref.load %arg4[%c2_28, %c2_29] : memref<4x8xf32, #tpu.memory_space<smem>>
    %c2_30 = arith.constant 2 : index
    %c3_31 = arith.constant 3 : index
    %19 = memref.load %arg4[%c2_30, %c3_31] : memref<4x8xf32, #tpu.memory_space<smem>>
    %c2_32 = arith.constant 2 : index
    %c4_33 = arith.constant 4 : index
    %20 = memref.load %arg4[%c2_32, %c4_33] : memref<4x8xf32, #tpu.memory_space<smem>>
    %c2_34 = arith.constant 2 : index
    %c5_35 = arith.constant 5 : index
    %21 = memref.load %arg4[%c2_34, %c5_35] : memref<4x8xf32, #tpu.memory_space<smem>>
    %c2_36 = arith.constant 2 : index
    %c6_37 = arith.constant 6 : index
    %22 = memref.load %arg4[%c2_36, %c6_37] : memref<4x8xf32, #tpu.memory_space<smem>>
    %c2_38 = arith.constant 2 : index
    %c7_39 = arith.constant 7 : index
    %23 = memref.load %arg4[%c2_38, %c7_39] : memref<4x8xf32, #tpu.memory_space<smem>>
    %c3_40 = arith.constant 3 : index
    %c0_41 = arith.constant 0 : index
    %24 = memref.load %arg4[%c3_40, %c0_41] : memref<4x8xf32, #tpu.memory_space<smem>>
    %c3_42 = arith.constant 3 : index
    %c1_43 = arith.constant 1 : index
    %25 = memref.load %arg4[%c3_42, %c1_43] : memref<4x8xf32, #tpu.memory_space<smem>>
    %c3_44 = arith.constant 3 : index
    %c2_45 = arith.constant 2 : index
    %26 = memref.load %arg4[%c3_44, %c2_45] : memref<4x8xf32, #tpu.memory_space<smem>>
    %c3_46 = arith.constant 3 : index
    %c3_47 = arith.constant 3 : index
    %27 = memref.load %arg4[%c3_46, %c3_47] : memref<4x8xf32, #tpu.memory_space<smem>>
    %c3_48 = arith.constant 3 : index
    %c4_49 = arith.constant 4 : index
    %28 = memref.load %arg4[%c3_48, %c4_49] : memref<4x8xf32, #tpu.memory_space<smem>>
    %c3_50 = arith.constant 3 : index
    %c5_51 = arith.constant 5 : index
    %29 = memref.load %arg4[%c3_50, %c5_51] : memref<4x8xf32, #tpu.memory_space<smem>>
    %c3_52 = arith.constant 3 : index
    %c6_53 = arith.constant 6 : index
    %30 = memref.load %arg4[%c3_52, %c6_53] : memref<4x8xf32, #tpu.memory_space<smem>>
    %c3_54 = arith.constant 3 : index
    %c7_55 = arith.constant 7 : index
    %31 = memref.load %arg4[%c3_54, %c7_55] : memref<4x8xf32, #tpu.memory_space<smem>>
    %c0_56 = arith.constant 0 : index
    %c0_57 = arith.constant 0 : index
    %32 = memref.load %arg5[%c0_56, %c0_57] : memref<8x8xf32, #tpu.memory_space<smem>>
    %c0_58 = arith.constant 0 : index
    %c1_59 = arith.constant 1 : index
    %33 = memref.load %arg5[%c0_58, %c1_59] : memref<8x8xf32, #tpu.memory_space<smem>>
    %c0_60 = arith.constant 0 : index
    %c2_61 = arith.constant 2 : index
    %34 = memref.load %arg5[%c0_60, %c2_61] : memref<8x8xf32, #tpu.memory_space<smem>>
    %c0_62 = arith.constant 0 : index
    %c3_63 = arith.constant 3 : index
    %35 = memref.load %arg5[%c0_62, %c3_63] : memref<8x8xf32, #tpu.memory_space<smem>>
    %c0_64 = arith.constant 0 : index
    %c4_65 = arith.constant 4 : index
    %36 = memref.load %arg5[%c0_64, %c4_65] : memref<8x8xf32, #tpu.memory_space<smem>>
    %c0_66 = arith.constant 0 : index
    %c5_67 = arith.constant 5 : index
    %37 = memref.load %arg5[%c0_66, %c5_67] : memref<8x8xf32, #tpu.memory_space<smem>>
    %c0_68 = arith.constant 0 : index
    %c6_69 = arith.constant 6 : index
    %38 = memref.load %arg5[%c0_68, %c6_69] : memref<8x8xf32, #tpu.memory_space<smem>>
    %c0_70 = arith.constant 0 : index
    %c7_71 = arith.constant 7 : index
    %39 = memref.load %arg5[%c0_70, %c7_71] : memref<8x8xf32, #tpu.memory_space<smem>>
    %c1_72 = arith.constant 1 : index
    %c0_73 = arith.constant 0 : index
    %40 = memref.load %arg5[%c1_72, %c0_73] : memref<8x8xf32, #tpu.memory_space<smem>>
    %c1_74 = arith.constant 1 : index
    %c1_75 = arith.constant 1 : index
    %41 = memref.load %arg5[%c1_74, %c1_75] : memref<8x8xf32, #tpu.memory_space<smem>>
    %c1_76 = arith.constant 1 : index
    %c2_77 = arith.constant 2 : index
    %42 = memref.load %arg5[%c1_76, %c2_77] : memref<8x8xf32, #tpu.memory_space<smem>>
    %c1_78 = arith.constant 1 : index
    %c3_79 = arith.constant 3 : index
    %43 = memref.load %arg5[%c1_78, %c3_79] : memref<8x8xf32, #tpu.memory_space<smem>>
    %c1_80 = arith.constant 1 : index
    %c4_81 = arith.constant 4 : index
    %44 = memref.load %arg5[%c1_80, %c4_81] : memref<8x8xf32, #tpu.memory_space<smem>>
    %c1_82 = arith.constant 1 : index
    %c5_83 = arith.constant 5 : index
    %45 = memref.load %arg5[%c1_82, %c5_83] : memref<8x8xf32, #tpu.memory_space<smem>>
    %c1_84 = arith.constant 1 : index
    %c6_85 = arith.constant 6 : index
    %46 = memref.load %arg5[%c1_84, %c6_85] : memref<8x8xf32, #tpu.memory_space<smem>>
    %c1_86 = arith.constant 1 : index
    %c7_87 = arith.constant 7 : index
    %47 = memref.load %arg5[%c1_86, %c7_87] : memref<8x8xf32, #tpu.memory_space<smem>>
    %c2_88 = arith.constant 2 : index
    %c0_89 = arith.constant 0 : index
    %48 = memref.load %arg5[%c2_88, %c0_89] : memref<8x8xf32, #tpu.memory_space<smem>>
    %c2_90 = arith.constant 2 : index
    %c1_91 = arith.constant 1 : index
    %49 = memref.load %arg5[%c2_90, %c1_91] : memref<8x8xf32, #tpu.memory_space<smem>>
    %c2_92 = arith.constant 2 : index
    %c2_93 = arith.constant 2 : index
    %50 = memref.load %arg5[%c2_92, %c2_93] : memref<8x8xf32, #tpu.memory_space<smem>>
    %c2_94 = arith.constant 2 : index
    %c3_95 = arith.constant 3 : index
    %51 = memref.load %arg5[%c2_94, %c3_95] : memref<8x8xf32, #tpu.memory_space<smem>>
    %c2_96 = arith.constant 2 : index
    %c4_97 = arith.constant 4 : index
    %52 = memref.load %arg5[%c2_96, %c4_97] : memref<8x8xf32, #tpu.memory_space<smem>>
    %c2_98 = arith.constant 2 : index
    %c5_99 = arith.constant 5 : index
    %53 = memref.load %arg5[%c2_98, %c5_99] : memref<8x8xf32, #tpu.memory_space<smem>>
    %c2_100 = arith.constant 2 : index
    %c6_101 = arith.constant 6 : index
    %54 = memref.load %arg5[%c2_100, %c6_101] : memref<8x8xf32, #tpu.memory_space<smem>>
    %c2_102 = arith.constant 2 : index
    %c7_103 = arith.constant 7 : index
    %55 = memref.load %arg5[%c2_102, %c7_103] : memref<8x8xf32, #tpu.memory_space<smem>>
    %c3_104 = arith.constant 3 : index
    %c0_105 = arith.constant 0 : index
    %56 = memref.load %arg5[%c3_104, %c0_105] : memref<8x8xf32, #tpu.memory_space<smem>>
    %c3_106 = arith.constant 3 : index
    %c1_107 = arith.constant 1 : index
    %57 = memref.load %arg5[%c3_106, %c1_107] : memref<8x8xf32, #tpu.memory_space<smem>>
    %c3_108 = arith.constant 3 : index
    %c2_109 = arith.constant 2 : index
    %58 = memref.load %arg5[%c3_108, %c2_109] : memref<8x8xf32, #tpu.memory_space<smem>>
    %c3_110 = arith.constant 3 : index
    %c3_111 = arith.constant 3 : index
    %59 = memref.load %arg5[%c3_110, %c3_111] : memref<8x8xf32, #tpu.memory_space<smem>>
    %c3_112 = arith.constant 3 : index
    %c4_113 = arith.constant 4 : index
    %60 = memref.load %arg5[%c3_112, %c4_113] : memref<8x8xf32, #tpu.memory_space<smem>>
    %c3_114 = arith.constant 3 : index
    %c5_115 = arith.constant 5 : index
    %61 = memref.load %arg5[%c3_114, %c5_115] : memref<8x8xf32, #tpu.memory_space<smem>>
    %c3_116 = arith.constant 3 : index
    %c6_117 = arith.constant 6 : index
    %62 = memref.load %arg5[%c3_116, %c6_117] : memref<8x8xf32, #tpu.memory_space<smem>>
    %c3_118 = arith.constant 3 : index
    %c7_119 = arith.constant 7 : index
    %63 = memref.load %arg5[%c3_118, %c7_119] : memref<8x8xf32, #tpu.memory_space<smem>>
    %c4_120 = arith.constant 4 : index
    %c0_121 = arith.constant 0 : index
    %64 = memref.load %arg5[%c4_120, %c0_121] : memref<8x8xf32, #tpu.memory_space<smem>>
    %c4_122 = arith.constant 4 : index
    %c1_123 = arith.constant 1 : index
    %65 = memref.load %arg5[%c4_122, %c1_123] : memref<8x8xf32, #tpu.memory_space<smem>>
    %c4_124 = arith.constant 4 : index
    %c2_125 = arith.constant 2 : index
    %66 = memref.load %arg5[%c4_124, %c2_125] : memref<8x8xf32, #tpu.memory_space<smem>>
    %c4_126 = arith.constant 4 : index
    %c3_127 = arith.constant 3 : index
    %67 = memref.load %arg5[%c4_126, %c3_127] : memref<8x8xf32, #tpu.memory_space<smem>>
    %c4_128 = arith.constant 4 : index
    %c4_129 = arith.constant 4 : index
    %68 = memref.load %arg5[%c4_128, %c4_129] : memref<8x8xf32, #tpu.memory_space<smem>>
    %c4_130 = arith.constant 4 : index
    %c5_131 = arith.constant 5 : index
    %69 = memref.load %arg5[%c4_130, %c5_131] : memref<8x8xf32, #tpu.memory_space<smem>>
    %c4_132 = arith.constant 4 : index
    %c6_133 = arith.constant 6 : index
    %70 = memref.load %arg5[%c4_132, %c6_133] : memref<8x8xf32, #tpu.memory_space<smem>>
    %c4_134 = arith.constant 4 : index
    %c7_135 = arith.constant 7 : index
    %71 = memref.load %arg5[%c4_134, %c7_135] : memref<8x8xf32, #tpu.memory_space<smem>>
    %c5_136 = arith.constant 5 : index
    %c0_137 = arith.constant 0 : index
    %72 = memref.load %arg5[%c5_136, %c0_137] : memref<8x8xf32, #tpu.memory_space<smem>>
    %c5_138 = arith.constant 5 : index
    %c1_139 = arith.constant 1 : index
    %73 = memref.load %arg5[%c5_138, %c1_139] : memref<8x8xf32, #tpu.memory_space<smem>>
    %c5_140 = arith.constant 5 : index
    %c2_141 = arith.constant 2 : index
    %74 = memref.load %arg5[%c5_140, %c2_141] : memref<8x8xf32, #tpu.memory_space<smem>>
    %c5_142 = arith.constant 5 : index
    %c3_143 = arith.constant 3 : index
    %75 = memref.load %arg5[%c5_142, %c3_143] : memref<8x8xf32, #tpu.memory_space<smem>>
    %c5_144 = arith.constant 5 : index
    %c4_145 = arith.constant 4 : index
    %76 = memref.load %arg5[%c5_144, %c4_145] : memref<8x8xf32, #tpu.memory_space<smem>>
    %c5_146 = arith.constant 5 : index
    %c5_147 = arith.constant 5 : index
    %77 = memref.load %arg5[%c5_146, %c5_147] : memref<8x8xf32, #tpu.memory_space<smem>>
    %c5_148 = arith.constant 5 : index
    %c6_149 = arith.constant 6 : index
    %78 = memref.load %arg5[%c5_148, %c6_149] : memref<8x8xf32, #tpu.memory_space<smem>>
    %c5_150 = arith.constant 5 : index
    %c7_151 = arith.constant 7 : index
    %79 = memref.load %arg5[%c5_150, %c7_151] : memref<8x8xf32, #tpu.memory_space<smem>>
    %c6_152 = arith.constant 6 : index
    %c0_153 = arith.constant 0 : index
    %80 = memref.load %arg5[%c6_152, %c0_153] : memref<8x8xf32, #tpu.memory_space<smem>>
    %c6_154 = arith.constant 6 : index
    %c1_155 = arith.constant 1 : index
    %81 = memref.load %arg5[%c6_154, %c1_155] : memref<8x8xf32, #tpu.memory_space<smem>>
    %c6_156 = arith.constant 6 : index
    %c2_157 = arith.constant 2 : index
    %82 = memref.load %arg5[%c6_156, %c2_157] : memref<8x8xf32, #tpu.memory_space<smem>>
    %c6_158 = arith.constant 6 : index
    %c3_159 = arith.constant 3 : index
    %83 = memref.load %arg5[%c6_158, %c3_159] : memref<8x8xf32, #tpu.memory_space<smem>>
    %c6_160 = arith.constant 6 : index
    %c4_161 = arith.constant 4 : index
    %84 = memref.load %arg5[%c6_160, %c4_161] : memref<8x8xf32, #tpu.memory_space<smem>>
    %c6_162 = arith.constant 6 : index
    %c5_163 = arith.constant 5 : index
    %85 = memref.load %arg5[%c6_162, %c5_163] : memref<8x8xf32, #tpu.memory_space<smem>>
    %c6_164 = arith.constant 6 : index
    %c6_165 = arith.constant 6 : index
    %86 = memref.load %arg5[%c6_164, %c6_165] : memref<8x8xf32, #tpu.memory_space<smem>>
    %c6_166 = arith.constant 6 : index
    %c7_167 = arith.constant 7 : index
    %87 = memref.load %arg5[%c6_166, %c7_167] : memref<8x8xf32, #tpu.memory_space<smem>>
    %c7_168 = arith.constant 7 : index
    %c0_169 = arith.constant 0 : index
    %88 = memref.load %arg5[%c7_168, %c0_169] : memref<8x8xf32, #tpu.memory_space<smem>>
    %c7_170 = arith.constant 7 : index
    %c1_171 = arith.constant 1 : index
    %89 = memref.load %arg5[%c7_170, %c1_171] : memref<8x8xf32, #tpu.memory_space<smem>>
    %c7_172 = arith.constant 7 : index
    %c2_173 = arith.constant 2 : index
    %90 = memref.load %arg5[%c7_172, %c2_173] : memref<8x8xf32, #tpu.memory_space<smem>>
    %c7_174 = arith.constant 7 : index
    %c3_175 = arith.constant 3 : index
    %91 = memref.load %arg5[%c7_174, %c3_175] : memref<8x8xf32, #tpu.memory_space<smem>>
    %c7_176 = arith.constant 7 : index
    %c4_177 = arith.constant 4 : index
    %92 = memref.load %arg5[%c7_176, %c4_177] : memref<8x8xf32, #tpu.memory_space<smem>>
    %c7_178 = arith.constant 7 : index
    %c5_179 = arith.constant 5 : index
    %93 = memref.load %arg5[%c7_178, %c5_179] : memref<8x8xf32, #tpu.memory_space<smem>>
    %c7_180 = arith.constant 7 : index
    %c6_181 = arith.constant 6 : index
    %94 = memref.load %arg5[%c7_180, %c6_181] : memref<8x8xf32, #tpu.memory_space<smem>>
    %c7_182 = arith.constant 7 : index
    %c7_183 = arith.constant 7 : index
    %95 = memref.load %arg5[%c7_182, %c7_183] : memref<8x8xf32, #tpu.memory_space<smem>>
    %c0_184 = arith.constant 0 : index
    %c0_185 = arith.constant 0 : index
    %96 = memref.load %arg6[%c0_184, %c0_185] : memref<8x4xf32, #tpu.memory_space<smem>>
    %c0_186 = arith.constant 0 : index
    %c1_187 = arith.constant 1 : index
    %97 = memref.load %arg6[%c0_186, %c1_187] : memref<8x4xf32, #tpu.memory_space<smem>>
    %c0_188 = arith.constant 0 : index
    %c2_189 = arith.constant 2 : index
    %98 = memref.load %arg6[%c0_188, %c2_189] : memref<8x4xf32, #tpu.memory_space<smem>>
    %c0_190 = arith.constant 0 : index
    %c3_191 = arith.constant 3 : index
    %99 = memref.load %arg6[%c0_190, %c3_191] : memref<8x4xf32, #tpu.memory_space<smem>>
    %c1_192 = arith.constant 1 : index
    %c0_193 = arith.constant 0 : index
    %100 = memref.load %arg6[%c1_192, %c0_193] : memref<8x4xf32, #tpu.memory_space<smem>>
    %c1_194 = arith.constant 1 : index
    %c1_195 = arith.constant 1 : index
    %101 = memref.load %arg6[%c1_194, %c1_195] : memref<8x4xf32, #tpu.memory_space<smem>>
    %c1_196 = arith.constant 1 : index
    %c2_197 = arith.constant 2 : index
    %102 = memref.load %arg6[%c1_196, %c2_197] : memref<8x4xf32, #tpu.memory_space<smem>>
    %c1_198 = arith.constant 1 : index
    %c3_199 = arith.constant 3 : index
    %103 = memref.load %arg6[%c1_198, %c3_199] : memref<8x4xf32, #tpu.memory_space<smem>>
    %c2_200 = arith.constant 2 : index
    %c0_201 = arith.constant 0 : index
    %104 = memref.load %arg6[%c2_200, %c0_201] : memref<8x4xf32, #tpu.memory_space<smem>>
    %c2_202 = arith.constant 2 : index
    %c1_203 = arith.constant 1 : index
    %105 = memref.load %arg6[%c2_202, %c1_203] : memref<8x4xf32, #tpu.memory_space<smem>>
    %c2_204 = arith.constant 2 : index
    %c2_205 = arith.constant 2 : index
    %106 = memref.load %arg6[%c2_204, %c2_205] : memref<8x4xf32, #tpu.memory_space<smem>>
    %c2_206 = arith.constant 2 : index
    %c3_207 = arith.constant 3 : index
    %107 = memref.load %arg6[%c2_206, %c3_207] : memref<8x4xf32, #tpu.memory_space<smem>>
    %c3_208 = arith.constant 3 : index
    %c0_209 = arith.constant 0 : index
    %108 = memref.load %arg6[%c3_208, %c0_209] : memref<8x4xf32, #tpu.memory_space<smem>>
    %c3_210 = arith.constant 3 : index
    %c1_211 = arith.constant 1 : index
    %109 = memref.load %arg6[%c3_210, %c1_211] : memref<8x4xf32, #tpu.memory_space<smem>>
    %c3_212 = arith.constant 3 : index
    %c2_213 = arith.constant 2 : index
    %110 = memref.load %arg6[%c3_212, %c2_213] : memref<8x4xf32, #tpu.memory_space<smem>>
    %c3_214 = arith.constant 3 : index
    %c3_215 = arith.constant 3 : index
    %111 = memref.load %arg6[%c3_214, %c3_215] : memref<8x4xf32, #tpu.memory_space<smem>>
    %c4_216 = arith.constant 4 : index
    %c0_217 = arith.constant 0 : index
    %112 = memref.load %arg6[%c4_216, %c0_217] : memref<8x4xf32, #tpu.memory_space<smem>>
    %c4_218 = arith.constant 4 : index
    %c1_219 = arith.constant 1 : index
    %113 = memref.load %arg6[%c4_218, %c1_219] : memref<8x4xf32, #tpu.memory_space<smem>>
    %c4_220 = arith.constant 4 : index
    %c2_221 = arith.constant 2 : index
    %114 = memref.load %arg6[%c4_220, %c2_221] : memref<8x4xf32, #tpu.memory_space<smem>>
    %c4_222 = arith.constant 4 : index
    %c3_223 = arith.constant 3 : index
    %115 = memref.load %arg6[%c4_222, %c3_223] : memref<8x4xf32, #tpu.memory_space<smem>>
    %c5_224 = arith.constant 5 : index
    %c0_225 = arith.constant 0 : index
    %116 = memref.load %arg6[%c5_224, %c0_225] : memref<8x4xf32, #tpu.memory_space<smem>>
    %c5_226 = arith.constant 5 : index
    %c1_227 = arith.constant 1 : index
    %117 = memref.load %arg6[%c5_226, %c1_227] : memref<8x4xf32, #tpu.memory_space<smem>>
    %c5_228 = arith.constant 5 : index
    %c2_229 = arith.constant 2 : index
    %118 = memref.load %arg6[%c5_228, %c2_229] : memref<8x4xf32, #tpu.memory_space<smem>>
    %c5_230 = arith.constant 5 : index
    %c3_231 = arith.constant 3 : index
    %119 = memref.load %arg6[%c5_230, %c3_231] : memref<8x4xf32, #tpu.memory_space<smem>>
    %c6_232 = arith.constant 6 : index
    %c0_233 = arith.constant 0 : index
    %120 = memref.load %arg6[%c6_232, %c0_233] : memref<8x4xf32, #tpu.memory_space<smem>>
    %c6_234 = arith.constant 6 : index
    %c1_235 = arith.constant 1 : index
    %121 = memref.load %arg6[%c6_234, %c1_235] : memref<8x4xf32, #tpu.memory_space<smem>>
    %c6_236 = arith.constant 6 : index
    %c2_237 = arith.constant 2 : index
    %122 = memref.load %arg6[%c6_236, %c2_237] : memref<8x4xf32, #tpu.memory_space<smem>>
    %c6_238 = arith.constant 6 : index
    %c3_239 = arith.constant 3 : index
    %123 = memref.load %arg6[%c6_238, %c3_239] : memref<8x4xf32, #tpu.memory_space<smem>>
    %c7_240 = arith.constant 7 : index
    %c0_241 = arith.constant 0 : index
    %124 = memref.load %arg6[%c7_240, %c0_241] : memref<8x4xf32, #tpu.memory_space<smem>>
    %c7_242 = arith.constant 7 : index
    %c1_243 = arith.constant 1 : index
    %125 = memref.load %arg6[%c7_242, %c1_243] : memref<8x4xf32, #tpu.memory_space<smem>>
    %c7_244 = arith.constant 7 : index
    %c2_245 = arith.constant 2 : index
    %126 = memref.load %arg6[%c7_244, %c2_245] : memref<8x4xf32, #tpu.memory_space<smem>>
    %c7_246 = arith.constant 7 : index
    %c3_247 = arith.constant 3 : index
    %127 = memref.load %arg6[%c7_246, %c3_247] : memref<8x4xf32, #tpu.memory_space<smem>>
    %c0_248 = arith.constant 0 : index
    %128 = memref.load %arg7[%c0_248] : memref<8xf32, #tpu.memory_space<smem>>
    %c1_249 = arith.constant 1 : index
    %129 = memref.load %arg7[%c1_249] : memref<8xf32, #tpu.memory_space<smem>>
    %c2_250 = arith.constant 2 : index
    %130 = memref.load %arg7[%c2_250] : memref<8xf32, #tpu.memory_space<smem>>
    %c3_251 = arith.constant 3 : index
    %131 = memref.load %arg7[%c3_251] : memref<8xf32, #tpu.memory_space<smem>>
    %c4_252 = arith.constant 4 : index
    %132 = memref.load %arg7[%c4_252] : memref<8xf32, #tpu.memory_space<smem>>
    %c5_253 = arith.constant 5 : index
    %133 = memref.load %arg7[%c5_253] : memref<8xf32, #tpu.memory_space<smem>>
    %c6_254 = arith.constant 6 : index
    %134 = memref.load %arg7[%c6_254] : memref<8xf32, #tpu.memory_space<smem>>
    %c7_255 = arith.constant 7 : index
    %135 = memref.load %arg7[%c7_255] : memref<8xf32, #tpu.memory_space<smem>>
    %c0_256 = arith.constant 0 : index
    %136 = memref.load %arg8[%c0_256] : memref<4xf32, #tpu.memory_space<smem>>
    %c1_257 = arith.constant 1 : index
    %137 = memref.load %arg8[%c1_257] : memref<4xf32, #tpu.memory_space<smem>>
    %c2_258 = arith.constant 2 : index
    %138 = memref.load %arg8[%c2_258] : memref<4xf32, #tpu.memory_space<smem>>
    %c3_259 = arith.constant 3 : index
    %139 = memref.load %arg8[%c3_259] : memref<4xf32, #tpu.memory_space<smem>>
    %c0_i32 = arith.constant 0 : i32
    %c1_i32 = arith.constant 1 : i32
    %140 = arith.muli %c0_i32, %c1_i32 : i32
    %c0_i32_260 = arith.constant 0 : i32
    %141 = arith.addi %c0_i32_260, %140 : i32
    %c16_i32 = arith.constant 16 : i32
    %142 = arith.muli %141, %c16_i32 : i32
    %143 = tpu.assume_multiple %142, 16 : i32
    %c0_261 = arith.constant 0 : index
    %c0_262 = arith.constant 0 : index
    %144 = arith.index_cast %143 : i32 to index
    %c0_263 = arith.constant 0 : index
    %145 = vector.load %arg2[%c0_261, %c0_262, %144, %c0_263] : memref<1x4x16x128xf32, #tpu.memory_space<vmem>>, vector<1x1x16x128xf32>
    %146 = vector.shape_cast %145 : vector<1x1x16x128xf32> to vector<16x128xf32>
    %c0_264 = arith.constant 0 : index
    %c1_265 = arith.constant 1 : index
    %147 = arith.index_cast %143 : i32 to index
    %c0_266 = arith.constant 0 : index
    %148 = vector.load %arg2[%c0_264, %c1_265, %147, %c0_266] : memref<1x4x16x128xf32, #tpu.memory_space<vmem>>, vector<1x1x16x128xf32>
    %149 = vector.shape_cast %148 : vector<1x1x16x128xf32> to vector<16x128xf32>
    %c0_267 = arith.constant 0 : index
    %c2_268 = arith.constant 2 : index
    %150 = arith.index_cast %143 : i32 to index
    %c0_269 = arith.constant 0 : index
    %151 = vector.load %arg2[%c0_267, %c2_268, %150, %c0_269] : memref<1x4x16x128xf32, #tpu.memory_space<vmem>>, vector<1x1x16x128xf32>
    %152 = vector.shape_cast %151 : vector<1x1x16x128xf32> to vector<16x128xf32>
    %c0_270 = arith.constant 0 : index
    %c3_271 = arith.constant 3 : index
    %153 = arith.index_cast %143 : i32 to index
    %c0_272 = arith.constant 0 : index
    %154 = vector.load %arg2[%c0_270, %c3_271, %153, %c0_272] : memref<1x4x16x128xf32, #tpu.memory_space<vmem>>, vector<1x1x16x128xf32>
    %155 = vector.shape_cast %154 : vector<1x1x16x128xf32> to vector<16x128xf32>
    %c0_273 = arith.constant 0 : index
    %c0_274 = arith.constant 0 : index
    %156 = arith.index_cast %143 : i32 to index
    %c0_275 = arith.constant 0 : index
    %157 = vector.load %arg3[%c0_273, %c0_274, %156, %c0_275] : memref<1x8x16x128xf32, #tpu.memory_space<vmem>>, vector<1x1x16x128xf32>
    %158 = vector.shape_cast %157 : vector<1x1x16x128xf32> to vector<16x128xf32>
    %c0_276 = arith.constant 0 : index
    %c1_277 = arith.constant 1 : index
    %159 = arith.index_cast %143 : i32 to index
    %c0_278 = arith.constant 0 : index
    %160 = vector.load %arg3[%c0_276, %c1_277, %159, %c0_278] : memref<1x8x16x128xf32, #tpu.memory_space<vmem>>, vector<1x1x16x128xf32>
    %161 = vector.shape_cast %160 : vector<1x1x16x128xf32> to vector<16x128xf32>
    %c0_279 = arith.constant 0 : index
    %c2_280 = arith.constant 2 : index
    %162 = arith.index_cast %143 : i32 to index
    %c0_281 = arith.constant 0 : index
    %163 = vector.load %arg3[%c0_279, %c2_280, %162, %c0_281] : memref<1x8x16x128xf32, #tpu.memory_space<vmem>>, vector<1x1x16x128xf32>
    %164 = vector.shape_cast %163 : vector<1x1x16x128xf32> to vector<16x128xf32>
    %c0_282 = arith.constant 0 : index
    %c3_283 = arith.constant 3 : index
    %165 = arith.index_cast %143 : i32 to index
    %c0_284 = arith.constant 0 : index
    %166 = vector.load %arg3[%c0_282, %c3_283, %165, %c0_284] : memref<1x8x16x128xf32, #tpu.memory_space<vmem>>, vector<1x1x16x128xf32>
    %167 = vector.shape_cast %166 : vector<1x1x16x128xf32> to vector<16x128xf32>
    %c0_285 = arith.constant 0 : index
    %c4_286 = arith.constant 4 : index
    %168 = arith.index_cast %143 : i32 to index
    %c0_287 = arith.constant 0 : index
    %169 = vector.load %arg3[%c0_285, %c4_286, %168, %c0_287] : memref<1x8x16x128xf32, #tpu.memory_space<vmem>>, vector<1x1x16x128xf32>
    %170 = vector.shape_cast %169 : vector<1x1x16x128xf32> to vector<16x128xf32>
    %c0_288 = arith.constant 0 : index
    %c5_289 = arith.constant 5 : index
    %171 = arith.index_cast %143 : i32 to index
    %c0_290 = arith.constant 0 : index
    %172 = vector.load %arg3[%c0_288, %c5_289, %171, %c0_290] : memref<1x8x16x128xf32, #tpu.memory_space<vmem>>, vector<1x1x16x128xf32>
    %173 = vector.shape_cast %172 : vector<1x1x16x128xf32> to vector<16x128xf32>
    %c0_291 = arith.constant 0 : index
    %c6_292 = arith.constant 6 : index
    %174 = arith.index_cast %143 : i32 to index
    %c0_293 = arith.constant 0 : index
    %175 = vector.load %arg3[%c0_291, %c6_292, %174, %c0_293] : memref<1x8x16x128xf32, #tpu.memory_space<vmem>>, vector<1x1x16x128xf32>
    %176 = vector.shape_cast %175 : vector<1x1x16x128xf32> to vector<16x128xf32>
    %c0_294 = arith.constant 0 : index
    %c7_295 = arith.constant 7 : index
    %177 = arith.index_cast %143 : i32 to index
    %c0_296 = arith.constant 0 : index
    %178 = vector.load %arg3[%c0_294, %c7_295, %177, %c0_296] : memref<1x8x16x128xf32, #tpu.memory_space<vmem>>, vector<1x1x16x128xf32>
    %179 = vector.shape_cast %178 : vector<1x1x16x128xf32> to vector<16x128xf32>
    %180 = vector.broadcast %0 : f32 to vector<16x128xf32>
    %181 = arith.mulf %146, %180 : vector<16x128xf32>
    %182 = vector.broadcast %8 : f32 to vector<16x128xf32>
    %183 = arith.mulf %149, %182 : vector<16x128xf32>
    %184 = arith.addf %181, %183 : vector<16x128xf32>
    %185 = vector.broadcast %16 : f32 to vector<16x128xf32>
    %186 = arith.mulf %152, %185 : vector<16x128xf32>
    %187 = arith.addf %184, %186 : vector<16x128xf32>
    %188 = vector.broadcast %24 : f32 to vector<16x128xf32>
    %189 = arith.mulf %155, %188 : vector<16x128xf32>
    %190 = arith.addf %187, %189 : vector<16x128xf32>
    %191 = vector.broadcast %32 : f32 to vector<16x128xf32>
    %192 = arith.mulf %158, %191 : vector<16x128xf32>
    %193 = arith.addf %190, %192 : vector<16x128xf32>
    %194 = vector.broadcast %40 : f32 to vector<16x128xf32>
    %195 = arith.mulf %161, %194 : vector<16x128xf32>
    %196 = arith.addf %193, %195 : vector<16x128xf32>
    %197 = vector.broadcast %48 : f32 to vector<16x128xf32>
    %198 = arith.mulf %164, %197 : vector<16x128xf32>
    %199 = arith.addf %196, %198 : vector<16x128xf32>
    %200 = vector.broadcast %56 : f32 to vector<16x128xf32>
    %201 = arith.mulf %167, %200 : vector<16x128xf32>
    %202 = arith.addf %199, %201 : vector<16x128xf32>
    %203 = vector.broadcast %64 : f32 to vector<16x128xf32>
    %204 = arith.mulf %170, %203 : vector<16x128xf32>
    %205 = arith.addf %202, %204 : vector<16x128xf32>
    %206 = vector.broadcast %72 : f32 to vector<16x128xf32>
    %207 = arith.mulf %173, %206 : vector<16x128xf32>
    %208 = arith.addf %205, %207 : vector<16x128xf32>
    %209 = vector.broadcast %80 : f32 to vector<16x128xf32>
    %210 = arith.mulf %176, %209 : vector<16x128xf32>
    %211 = arith.addf %208, %210 : vector<16x128xf32>
    %212 = vector.broadcast %88 : f32 to vector<16x128xf32>
    %213 = arith.mulf %179, %212 : vector<16x128xf32>
    %214 = arith.addf %211, %213 : vector<16x128xf32>
    %215 = vector.broadcast %128 : f32 to vector<16x128xf32>
    %216 = arith.addf %214, %215 : vector<16x128xf32>
    %cst = arith.constant 0.000000e+00 : f32
    %217 = vector.broadcast %cst : f32 to vector<16x128xf32>
    %218 = arith.maximumf %216, %217 : vector<16x128xf32>
    %219 = vector.broadcast %96 : f32 to vector<16x128xf32>
    %220 = arith.mulf %218, %219 : vector<16x128xf32>
    %221 = vector.broadcast %97 : f32 to vector<16x128xf32>
    %222 = arith.mulf %218, %221 : vector<16x128xf32>
    %223 = vector.broadcast %98 : f32 to vector<16x128xf32>
    %224 = arith.mulf %218, %223 : vector<16x128xf32>
    %225 = vector.broadcast %99 : f32 to vector<16x128xf32>
    %226 = arith.mulf %218, %225 : vector<16x128xf32>
    %227 = vector.broadcast %1 : f32 to vector<16x128xf32>
    %228 = arith.mulf %146, %227 : vector<16x128xf32>
    %229 = vector.broadcast %9 : f32 to vector<16x128xf32>
    %230 = arith.mulf %149, %229 : vector<16x128xf32>
    %231 = arith.addf %228, %230 : vector<16x128xf32>
    %232 = vector.broadcast %17 : f32 to vector<16x128xf32>
    %233 = arith.mulf %152, %232 : vector<16x128xf32>
    %234 = arith.addf %231, %233 : vector<16x128xf32>
    %235 = vector.broadcast %25 : f32 to vector<16x128xf32>
    %236 = arith.mulf %155, %235 : vector<16x128xf32>
    %237 = arith.addf %234, %236 : vector<16x128xf32>
    %238 = vector.broadcast %33 : f32 to vector<16x128xf32>
    %239 = arith.mulf %158, %238 : vector<16x128xf32>
    %240 = arith.addf %237, %239 : vector<16x128xf32>
    %241 = vector.broadcast %41 : f32 to vector<16x128xf32>
    %242 = arith.mulf %161, %241 : vector<16x128xf32>
    %243 = arith.addf %240, %242 : vector<16x128xf32>
    %244 = vector.broadcast %49 : f32 to vector<16x128xf32>
    %245 = arith.mulf %164, %244 : vector<16x128xf32>
    %246 = arith.addf %243, %245 : vector<16x128xf32>
    %247 = vector.broadcast %57 : f32 to vector<16x128xf32>
    %248 = arith.mulf %167, %247 : vector<16x128xf32>
    %249 = arith.addf %246, %248 : vector<16x128xf32>
    %250 = vector.broadcast %65 : f32 to vector<16x128xf32>
    %251 = arith.mulf %170, %250 : vector<16x128xf32>
    %252 = arith.addf %249, %251 : vector<16x128xf32>
    %253 = vector.broadcast %73 : f32 to vector<16x128xf32>
    %254 = arith.mulf %173, %253 : vector<16x128xf32>
    %255 = arith.addf %252, %254 : vector<16x128xf32>
    %256 = vector.broadcast %81 : f32 to vector<16x128xf32>
    %257 = arith.mulf %176, %256 : vector<16x128xf32>
    %258 = arith.addf %255, %257 : vector<16x128xf32>
    %259 = vector.broadcast %89 : f32 to vector<16x128xf32>
    %260 = arith.mulf %179, %259 : vector<16x128xf32>
    %261 = arith.addf %258, %260 : vector<16x128xf32>
    %262 = vector.broadcast %129 : f32 to vector<16x128xf32>
    %263 = arith.addf %261, %262 : vector<16x128xf32>
    %cst_297 = arith.constant 0.000000e+00 : f32
    %264 = vector.broadcast %cst_297 : f32 to vector<16x128xf32>
    %265 = arith.maximumf %263, %264 : vector<16x128xf32>
    %266 = vector.broadcast %100 : f32 to vector<16x128xf32>
    %267 = arith.mulf %265, %266 : vector<16x128xf32>
    %268 = arith.addf %220, %267 : vector<16x128xf32>
    %269 = vector.broadcast %101 : f32 to vector<16x128xf32>
    %270 = arith.mulf %265, %269 : vector<16x128xf32>
    %271 = arith.addf %222, %270 : vector<16x128xf32>
    %272 = vector.broadcast %102 : f32 to vector<16x128xf32>
    %273 = arith.mulf %265, %272 : vector<16x128xf32>
    %274 = arith.addf %224, %273 : vector<16x128xf32>
    %275 = vector.broadcast %103 : f32 to vector<16x128xf32>
    %276 = arith.mulf %265, %275 : vector<16x128xf32>
    %277 = arith.addf %226, %276 : vector<16x128xf32>
    %278 = vector.broadcast %2 : f32 to vector<16x128xf32>
    %279 = arith.mulf %146, %278 : vector<16x128xf32>
    %280 = vector.broadcast %10 : f32 to vector<16x128xf32>
    %281 = arith.mulf %149, %280 : vector<16x128xf32>
    %282 = arith.addf %279, %281 : vector<16x128xf32>
    %283 = vector.broadcast %18 : f32 to vector<16x128xf32>
    %284 = arith.mulf %152, %283 : vector<16x128xf32>
    %285 = arith.addf %282, %284 : vector<16x128xf32>
    %286 = vector.broadcast %26 : f32 to vector<16x128xf32>
    %287 = arith.mulf %155, %286 : vector<16x128xf32>
    %288 = arith.addf %285, %287 : vector<16x128xf32>
    %289 = vector.broadcast %34 : f32 to vector<16x128xf32>
    %290 = arith.mulf %158, %289 : vector<16x128xf32>
    %291 = arith.addf %288, %290 : vector<16x128xf32>
    %292 = vector.broadcast %42 : f32 to vector<16x128xf32>
    %293 = arith.mulf %161, %292 : vector<16x128xf32>
    %294 = arith.addf %291, %293 : vector<16x128xf32>
    %295 = vector.broadcast %50 : f32 to vector<16x128xf32>
    %296 = arith.mulf %164, %295 : vector<16x128xf32>
    %297 = arith.addf %294, %296 : vector<16x128xf32>
    %298 = vector.broadcast %58 : f32 to vector<16x128xf32>
    %299 = arith.mulf %167, %298 : vector<16x128xf32>
    %300 = arith.addf %297, %299 : vector<16x128xf32>
    %301 = vector.broadcast %66 : f32 to vector<16x128xf32>
    %302 = arith.mulf %170, %301 : vector<16x128xf32>
    %303 = arith.addf %300, %302 : vector<16x128xf32>
    %304 = vector.broadcast %74 : f32 to vector<16x128xf32>
    %305 = arith.mulf %173, %304 : vector<16x128xf32>
    %306 = arith.addf %303, %305 : vector<16x128xf32>
    %307 = vector.broadcast %82 : f32 to vector<16x128xf32>
    %308 = arith.mulf %176, %307 : vector<16x128xf32>
    %309 = arith.addf %306, %308 : vector<16x128xf32>
    %310 = vector.broadcast %90 : f32 to vector<16x128xf32>
    %311 = arith.mulf %179, %310 : vector<16x128xf32>
    %312 = arith.addf %309, %311 : vector<16x128xf32>
    %313 = vector.broadcast %130 : f32 to vector<16x128xf32>
    %314 = arith.addf %312, %313 : vector<16x128xf32>
    %cst_298 = arith.constant 0.000000e+00 : f32
    %315 = vector.broadcast %cst_298 : f32 to vector<16x128xf32>
    %316 = arith.maximumf %314, %315 : vector<16x128xf32>
    %317 = vector.broadcast %104 : f32 to vector<16x128xf32>
    %318 = arith.mulf %316, %317 : vector<16x128xf32>
    %319 = arith.addf %268, %318 : vector<16x128xf32>
    %320 = vector.broadcast %105 : f32 to vector<16x128xf32>
    %321 = arith.mulf %316, %320 : vector<16x128xf32>
    %322 = arith.addf %271, %321 : vector<16x128xf32>
    %323 = vector.broadcast %106 : f32 to vector<16x128xf32>
    %324 = arith.mulf %316, %323 : vector<16x128xf32>
    %325 = arith.addf %274, %324 : vector<16x128xf32>
    %326 = vector.broadcast %107 : f32 to vector<16x128xf32>
    %327 = arith.mulf %316, %326 : vector<16x128xf32>
    %328 = arith.addf %277, %327 : vector<16x128xf32>
    %329 = vector.broadcast %3 : f32 to vector<16x128xf32>
    %330 = arith.mulf %146, %329 : vector<16x128xf32>
    %331 = vector.broadcast %11 : f32 to vector<16x128xf32>
    %332 = arith.mulf %149, %331 : vector<16x128xf32>
    %333 = arith.addf %330, %332 : vector<16x128xf32>
    %334 = vector.broadcast %19 : f32 to vector<16x128xf32>
    %335 = arith.mulf %152, %334 : vector<16x128xf32>
    %336 = arith.addf %333, %335 : vector<16x128xf32>
    %337 = vector.broadcast %27 : f32 to vector<16x128xf32>
    %338 = arith.mulf %155, %337 : vector<16x128xf32>
    %339 = arith.addf %336, %338 : vector<16x128xf32>
    %340 = vector.broadcast %35 : f32 to vector<16x128xf32>
    %341 = arith.mulf %158, %340 : vector<16x128xf32>
    %342 = arith.addf %339, %341 : vector<16x128xf32>
    %343 = vector.broadcast %43 : f32 to vector<16x128xf32>
    %344 = arith.mulf %161, %343 : vector<16x128xf32>
    %345 = arith.addf %342, %344 : vector<16x128xf32>
    %346 = vector.broadcast %51 : f32 to vector<16x128xf32>
    %347 = arith.mulf %164, %346 : vector<16x128xf32>
    %348 = arith.addf %345, %347 : vector<16x128xf32>
    %349 = vector.broadcast %59 : f32 to vector<16x128xf32>
    %350 = arith.mulf %167, %349 : vector<16x128xf32>
    %351 = arith.addf %348, %350 : vector<16x128xf32>
    %352 = vector.broadcast %67 : f32 to vector<16x128xf32>
    %353 = arith.mulf %170, %352 : vector<16x128xf32>
    %354 = arith.addf %351, %353 : vector<16x128xf32>
    %355 = vector.broadcast %75 : f32 to vector<16x128xf32>
    %356 = arith.mulf %173, %355 : vector<16x128xf32>
    %357 = arith.addf %354, %356 : vector<16x128xf32>
    %358 = vector.broadcast %83 : f32 to vector<16x128xf32>
    %359 = arith.mulf %176, %358 : vector<16x128xf32>
    %360 = arith.addf %357, %359 : vector<16x128xf32>
    %361 = vector.broadcast %91 : f32 to vector<16x128xf32>
    %362 = arith.mulf %179, %361 : vector<16x128xf32>
    %363 = arith.addf %360, %362 : vector<16x128xf32>
    %364 = vector.broadcast %131 : f32 to vector<16x128xf32>
    %365 = arith.addf %363, %364 : vector<16x128xf32>
    %cst_299 = arith.constant 0.000000e+00 : f32
    %366 = vector.broadcast %cst_299 : f32 to vector<16x128xf32>
    %367 = arith.maximumf %365, %366 : vector<16x128xf32>
    %368 = vector.broadcast %108 : f32 to vector<16x128xf32>
    %369 = arith.mulf %367, %368 : vector<16x128xf32>
    %370 = arith.addf %319, %369 : vector<16x128xf32>
    %371 = vector.broadcast %109 : f32 to vector<16x128xf32>
    %372 = arith.mulf %367, %371 : vector<16x128xf32>
    %373 = arith.addf %322, %372 : vector<16x128xf32>
    %374 = vector.broadcast %110 : f32 to vector<16x128xf32>
    %375 = arith.mulf %367, %374 : vector<16x128xf32>
    %376 = arith.addf %325, %375 : vector<16x128xf32>
    %377 = vector.broadcast %111 : f32 to vector<16x128xf32>
    %378 = arith.mulf %367, %377 : vector<16x128xf32>
    %379 = arith.addf %328, %378 : vector<16x128xf32>
    %380 = vector.broadcast %4 : f32 to vector<16x128xf32>
    %381 = arith.mulf %146, %380 : vector<16x128xf32>
    %382 = vector.broadcast %12 : f32 to vector<16x128xf32>
    %383 = arith.mulf %149, %382 : vector<16x128xf32>
    %384 = arith.addf %381, %383 : vector<16x128xf32>
    %385 = vector.broadcast %20 : f32 to vector<16x128xf32>
    %386 = arith.mulf %152, %385 : vector<16x128xf32>
    %387 = arith.addf %384, %386 : vector<16x128xf32>
    %388 = vector.broadcast %28 : f32 to vector<16x128xf32>
    %389 = arith.mulf %155, %388 : vector<16x128xf32>
    %390 = arith.addf %387, %389 : vector<16x128xf32>
    %391 = vector.broadcast %36 : f32 to vector<16x128xf32>
    %392 = arith.mulf %158, %391 : vector<16x128xf32>
    %393 = arith.addf %390, %392 : vector<16x128xf32>
    %394 = vector.broadcast %44 : f32 to vector<16x128xf32>
    %395 = arith.mulf %161, %394 : vector<16x128xf32>
    %396 = arith.addf %393, %395 : vector<16x128xf32>
    %397 = vector.broadcast %52 : f32 to vector<16x128xf32>
    %398 = arith.mulf %164, %397 : vector<16x128xf32>
    %399 = arith.addf %396, %398 : vector<16x128xf32>
    %400 = vector.broadcast %60 : f32 to vector<16x128xf32>
    %401 = arith.mulf %167, %400 : vector<16x128xf32>
    %402 = arith.addf %399, %401 : vector<16x128xf32>
    %403 = vector.broadcast %68 : f32 to vector<16x128xf32>
    %404 = arith.mulf %170, %403 : vector<16x128xf32>
    %405 = arith.addf %402, %404 : vector<16x128xf32>
    %406 = vector.broadcast %76 : f32 to vector<16x128xf32>
    %407 = arith.mulf %173, %406 : vector<16x128xf32>
    %408 = arith.addf %405, %407 : vector<16x128xf32>
    %409 = vector.broadcast %84 : f32 to vector<16x128xf32>
    %410 = arith.mulf %176, %409 : vector<16x128xf32>
    %411 = arith.addf %408, %410 : vector<16x128xf32>
    %412 = vector.broadcast %92 : f32 to vector<16x128xf32>
    %413 = arith.mulf %179, %412 : vector<16x128xf32>
    %414 = arith.addf %411, %413 : vector<16x128xf32>
    %415 = vector.broadcast %132 : f32 to vector<16x128xf32>
    %416 = arith.addf %414, %415 : vector<16x128xf32>
    %cst_300 = arith.constant 0.000000e+00 : f32
    %417 = vector.broadcast %cst_300 : f32 to vector<16x128xf32>
    %418 = arith.maximumf %416, %417 : vector<16x128xf32>
    %419 = vector.broadcast %112 : f32 to vector<16x128xf32>
    %420 = arith.mulf %418, %419 : vector<16x128xf32>
    %421 = arith.addf %370, %420 : vector<16x128xf32>
    %422 = vector.broadcast %113 : f32 to vector<16x128xf32>
    %423 = arith.mulf %418, %422 : vector<16x128xf32>
    %424 = arith.addf %373, %423 : vector<16x128xf32>
    %425 = vector.broadcast %114 : f32 to vector<16x128xf32>
    %426 = arith.mulf %418, %425 : vector<16x128xf32>
    %427 = arith.addf %376, %426 : vector<16x128xf32>
    %428 = vector.broadcast %115 : f32 to vector<16x128xf32>
    %429 = arith.mulf %418, %428 : vector<16x128xf32>
    %430 = arith.addf %379, %429 : vector<16x128xf32>
    %431 = vector.broadcast %5 : f32 to vector<16x128xf32>
    %432 = arith.mulf %146, %431 : vector<16x128xf32>
    %433 = vector.broadcast %13 : f32 to vector<16x128xf32>
    %434 = arith.mulf %149, %433 : vector<16x128xf32>
    %435 = arith.addf %432, %434 : vector<16x128xf32>
    %436 = vector.broadcast %21 : f32 to vector<16x128xf32>
    %437 = arith.mulf %152, %436 : vector<16x128xf32>
    %438 = arith.addf %435, %437 : vector<16x128xf32>
    %439 = vector.broadcast %29 : f32 to vector<16x128xf32>
    %440 = arith.mulf %155, %439 : vector<16x128xf32>
    %441 = arith.addf %438, %440 : vector<16x128xf32>
    %442 = vector.broadcast %37 : f32 to vector<16x128xf32>
    %443 = arith.mulf %158, %442 : vector<16x128xf32>
    %444 = arith.addf %441, %443 : vector<16x128xf32>
    %445 = vector.broadcast %45 : f32 to vector<16x128xf32>
    %446 = arith.mulf %161, %445 : vector<16x128xf32>
    %447 = arith.addf %444, %446 : vector<16x128xf32>
    %448 = vector.broadcast %53 : f32 to vector<16x128xf32>
    %449 = arith.mulf %164, %448 : vector<16x128xf32>
    %450 = arith.addf %447, %449 : vector<16x128xf32>
    %451 = vector.broadcast %61 : f32 to vector<16x128xf32>
    %452 = arith.mulf %167, %451 : vector<16x128xf32>
    %453 = arith.addf %450, %452 : vector<16x128xf32>
    %454 = vector.broadcast %69 : f32 to vector<16x128xf32>
    %455 = arith.mulf %170, %454 : vector<16x128xf32>
    %456 = arith.addf %453, %455 : vector<16x128xf32>
    %457 = vector.broadcast %77 : f32 to vector<16x128xf32>
    %458 = arith.mulf %173, %457 : vector<16x128xf32>
    %459 = arith.addf %456, %458 : vector<16x128xf32>
    %460 = vector.broadcast %85 : f32 to vector<16x128xf32>
    %461 = arith.mulf %176, %460 : vector<16x128xf32>
    %462 = arith.addf %459, %461 : vector<16x128xf32>
    %463 = vector.broadcast %93 : f32 to vector<16x128xf32>
    %464 = arith.mulf %179, %463 : vector<16x128xf32>
    %465 = arith.addf %462, %464 : vector<16x128xf32>
    %466 = vector.broadcast %133 : f32 to vector<16x128xf32>
    %467 = arith.addf %465, %466 : vector<16x128xf32>
    %cst_301 = arith.constant 0.000000e+00 : f32
    %468 = vector.broadcast %cst_301 : f32 to vector<16x128xf32>
    %469 = arith.maximumf %467, %468 : vector<16x128xf32>
    %470 = vector.broadcast %116 : f32 to vector<16x128xf32>
    %471 = arith.mulf %469, %470 : vector<16x128xf32>
    %472 = arith.addf %421, %471 : vector<16x128xf32>
    %473 = vector.broadcast %117 : f32 to vector<16x128xf32>
    %474 = arith.mulf %469, %473 : vector<16x128xf32>
    %475 = arith.addf %424, %474 : vector<16x128xf32>
    %476 = vector.broadcast %118 : f32 to vector<16x128xf32>
    %477 = arith.mulf %469, %476 : vector<16x128xf32>
    %478 = arith.addf %427, %477 : vector<16x128xf32>
    %479 = vector.broadcast %119 : f32 to vector<16x128xf32>
    %480 = arith.mulf %469, %479 : vector<16x128xf32>
    %481 = arith.addf %430, %480 : vector<16x128xf32>
    %482 = vector.broadcast %6 : f32 to vector<16x128xf32>
    %483 = arith.mulf %146, %482 : vector<16x128xf32>
    %484 = vector.broadcast %14 : f32 to vector<16x128xf32>
    %485 = arith.mulf %149, %484 : vector<16x128xf32>
    %486 = arith.addf %483, %485 : vector<16x128xf32>
    %487 = vector.broadcast %22 : f32 to vector<16x128xf32>
    %488 = arith.mulf %152, %487 : vector<16x128xf32>
    %489 = arith.addf %486, %488 : vector<16x128xf32>
    %490 = vector.broadcast %30 : f32 to vector<16x128xf32>
    %491 = arith.mulf %155, %490 : vector<16x128xf32>
    %492 = arith.addf %489, %491 : vector<16x128xf32>
    %493 = vector.broadcast %38 : f32 to vector<16x128xf32>
    %494 = arith.mulf %158, %493 : vector<16x128xf32>
    %495 = arith.addf %492, %494 : vector<16x128xf32>
    %496 = vector.broadcast %46 : f32 to vector<16x128xf32>
    %497 = arith.mulf %161, %496 : vector<16x128xf32>
    %498 = arith.addf %495, %497 : vector<16x128xf32>
    %499 = vector.broadcast %54 : f32 to vector<16x128xf32>
    %500 = arith.mulf %164, %499 : vector<16x128xf32>
    %501 = arith.addf %498, %500 : vector<16x128xf32>
    %502 = vector.broadcast %62 : f32 to vector<16x128xf32>
    %503 = arith.mulf %167, %502 : vector<16x128xf32>
    %504 = arith.addf %501, %503 : vector<16x128xf32>
    %505 = vector.broadcast %70 : f32 to vector<16x128xf32>
    %506 = arith.mulf %170, %505 : vector<16x128xf32>
    %507 = arith.addf %504, %506 : vector<16x128xf32>
    %508 = vector.broadcast %78 : f32 to vector<16x128xf32>
    %509 = arith.mulf %173, %508 : vector<16x128xf32>
    %510 = arith.addf %507, %509 : vector<16x128xf32>
    %511 = vector.broadcast %86 : f32 to vector<16x128xf32>
    %512 = arith.mulf %176, %511 : vector<16x128xf32>
    %513 = arith.addf %510, %512 : vector<16x128xf32>
    %514 = vector.broadcast %94 : f32 to vector<16x128xf32>
    %515 = arith.mulf %179, %514 : vector<16x128xf32>
    %516 = arith.addf %513, %515 : vector<16x128xf32>
    %517 = vector.broadcast %134 : f32 to vector<16x128xf32>
    %518 = arith.addf %516, %517 : vector<16x128xf32>
    %cst_302 = arith.constant 0.000000e+00 : f32
    %519 = vector.broadcast %cst_302 : f32 to vector<16x128xf32>
    %520 = arith.maximumf %518, %519 : vector<16x128xf32>
    %521 = vector.broadcast %120 : f32 to vector<16x128xf32>
    %522 = arith.mulf %520, %521 : vector<16x128xf32>
    %523 = arith.addf %472, %522 : vector<16x128xf32>
    %524 = vector.broadcast %121 : f32 to vector<16x128xf32>
    %525 = arith.mulf %520, %524 : vector<16x128xf32>
    %526 = arith.addf %475, %525 : vector<16x128xf32>
    %527 = vector.broadcast %122 : f32 to vector<16x128xf32>
    %528 = arith.mulf %520, %527 : vector<16x128xf32>
    %529 = arith.addf %478, %528 : vector<16x128xf32>
    %530 = vector.broadcast %123 : f32 to vector<16x128xf32>
    %531 = arith.mulf %520, %530 : vector<16x128xf32>
    %532 = arith.addf %481, %531 : vector<16x128xf32>
    %533 = vector.broadcast %7 : f32 to vector<16x128xf32>
    %534 = arith.mulf %146, %533 : vector<16x128xf32>
    %535 = vector.broadcast %15 : f32 to vector<16x128xf32>
    %536 = arith.mulf %149, %535 : vector<16x128xf32>
    %537 = arith.addf %534, %536 : vector<16x128xf32>
    %538 = vector.broadcast %23 : f32 to vector<16x128xf32>
    %539 = arith.mulf %152, %538 : vector<16x128xf32>
    %540 = arith.addf %537, %539 : vector<16x128xf32>
    %541 = vector.broadcast %31 : f32 to vector<16x128xf32>
    %542 = arith.mulf %155, %541 : vector<16x128xf32>
    %543 = arith.addf %540, %542 : vector<16x128xf32>
    %544 = vector.broadcast %39 : f32 to vector<16x128xf32>
    %545 = arith.mulf %158, %544 : vector<16x128xf32>
    %546 = arith.addf %543, %545 : vector<16x128xf32>
    %547 = vector.broadcast %47 : f32 to vector<16x128xf32>
    %548 = arith.mulf %161, %547 : vector<16x128xf32>
    %549 = arith.addf %546, %548 : vector<16x128xf32>
    %550 = vector.broadcast %55 : f32 to vector<16x128xf32>
    %551 = arith.mulf %164, %550 : vector<16x128xf32>
    %552 = arith.addf %549, %551 : vector<16x128xf32>
    %553 = vector.broadcast %63 : f32 to vector<16x128xf32>
    %554 = arith.mulf %167, %553 : vector<16x128xf32>
    %555 = arith.addf %552, %554 : vector<16x128xf32>
    %556 = vector.broadcast %71 : f32 to vector<16x128xf32>
    %557 = arith.mulf %170, %556 : vector<16x128xf32>
    %558 = arith.addf %555, %557 : vector<16x128xf32>
    %559 = vector.broadcast %79 : f32 to vector<16x128xf32>
    %560 = arith.mulf %173, %559 : vector<16x128xf32>
    %561 = arith.addf %558, %560 : vector<16x128xf32>
    %562 = vector.broadcast %87 : f32 to vector<16x128xf32>
    %563 = arith.mulf %176, %562 : vector<16x128xf32>
    %564 = arith.addf %561, %563 : vector<16x128xf32>
    %565 = vector.broadcast %95 : f32 to vector<16x128xf32>
    %566 = arith.mulf %179, %565 : vector<16x128xf32>
    %567 = arith.addf %564, %566 : vector<16x128xf32>
    %568 = vector.broadcast %135 : f32 to vector<16x128xf32>
    %569 = arith.addf %567, %568 : vector<16x128xf32>
    %cst_303 = arith.constant 0.000000e+00 : f32
    %570 = vector.broadcast %cst_303 : f32 to vector<16x128xf32>
    %571 = arith.maximumf %569, %570 : vector<16x128xf32>
    %572 = vector.broadcast %124 : f32 to vector<16x128xf32>
    %573 = arith.mulf %571, %572 : vector<16x128xf32>
    %574 = arith.addf %523, %573 : vector<16x128xf32>
    %575 = vector.broadcast %125 : f32 to vector<16x128xf32>
    %576 = arith.mulf %571, %575 : vector<16x128xf32>
    %577 = arith.addf %526, %576 : vector<16x128xf32>
    %578 = vector.broadcast %126 : f32 to vector<16x128xf32>
    %579 = arith.mulf %571, %578 : vector<16x128xf32>
    %580 = arith.addf %529, %579 : vector<16x128xf32>
    %581 = vector.broadcast %127 : f32 to vector<16x128xf32>
    %582 = arith.mulf %571, %581 : vector<16x128xf32>
    %583 = arith.addf %532, %582 : vector<16x128xf32>
    %584 = vector.broadcast %136 : f32 to vector<16x128xf32>
    %585 = arith.addf %574, %584 : vector<16x128xf32>
    %586 = arith.negf %585 : vector<16x128xf32>
    %587 = math.exp %586 : vector<16x128xf32>
    %cst_304 = arith.constant 1.000000e+00 : f32
    %588 = vector.broadcast %cst_304 : f32 to vector<16x128xf32>
    %589 = arith.addf %588, %587 : vector<16x128xf32>
    %590 = arith.divf %588, %589 : vector<16x128xf32>
    %c0_305 = arith.constant 0 : index
    %c0_306 = arith.constant 0 : index
    %591 = arith.index_cast %143 : i32 to index
    %c0_307 = arith.constant 0 : index
    %592 = vector.load %arg9[%c0_305, %c0_306, %591, %c0_307] : memref<1x4x16x128xf32, #tpu.memory_space<vmem>>, vector<1x1x16x128xf32>
    %593 = vector.shape_cast %592 : vector<1x1x16x128xf32> to vector<16x128xf32>
    %594 = vector.shape_cast %590 : vector<16x128xf32> to vector<1x1x16x128xf32>
    tpu.vector_store %arg9[%c0_305, %c0_306, %591, %c0_307], %594 {strides = array<i32>} : memref<1x4x16x128xf32, #tpu.memory_space<vmem>>, vector<1x1x16x128xf32>,
    %595 = vector.broadcast %137 : f32 to vector<16x128xf32>
    %596 = arith.addf %577, %595 : vector<16x128xf32>
    %597 = arith.negf %596 : vector<16x128xf32>
    %598 = math.exp %597 : vector<16x128xf32>
    %cst_308 = arith.constant 1.000000e+00 : f32
    %599 = vector.broadcast %cst_308 : f32 to vector<16x128xf32>
    %600 = arith.addf %599, %598 : vector<16x128xf32>
    %601 = arith.divf %599, %600 : vector<16x128xf32>
    %c0_309 = arith.constant 0 : index
    %c1_310 = arith.constant 1 : index
    %602 = arith.index_cast %143 : i32 to index
    %c0_311 = arith.constant 0 : index
    %603 = vector.load %arg9[%c0_309, %c1_310, %602, %c0_311] : memref<1x4x16x128xf32, #tpu.memory_space<vmem>>, vector<1x1x16x128xf32>
    %604 = vector.shape_cast %603 : vector<1x1x16x128xf32> to vector<16x128xf32>
    %605 = vector.shape_cast %601 : vector<16x128xf32> to vector<1x1x16x128xf32>
    tpu.vector_store %arg9[%c0_309, %c1_310, %602, %c0_311], %605 {strides = array<i32>} : memref<1x4x16x128xf32, #tpu.memory_space<vmem>>, vector<1x1x16x128xf32>,
    %606 = vector.broadcast %138 : f32 to vector<16x128xf32>
    %607 = arith.addf %580, %606 : vector<16x128xf32>
    %608 = arith.negf %607 : vector<16x128xf32>
    %609 = math.exp %608 : vector<16x128xf32>
    %cst_312 = arith.constant 1.000000e+00 : f32
    %610 = vector.broadcast %cst_312 : f32 to vector<16x128xf32>
    %611 = arith.addf %610, %609 : vector<16x128xf32>
    %612 = arith.divf %610, %611 : vector<16x128xf32>
    %c0_313 = arith.constant 0 : index
    %c2_314 = arith.constant 2 : index
    %613 = arith.index_cast %143 : i32 to index
    %c0_315 = arith.constant 0 : index
    %614 = vector.load %arg9[%c0_313, %c2_314, %613, %c0_315] : memref<1x4x16x128xf32, #tpu.memory_space<vmem>>, vector<1x1x16x128xf32>
    %615 = vector.shape_cast %614 : vector<1x1x16x128xf32> to vector<16x128xf32>
    %616 = vector.shape_cast %612 : vector<16x128xf32> to vector<1x1x16x128xf32>
    tpu.vector_store %arg9[%c0_313, %c2_314, %613, %c0_315], %616 {strides = array<i32>} : memref<1x4x16x128xf32, #tpu.memory_space<vmem>>, vector<1x1x16x128xf32>,
    %617 = vector.broadcast %139 : f32 to vector<16x128xf32>
    %618 = arith.addf %583, %617 : vector<16x128xf32>
    %619 = arith.negf %618 : vector<16x128xf32>
    %620 = math.exp %619 : vector<16x128xf32>
    %cst_316 = arith.constant 1.000000e+00 : f32
    %621 = vector.broadcast %cst_316 : f32 to vector<16x128xf32>
    %622 = arith.addf %621, %620 : vector<16x128xf32>
    %623 = arith.divf %621, %622 : vector<16x128xf32>
    %c0_317 = arith.constant 0 : index
    %c3_318 = arith.constant 3 : index
    %624 = arith.index_cast %143 : i32 to index
    %c0_319 = arith.constant 0 : index
    %625 = vector.load %arg9[%c0_317, %c3_318, %624, %c0_319] : memref<1x4x16x128xf32, #tpu.memory_space<vmem>>, vector<1x1x16x128xf32>
    %626 = vector.shape_cast %625 : vector<1x1x16x128xf32> to vector<16x128xf32>
    %627 = vector.shape_cast %623 : vector<16x128xf32> to vector<1x1x16x128xf32>
    tpu.vector_store %arg9[%c0_317, %c3_318, %624, %c0_319], %627 {strides = array<i32>} : memref<1x4x16x128xf32, #tpu.memory_space<vmem>>, vector<1x1x16x128xf32>,
    %c1_i32_320 = arith.constant 1 : i32
    return
  }
  func.func @transform_0(%arg0: i32, %arg1: i32) -> (i32, i32, i32, i32) {
    %c0_i32 = arith.constant 0 : i32
    %c0_i32_0 = arith.constant 0 : i32
    %c0_i32_1 = arith.constant 0 : i32
    return %arg0, %c0_i32, %arg1, %c0_i32_0 : i32, i32, i32, i32
  }
  func.func @transform_1(%arg0: i32, %arg1: i32) -> (i32, i32, i32, i32) {
    %c0_i32 = arith.constant 0 : i32
    %c0_i32_0 = arith.constant 0 : i32
    %c0_i32_1 = arith.constant 0 : i32
    return %arg0, %c0_i32, %arg1, %c0_i32_0 : i32, i32, i32, i32
  }
  func.func @transform_2(%arg0: i32, %arg1: i32) -> (i32, i32) {
    %c0_i32 = arith.constant 0 : i32
    %c0_i32_0 = arith.constant 0 : i32
    %c0_i32_1 = arith.constant 0 : i32
    return %c0_i32, %c0_i32_0 : i32, i32
  }
  func.func @transform_3(%arg0: i32, %arg1: i32) -> (i32, i32) {
    %c0_i32 = arith.constant 0 : i32
    %c0_i32_0 = arith.constant 0 : i32
    %c0_i32_1 = arith.constant 0 : i32
    return %c0_i32, %c0_i32_0 : i32, i32
  }
  func.func @transform_4(%arg0: i32, %arg1: i32) -> (i32, i32) {
    %c0_i32 = arith.constant 0 : i32
    %c0_i32_0 = arith.constant 0 : i32
    %c0_i32_1 = arith.constant 0 : i32
    return %c0_i32, %c0_i32_0 : i32, i32
  }
  func.func @transform_5(%arg0: i32, %arg1: i32) -> i32 {
    %c0_i32 = arith.constant 0 : i32
    %c0_i32_0 = arith.constant 0 : i32
    return %c0_i32 : i32
  }
  func.func @transform_6(%arg0: i32, %arg1: i32) -> i32 {
    %c0_i32 = arith.constant 0 : i32
    %c0_i32_0 = arith.constant 0 : i32
    return %c0_i32 : i32
  }
  func.func @transform_7(%arg0: i32, %arg1: i32) -> (i32, i32, i32, i32) {
    %c0_i32 = arith.constant 0 : i32
    %c0_i32_0 = arith.constant 0 : i32
    %c0_i32_1 = arith.constant 0 : i32
    return %arg0, %c0_i32, %arg1, %c0_i32_0 : i32, i32, i32, i32
  }
}

module attributes {stable_mosaic.version = 11 : i64} {
  func.func @_mul_kernel(%arg0: i32, %arg1: i32, %arg2: i32, %arg3: memref<1x4x8x8xf32, #tpu.memory_space<vmem>>, %arg4: memref<1x4x16x16xf32, #tpu.memory_space<vmem>>, %arg5: memref<8x16xbf16, #tpu.memory_space<vmem>>, %arg6: memref<16x24xbf16, #tpu.memory_space<vmem>>, %arg7: memref<1x4x16x16xf32, #tpu.memory_space<vmem>>) attributes {dimension_semantics = [#tpu.dimension_semantics<parallel>, #tpu.dimension_semantics<parallel>, #tpu.dimension_semantics<parallel>], iteration_bounds = array<i64: 2, 1, 1>, scalar_prefetch = 0 : i64, scratch_operands = 0 : i64, tpu.core_type = #tpu.core_type<tc>, window_params = [{transform_indices = @transform_0, window_bounds = array<i64: 1, 4, 8, 8>}, {transform_indices = @transform_1, window_bounds = array<i64: 1, 4, 16, 16>}, {pipeline_mode = #tpu.pipeline_mode<synchronous>, transform_indices = @transform_2, window_bounds = array<i64: 8, 16>}, {pipeline_mode = #tpu.pipeline_mode<synchronous>, transform_indices = @transform_3, window_bounds = array<i64: 16, 24>}, {transform_indices = @transform_4, window_bounds = array<i64: 1, 4, 16, 16>}]} {
    %c0 = arith.constant 0 : index
    %c0_0 = arith.constant 0 : index
    %0 = vector.load %arg5[%c0, %c0_0] : memref<8x16xbf16, #tpu.memory_space<vmem>>, vector<8x16xbf16>
    %c0_1 = arith.constant 0 : index
    %c0_2 = arith.constant 0 : index
    %c0_3 = arith.constant 0 : index
    %c0_4 = arith.constant 0 : index
    %1 = vector.load %arg3[%c0_1, %c0_2, %c0_3, %c0_4] : memref<1x4x8x8xf32, #tpu.memory_space<vmem>>, vector<1x1x8x8xf32>
    %2 = vector.shape_cast %1 : vector<1x1x8x8xf32> to vector<8x8xf32>
    %3 = arith.truncf %2 : vector<8x8xf32> to vector<8x8xbf16>
    %4 = arith.extf %3 : vector<8x8xbf16> to vector<8x8xf32>
    %5 = arith.subf %2, %4 : vector<8x8xf32>
    %6 = arith.truncf %5 : vector<8x8xf32> to vector<8x8xbf16>
    %7 = arith.extf %6 : vector<8x8xbf16> to vector<8x8xf32>
    %8 = arith.subf %5, %7 : vector<8x8xf32>
    %9 = arith.truncf %8 : vector<8x8xf32> to vector<8x8xbf16>
    %10 = tpu.concatenate %3, %6, %9 in 0 : vector<8x8xbf16>, vector<8x8xbf16>, vector<8x8xbf16> -> vector<24x8xbf16>
    %cst = arith.constant dense<0.000000e+00> : vector<24x16xf32>
    %11 = tpu.matmul %10, %0, %cst {dimension_numbers = #tpu.dot_dimension_numbers<[1], [0], [0], [1], [0, 0, 1, 1], [], []>} : vector<24x8xbf16>, vector<8x16xbf16>, vector<24x16xf32> -> vector<24x16xf32>
    %12 = arith.truncf %11 : vector<24x16xf32> to vector<24x16xbf16>
    %c0_5 = arith.constant 0 : index
    %c0_6 = arith.constant 0 : index
    %13 = vector.load %arg6[%c0_5, %c0_6] : memref<16x24xbf16, #tpu.memory_space<vmem>>, vector<16x24xbf16>
    %cst_7 = arith.constant dense<0.000000e+00> : vector<16x16xf32>
    %14 = tpu.matmul %13, %12, %cst_7 {dimension_numbers = #tpu.dot_dimension_numbers<[1], [0], [0], [1], [0, 0, 1, 1], [], []>} : vector<16x24xbf16>, vector<24x16xbf16>, vector<16x16xf32> -> vector<16x16xf32>
    %c0_8 = arith.constant 0 : index
    %c0_9 = arith.constant 0 : index
    %c0_10 = arith.constant 0 : index
    %c0_11 = arith.constant 0 : index
    %15 = vector.load %arg4[%c0_8, %c0_9, %c0_10, %c0_11] : memref<1x4x16x16xf32, #tpu.memory_space<vmem>>, vector<1x1x16x16xf32>
    %16 = vector.shape_cast %15 : vector<1x1x16x16xf32> to vector<16x16xf32>
    %17 = arith.mulf %14, %16 : vector<16x16xf32>
    %c0_12 = arith.constant 0 : index
    %c0_13 = arith.constant 0 : index
    %c0_14 = arith.constant 0 : index
    %c0_15 = arith.constant 0 : index
    %18 = vector.load %arg7[%c0_12, %c0_13, %c0_14, %c0_15] : memref<1x4x16x16xf32, #tpu.memory_space<vmem>>, vector<1x1x16x16xf32>
    %19 = vector.shape_cast %18 : vector<1x1x16x16xf32> to vector<16x16xf32>
    %20 = vector.shape_cast %17 : vector<16x16xf32> to vector<1x1x16x16xf32>
    tpu.vector_store %arg7[%c0_12, %c0_13, %c0_14, %c0_15], %20 {strides = array<i32>} : memref<1x4x16x16xf32, #tpu.memory_space<vmem>>, vector<1x1x16x16xf32>,
    %c0_16 = arith.constant 0 : index
    %c1 = arith.constant 1 : index
    %c0_17 = arith.constant 0 : index
    %c0_18 = arith.constant 0 : index
    %21 = vector.load %arg3[%c0_16, %c1, %c0_17, %c0_18] : memref<1x4x8x8xf32, #tpu.memory_space<vmem>>, vector<1x1x8x8xf32>
    %22 = vector.shape_cast %21 : vector<1x1x8x8xf32> to vector<8x8xf32>
    %23 = arith.truncf %22 : vector<8x8xf32> to vector<8x8xbf16>
    %24 = arith.extf %23 : vector<8x8xbf16> to vector<8x8xf32>
    %25 = arith.subf %22, %24 : vector<8x8xf32>
    %26 = arith.truncf %25 : vector<8x8xf32> to vector<8x8xbf16>
    %27 = arith.extf %26 : vector<8x8xbf16> to vector<8x8xf32>
    %28 = arith.subf %25, %27 : vector<8x8xf32>
    %29 = arith.truncf %28 : vector<8x8xf32> to vector<8x8xbf16>
    %30 = tpu.concatenate %23, %26, %29 in 0 : vector<8x8xbf16>, vector<8x8xbf16>, vector<8x8xbf16> -> vector<24x8xbf16>
    %cst_19 = arith.constant dense<0.000000e+00> : vector<24x16xf32>
    %31 = tpu.matmul %30, %0, %cst_19 {dimension_numbers = #tpu.dot_dimension_numbers<[1], [0], [0], [1], [0, 0, 1, 1], [], []>} : vector<24x8xbf16>, vector<8x16xbf16>, vector<24x16xf32> -> vector<24x16xf32>
    %32 = arith.truncf %31 : vector<24x16xf32> to vector<24x16xbf16>
    %c0_20 = arith.constant 0 : index
    %c0_21 = arith.constant 0 : index
    %33 = vector.load %arg6[%c0_20, %c0_21] : memref<16x24xbf16, #tpu.memory_space<vmem>>, vector<16x24xbf16>
    %cst_22 = arith.constant dense<0.000000e+00> : vector<16x16xf32>
    %34 = tpu.matmul %33, %32, %cst_22 {dimension_numbers = #tpu.dot_dimension_numbers<[1], [0], [0], [1], [0, 0, 1, 1], [], []>} : vector<16x24xbf16>, vector<24x16xbf16>, vector<16x16xf32> -> vector<16x16xf32>
    %c0_23 = arith.constant 0 : index
    %c1_24 = arith.constant 1 : index
    %c0_25 = arith.constant 0 : index
    %c0_26 = arith.constant 0 : index
    %35 = vector.load %arg4[%c0_23, %c1_24, %c0_25, %c0_26] : memref<1x4x16x16xf32, #tpu.memory_space<vmem>>, vector<1x1x16x16xf32>
    %36 = vector.shape_cast %35 : vector<1x1x16x16xf32> to vector<16x16xf32>
    %37 = arith.mulf %34, %36 : vector<16x16xf32>
    %c0_27 = arith.constant 0 : index
    %c1_28 = arith.constant 1 : index
    %c0_29 = arith.constant 0 : index
    %c0_30 = arith.constant 0 : index
    %38 = vector.load %arg7[%c0_27, %c1_28, %c0_29, %c0_30] : memref<1x4x16x16xf32, #tpu.memory_space<vmem>>, vector<1x1x16x16xf32>
    %39 = vector.shape_cast %38 : vector<1x1x16x16xf32> to vector<16x16xf32>
    %40 = vector.shape_cast %37 : vector<16x16xf32> to vector<1x1x16x16xf32>
    tpu.vector_store %arg7[%c0_27, %c1_28, %c0_29, %c0_30], %40 {strides = array<i32>} : memref<1x4x16x16xf32, #tpu.memory_space<vmem>>, vector<1x1x16x16xf32>,
    %c0_31 = arith.constant 0 : index
    %c2 = arith.constant 2 : index
    %c0_32 = arith.constant 0 : index
    %c0_33 = arith.constant 0 : index
    %41 = vector.load %arg3[%c0_31, %c2, %c0_32, %c0_33] : memref<1x4x8x8xf32, #tpu.memory_space<vmem>>, vector<1x1x8x8xf32>
    %42 = vector.shape_cast %41 : vector<1x1x8x8xf32> to vector<8x8xf32>
    %43 = arith.truncf %42 : vector<8x8xf32> to vector<8x8xbf16>
    %44 = arith.extf %43 : vector<8x8xbf16> to vector<8x8xf32>
    %45 = arith.subf %42, %44 : vector<8x8xf32>
    %46 = arith.truncf %45 : vector<8x8xf32> to vector<8x8xbf16>
    %47 = arith.extf %46 : vector<8x8xbf16> to vector<8x8xf32>
    %48 = arith.subf %45, %47 : vector<8x8xf32>
    %49 = arith.truncf %48 : vector<8x8xf32> to vector<8x8xbf16>
    %50 = tpu.concatenate %43, %46, %49 in 0 : vector<8x8xbf16>, vector<8x8xbf16>, vector<8x8xbf16> -> vector<24x8xbf16>
    %cst_34 = arith.constant dense<0.000000e+00> : vector<24x16xf32>
    %51 = tpu.matmul %50, %0, %cst_34 {dimension_numbers = #tpu.dot_dimension_numbers<[1], [0], [0], [1], [0, 0, 1, 1], [], []>} : vector<24x8xbf16>, vector<8x16xbf16>, vector<24x16xf32> -> vector<24x16xf32>
    %52 = arith.truncf %51 : vector<24x16xf32> to vector<24x16xbf16>
    %c0_35 = arith.constant 0 : index
    %c0_36 = arith.constant 0 : index
    %53 = vector.load %arg6[%c0_35, %c0_36] : memref<16x24xbf16, #tpu.memory_space<vmem>>, vector<16x24xbf16>
    %cst_37 = arith.constant dense<0.000000e+00> : vector<16x16xf32>
    %54 = tpu.matmul %53, %52, %cst_37 {dimension_numbers = #tpu.dot_dimension_numbers<[1], [0], [0], [1], [0, 0, 1, 1], [], []>} : vector<16x24xbf16>, vector<24x16xbf16>, vector<16x16xf32> -> vector<16x16xf32>
    %c0_38 = arith.constant 0 : index
    %c2_39 = arith.constant 2 : index
    %c0_40 = arith.constant 0 : index
    %c0_41 = arith.constant 0 : index
    %55 = vector.load %arg4[%c0_38, %c2_39, %c0_40, %c0_41] : memref<1x4x16x16xf32, #tpu.memory_space<vmem>>, vector<1x1x16x16xf32>
    %56 = vector.shape_cast %55 : vector<1x1x16x16xf32> to vector<16x16xf32>
    %57 = arith.mulf %54, %56 : vector<16x16xf32>
    %c0_42 = arith.constant 0 : index
    %c2_43 = arith.constant 2 : index
    %c0_44 = arith.constant 0 : index
    %c0_45 = arith.constant 0 : index
    %58 = vector.load %arg7[%c0_42, %c2_43, %c0_44, %c0_45] : memref<1x4x16x16xf32, #tpu.memory_space<vmem>>, vector<1x1x16x16xf32>
    %59 = vector.shape_cast %58 : vector<1x1x16x16xf32> to vector<16x16xf32>
    %60 = vector.shape_cast %57 : vector<16x16xf32> to vector<1x1x16x16xf32>
    tpu.vector_store %arg7[%c0_42, %c2_43, %c0_44, %c0_45], %60 {strides = array<i32>} : memref<1x4x16x16xf32, #tpu.memory_space<vmem>>, vector<1x1x16x16xf32>,
    %c0_46 = arith.constant 0 : index
    %c3 = arith.constant 3 : index
    %c0_47 = arith.constant 0 : index
    %c0_48 = arith.constant 0 : index
    %61 = vector.load %arg3[%c0_46, %c3, %c0_47, %c0_48] : memref<1x4x8x8xf32, #tpu.memory_space<vmem>>, vector<1x1x8x8xf32>
    %62 = vector.shape_cast %61 : vector<1x1x8x8xf32> to vector<8x8xf32>
    %63 = arith.truncf %62 : vector<8x8xf32> to vector<8x8xbf16>
    %64 = arith.extf %63 : vector<8x8xbf16> to vector<8x8xf32>
    %65 = arith.subf %62, %64 : vector<8x8xf32>
    %66 = arith.truncf %65 : vector<8x8xf32> to vector<8x8xbf16>
    %67 = arith.extf %66 : vector<8x8xbf16> to vector<8x8xf32>
    %68 = arith.subf %65, %67 : vector<8x8xf32>
    %69 = arith.truncf %68 : vector<8x8xf32> to vector<8x8xbf16>
    %70 = tpu.concatenate %63, %66, %69 in 0 : vector<8x8xbf16>, vector<8x8xbf16>, vector<8x8xbf16> -> vector<24x8xbf16>
    %cst_49 = arith.constant dense<0.000000e+00> : vector<24x16xf32>
    %71 = tpu.matmul %70, %0, %cst_49 {dimension_numbers = #tpu.dot_dimension_numbers<[1], [0], [0], [1], [0, 0, 1, 1], [], []>} : vector<24x8xbf16>, vector<8x16xbf16>, vector<24x16xf32> -> vector<24x16xf32>
    %72 = arith.truncf %71 : vector<24x16xf32> to vector<24x16xbf16>
    %c0_50 = arith.constant 0 : index
    %c0_51 = arith.constant 0 : index
    %73 = vector.load %arg6[%c0_50, %c0_51] : memref<16x24xbf16, #tpu.memory_space<vmem>>, vector<16x24xbf16>
    %cst_52 = arith.constant dense<0.000000e+00> : vector<16x16xf32>
    %74 = tpu.matmul %73, %72, %cst_52 {dimension_numbers = #tpu.dot_dimension_numbers<[1], [0], [0], [1], [0, 0, 1, 1], [], []>} : vector<16x24xbf16>, vector<24x16xbf16>, vector<16x16xf32> -> vector<16x16xf32>
    %c0_53 = arith.constant 0 : index
    %c3_54 = arith.constant 3 : index
    %c0_55 = arith.constant 0 : index
    %c0_56 = arith.constant 0 : index
    %75 = vector.load %arg4[%c0_53, %c3_54, %c0_55, %c0_56] : memref<1x4x16x16xf32, #tpu.memory_space<vmem>>, vector<1x1x16x16xf32>
    %76 = vector.shape_cast %75 : vector<1x1x16x16xf32> to vector<16x16xf32>
    %77 = arith.mulf %74, %76 : vector<16x16xf32>
    %c0_57 = arith.constant 0 : index
    %c3_58 = arith.constant 3 : index
    %c0_59 = arith.constant 0 : index
    %c0_60 = arith.constant 0 : index
    %78 = vector.load %arg7[%c0_57, %c3_58, %c0_59, %c0_60] : memref<1x4x16x16xf32, #tpu.memory_space<vmem>>, vector<1x1x16x16xf32>
    %79 = vector.shape_cast %78 : vector<1x1x16x16xf32> to vector<16x16xf32>
    %80 = vector.shape_cast %77 : vector<16x16xf32> to vector<1x1x16x16xf32>
    tpu.vector_store %arg7[%c0_57, %c3_58, %c0_59, %c0_60], %80 {strides = array<i32>} : memref<1x4x16x16xf32, #tpu.memory_space<vmem>>, vector<1x1x16x16xf32>,
    return
  }
  func.func @transform_0(%arg0: i32, %arg1: i32, %arg2: i32) -> (i32, i32, i32, i32) {
    %c0_i32 = arith.constant 0 : i32
    %c0_i32_0 = arith.constant 0 : i32
    return %arg0, %c0_i32, %arg1, %arg2 : i32, i32, i32, i32
  }
  func.func @transform_1(%arg0: i32, %arg1: i32, %arg2: i32) -> (i32, i32, i32, i32) {
    %c0_i32 = arith.constant 0 : i32
    %c0_i32_0 = arith.constant 0 : i32
    return %arg0, %c0_i32, %arg1, %arg2 : i32, i32, i32, i32
  }
  func.func @transform_2(%arg0: i32, %arg1: i32, %arg2: i32) -> (i32, i32) {
    %c0_i32 = arith.constant 0 : i32
    %c0_i32_0 = arith.constant 0 : i32
    %c0_i32_1 = arith.constant 0 : i32
    return %c0_i32, %c0_i32_0 : i32, i32
  }
  func.func @transform_3(%arg0: i32, %arg1: i32, %arg2: i32) -> (i32, i32) {
    %c0_i32 = arith.constant 0 : i32
    %c0_i32_0 = arith.constant 0 : i32
    %c0_i32_1 = arith.constant 0 : i32
    return %c0_i32, %c0_i32_0 : i32, i32
  }
  func.func @transform_4(%arg0: i32, %arg1: i32, %arg2: i32) -> (i32, i32, i32, i32) {
    %c0_i32 = arith.constant 0 : i32
    %c0_i32_0 = arith.constant 0 : i32
    return %arg0, %c0_i32, %arg1, %arg2 : i32, i32, i32, i32
  }
}

</mosaic_0001>

<bundles_post_ra>
// kernel: attention_gate_forward.3
= control target key start
LH: loop header
LB: loop body
LE: loop exit
PB: predicated region body
PF: predicated region fallthrough
CT: control target
= control target key end

     0   :  { %9 = vsyncpa [#allocation3], 0  ;;  %s1448_s0 = inlined_call_operand.vmem [shape: f32[2,4,8,8], index: 0, kind: input, shape index: {}]   ;;  %s1449_s1 = inlined_call_operand.vmem [shape: f32[2,4,16,16], index: 1, kind: input, shape index: {}]   ;;  %s1450_s2 = inlined_call_operand.vmem [shape: bf16[8,16], index: 2, kind: input, shape index: {}]   ;;  %s1451_s3 = inlined_call_operand.vmem [shape: bf16[16,24], index: 3, kind: input, shape index: {}]   ;;  %s1452_s4 = inlined_call_operand.hbm [shape: f32[2,4,16,16], index: 4, kind: output, shape index: {}]  }
   0x1   :  { %11 = vsyncpa [#allocation3 + $0x1], 0  ;;  %s1249_s15 = smov 0   ;;  %s1251_s16 = smov 0  }
   0x2   :  { %s1253_s17 = smov 0   ;;  %s1255_s18 = smov 0  }
   0x3   :  { %s1257_s19 = smov 0   ;;  %s1259_s20 = smov 0  }
   0x4 LB: > { %s943_s21 = sadd.s32 4294967295, %s1217_s20   ;;  %s944_s22 = sadd.s32 4294967294, %s1217_s20   ;;  %s1217_s20 = sphi %s1259_s20, %s17_s20   ;;  %s1213_s19 = sphi %s1257_s19, %s1459_s19   ;;  %s1209_s18 = sphi %s1255_s18, %s1458_s18   ;;  %s1205_s17 = sphi %s1253_s17, %s1457_s17   ;;  %s1201_s16 = sphi %s1251_s16, %s1456_s16   ;;  %s1197_s15 = sphi %s1249_s15, %s1455_s15  }
   0x5   : > { %s36_s23 = sadd.s32 1, %s1213_s19  ;;  %s149_s24 = sadd.s32 1, %s1205_s17 }
   0x6   : > { %p38_p0 = scmp.ge.s32.totalorder %s36_s23, 2  ;;  %p159_p1 = scmp.ne.s32.totalorder %s1205_s17, %s1201_s16 }
   0x7   : > { %p160_p2 = scmp.eq.s32.totalorder %s943_s21, 1  ;;  %p165_p3 = scmp.ne.s32.totalorder %s1201_s16, %s1197_s15 }
   0x8   : > { %s1461_s23 = smov (%p38_p0, %s36_s23), 0  ;;  %p166_p5 = scmp.eq.s32.totalorder %s944_s22, 1 }
   0x9   : > { %p1289_p4 = por %p160_p2, %p159_p1  ;;  %s142_s26 = ssub.s32 %s1213_s19, %s1461_s23 }
   0xa   : > { %p947_p6 = scmp.ge.s32.totalorder %s1217_s20, 1  ;;  %p147_p7 = scmp.eq.s32.totalorder %s142_s26, 0 }
   0xb   : > { %p1296_p8 = por %p166_p5, %p165_p3  ;;  %p220_p9 = scmp.lt.s32.totalorder %s1217_s20, 3 }
   0xc   : > { %s1302_s28 = scalar_select %p147_p7, %s1205_s17, %s149_s24  }
   0xd   : > { %p221_p10 = pnand %p947_p6, %p220_p9 }
   0xe   : > { %v290_v0 = vld [vmem:[%s1450_s2] sm:$0xf] (!%p221_p10)  ;;  %vm301_vm0 = vcmask (!%p221_p10), 1043456   ;;  %p264_p11 = scmp.lt.s32.totalorder (!%p221_p10), %s1209_s18, 1  ;;  %vm305_vm1 = vcmask (!%p221_p10), 64512   ;;  %v1219_v42 = vmov (!%p221_p10), 0.0  }
   0xf   : > { %224 = sbr.rel (%p221_p10) target bundleno = 520 (0x208), region = 36  ;;  %1072 = vmatprep.subr.msk.bf16.mxu0 (!%p221_p10), %vm301_vm0, %v290_v0  ;;  %v312_v1 = vsel (!%p221_p10), %vm301_vm0, %v290_v0, 0  ;;  %1022 = vmatprep.subr.bf16.mxu1 (!%p221_p10), %v1219_v42  ;;  %vm1220_vm2 = vmmov (!%p221_p10), 0   ;;  %v1135_v52 = vld [vmem:[%s1451_s3] sm:$0xff] (!%p221_p10)   ;;  %vm371_vm3 = vcmask (!%p221_p10), 195584   ;;  %s261_s29 = sand.u32 (!%p221_p10), 1, %s1201_s16  }
  0x10   : > { %1017 = vmatpush3.bf16.msra.mxu0 (!%p221_p10), %v312_v1  ;;  %1026 = vmatprep.mubr.msk.bf16.mxu1 (!%p221_p10), %vm1220_vm2, %v1219_v42  ;;  %v1136_v60 = vld [vmem:[%s1451_s3] sm:$0xff] (!%p221_p10)   ;;  %s948_s8 = sshll.u32 (!%p221_p10), %s261_s29, 6  ;;  %vm423_vm4 = vcmask (!%p221_p10), 130048   ;;  %s1221_s21 = smov (!%p221_p10), [#allocation2]  }
  0x11   : > { %1073 = vmatprep.subr.msk.bf16.mxu0 (!%p221_p10), %vm301_vm0, %v290_v0  ;;  %s1143_s22 = sshll.u32 (!%p221_p10), %s1221_s21, 4  ;;  %s1144_s22 = int_to_ptr.vmem [resolvable:$false] %s1143_s22 }
  0x12   : > { %s1145_s24 = scalar_lea.vmem (!%p221_p10), %s1144_s22, 2048 }
  0x16   : > { %s1311_s5 = scalar_select %p264_p11, %s1209_s18, 1 }
  0x18   : > { %s989_s6 = sshll.u32 %s1311_s5, 5  ;;  %s990_s26 = sshll.u32 %s1311_s5, 6 }
  0x19   : > { %s274_s9 = scalar_lea.vmem %s1448_s0, %s989_s6  ;;  %s1361_s7 = scalar_lea.vmem %s1449_s1, %s990_s26 }
  0x1a   : > { %v291_v2 = vld [vmem:[%s274_s9] sm:$0xff]  ;;  %v957_v3 = vld [vmem:[%s274_s9 + $0x8] sm:$0xff]  ;;  %v966_v4 = vld [vmem:[%s274_s9 + $0x10] sm:$0xff]  ;;  %s1367_s5 = scalar_lea.vmem [#allocation2], %s948_s8 }
  0x1b   : > { %v292_v5 = vpack.c.bf16 %v291_v2, %v291_v2  ;;  %v428_v6 = vpack.c.bf16 %v957_v3, %v957_v3  ;;  %v559_v9 = vpack.c.bf16 %v966_v4, %v966_v4  ;;  %v975_v15 = vld [vmem:[%s274_s9 + $0x18] sm:$0xff]  ;;  %s991_s9 = sshll.u32 %s1209_s18, 10  ;;  %s836_s10 = sshll.u32 %s1367_s5, 4  ;;  %s1394_s10 = int_to_ptr.vmem [resolvable:$true] %s836_s10 }
  0x1c   : > { %v690_v19 = vpack.c.bf16 %v975_v15, %v975_v15  ;;  %s1392_s13 = scalar_lea.hbm %s1452_s4, %s991_s9  ;;  %s1402_s18 = scalar_lea.sflag [#allocation3], %s261_s29 }
  0x1d   : > { %v293_v7 = vunpack.c.l.bf16 %v292_v5  ;;  %v429_v8 = vunpack.c.l.bf16 %v428_v6  ;;  %v560_v14 = vunpack.c.l.bf16 %v559_v9  ;;  %s1139_s14 = scalar_lea.vmem %s1394_s10, 1024  ;;  %p1146_p1 = scmp.lt.s32.totalorder %s1394_s10, %s1144_s22 }
  0x1e   : > { %v691_v28 = vunpack.c.l.bf16 %v690_v19  ;;  %p1140_p12 = scmp.ne.s32.totalorder %s1394_s10, %s1139_s14  ;;  %p1147_p2 = scmp.lt.s32.totalorder %s1145_s24, %s1139_s14 }
  0x1f   : > { %v294_v10 = vsub.f32 %v291_v2, %v293_v7  ;;  %v430_v11 = vsub.f32 %v957_v3, %v429_v8  ;;  %v561_v23 = vsub.f32 %v966_v4, %v560_v14  ;;  %v1137_v4 = vld [vmem:[%s1451_s3] sm:$0xff]  }
  0x20   : > { %v692_v32 = vsub.f32 %v975_v15, %v691_v28  ;;  %p1141_p13 = pnand %p1140_p12, %p1289_p4  ;;  %p1148_p3 = por %p1147_p2, %p1146_p1 }
  0x21   : > { %v295_v12 = vpack.c.bf16 %v294_v10, %v294_v10  ;;  %v431_v13 = vpack.c.bf16 %v430_v11, %v430_v11  ;;  %v562_v27 = vpack.c.bf16 %v561_v23, %v561_v23 }
  0x22   : > { %v693_v35 = vpack.c.bf16 %v692_v32, %v692_v32  ;;  %p1142_p0 = pneg %p1141_p13 }
  0x23   : > { %v296_v16 = vunpack.c.l.bf16 %v295_v12  ;;  %v300_v17 = vrot.slane %v295_v12, 4  ;;  %v436_v18 = vrot.slane %v431_v13, 4  ;;  %v432_v22 = vunpack.c.l.bf16 %v431_v13  ;;  %v420_v13 = vld [vmem:[%s1361_s7 + $0x8] sm:$0xff] }
  0x24   : > { %v567_v29 = vrot.slane %v562_v27, 4  ;;  %v563_v31 = vunpack.c.l.bf16 %v562_v27  ;;  %v698_v36 = vrot.slane %v693_v35, 4  ;;  %v694_v38 = vunpack.c.l.bf16 %v693_v35  ;;  %v971_v27 = vld [vmem:[%s1361_s7 + $0x20] sm:$0xff]  ;;  %v980_v35 = vld [vmem:[%s1361_s7 + $0x30] sm:$0xff]  ;;  %p1149_p5 = pnand %p1148_p3, %p1142_p0 }
  0x25   : > { %v304_v20 = vsel %vm301_vm0, %v292_v5, %v300_v17  ;;  %v297_v21 = vsub.f32 %v294_v10, %v296_v16  ;;  %v439_v25 = vsel %vm301_vm0, %v428_v6, %v436_v18  ;;  %v433_v26 = vsub.f32 %v430_v11, %v432_v22  ;;  %v1138_v10 = vld [vmem:[%s1451_s3] sm:$0xff]  }
  0x26   : > { %1018 = vmatprep.mubr.msk.bf16.mxu0 %vm305_vm1, %v304_v20  ;;  %v570_v33 = vsel %vm301_vm0, %v559_v9, %v567_v29  ;;  %v564_v34 = vsub.f32 %v561_v23, %v563_v31  ;;  %v701_v39 = vsel %vm301_vm0, %v690_v19, %v698_v36  ;;  %v695_v40 = vsub.f32 %v692_v32, %v694_v38  ;;  %v419_v11 = vld [vmem:[%s1361_s7] sm:$0xff]  ;;  %v962_v19 = vld [vmem:[%s1361_s7 + $0x10] sm:$0xff]  ;;  %v972_v29 = vld [vmem:[%s1361_s7 + $0x28] sm:$0xff] }
  0x27   : > { %v298_v24 = vpack.c.bf16 %v297_v21, %v297_v21  ;;  %v434_v30 = vpack.c.bf16 %v433_v26, %v433_v26  ;;  %v963_v21 = vld [vmem:[%s1361_s7 + $0x18] sm:$0xff] }
  0x28   : > { %v565_v37 = vpack.c.bf16 %v564_v34, %v564_v34  ;;  %v696_v41 = vpack.c.bf16 %v695_v40, %v695_v40 }
  0x29   : > { %1019 = vmatmul.mubr.msk.bf16.vlgmr.msra.gmra.mrb[0].mxu0 %vm305_vm1, %v298_v24 }
  0x2a   : > { %1031 = vmatpush3.bf16.msra.mxu0 %v312_v1  ;;  %1032 = vmatprep.mubr.msk.bf16.mxu0 %vm305_vm1, %v439_v25 }
  0x2b   : > { %1074 = vmatprep.subr.msk.bf16.mxu0 %vm301_vm0, %v290_v0 }
  0x31   : > { %1033 = vmatmul.mubr.msk.bf16.vlgmr.msra.gmra.mrb[4].mxu0 %vm305_vm1, %v434_v30 }
  0x32   : > { %1045 = vmatpush3.bf16.msra.mxu0 %v312_v1  ;;  %1046 = vmatprep.mubr.msk.bf16.mxu0 %vm305_vm1, %v570_v33 }
  0x33   : > { %1075 = vmatprep.subr.msk.bf16.mxu0 %vm301_vm0, %v290_v0 }
  0x39   : > { %1047 = vmatmul.mubr.msk.bf16.vlgmr.msra.gmra.mrb[8].mxu0 %vm305_vm1, %v565_v37  ;;  %v981_v37 = vld [vmem:[%s1361_s7 + $0x38] sm:$0xff] }
  0x3a   : > { %1059 = vmatpush3.bf16.msra.mxu0 %v312_v1  ;;  %1060 = vmatprep.mubr.msk.bf16.mxu0 %vm305_vm1, %v701_v39 }
  0x41   : > { %1061 = vmatmul.mubr.msk.bf16.vlgmr.msra.gmra.mrb[12].mxu0 %vm305_vm1, %v696_v41 }
  0xfc   : > { %v1020_v43 = vpop.f32.mrb[0].mxu0 }
  0xfd   : > { %v348_v44 = vpop.f32.mrb[1].mxu0  ;;  %v363_v48 = vpack.c.bf16 %v1020_v43, %v1020_v43 }
  0xfe   : > { %v1021_v45 = vpop.f32.mrb[2].mxu0 }
  0xff   : > { %v351_v46 = vpop.f32.mrb[3].mxu0  ;;  %v376_v51 = vsel %vm301_vm0, %v363_v48, 0 }
 0x100   : > { %v362_v47 = vpack.c.bf16 %v351_v46, %v348_v44 }
 0x102   : > { %1023 = vmatpush3.bf16.msra.mxu1 %v362_v47 }
 0x103   : > { %1024 = vmatprep.subr.bf16.mxu1 %v1219_v42 }
 0x104   : > { %v1034_v49 = vpop.f32.mrb[4].mxu0 }
 0x105   : > { %v479_v50 = vpop.f32.mrb[5].mxu0  ;;  %v494_v56 = vpack.c.bf16 %v1034_v49, %v1034_v49 }
 0x106   : > { %1025 = vmatpush3.bf16.msra.mxu1 %v376_v51  ;;  %v1035_v53 = vpop.f32.mrb[6].mxu0 }
 0x107   : > { %v482_v54 = vpop.f32.mrb[7].mxu0  ;;  %1036 = vmatprep.subr.bf16.mxu1 %v1219_v42  ;;  %v506_v58 = vsel %vm301_vm0, %v494_v56, 0 }
 0x108   : > { %v493_v55 = vpack.c.bf16 %v482_v54, %v479_v50 }
 0x109   : > { %1027 = vmatmul.mubr.msk.bf16.vlgmr.msra.gmra.mrb[0].mxu1 %vm371_vm3, %v1135_v52 }
 0x10a   : > { %1037 = vmatpush3.bf16.msra.mxu1 %v493_v55  ;;  %1040 = vmatprep.mubr.msk.bf16.mxu1 %vm1220_vm2, %v1219_v42 }
 0x10b   : > { %1038 = vmatprep.subr.bf16.mxu1 %v1219_v42 }
 0x10c   : > { %v1048_v57 = vpop.f32.mrb[8].mxu0 }
 0x10d   : > { %v610_v59 = vpop.f32.mrb[9].mxu0  ;;  %v625_v0 = vpack.c.bf16 %v1048_v57, %v1048_v57 }
 0x10e   : > { %1039 = vmatpush3.bf16.msra.mxu1 %v506_v58  ;;  %v1049_v61 = vpop.f32.mrb[10].mxu0 }
 0x10f   : > { %v613_v62 = vpop.f32.mrb[11].mxu0  ;;  %1050 = vmatprep.subr.bf16.mxu1 %v1219_v42  ;;  %v637_v2 = vsel %vm301_vm0, %v625_v0, 0 }
 0x110   : > { %v624_v63 = vpack.c.bf16 %v613_v62, %v610_v59 }
 0x111   : > { %1041 = vmatmul.mubr.msk.bf16.vlgmr.msra.gmra.mrb[4].mxu1 %vm371_vm3, %v1136_v60 }
 0x112   : > { %1051 = vmatpush3.bf16.msra.mxu1 %v624_v63  ;;  %1054 = vmatprep.mubr.msk.bf16.mxu1 %vm1220_vm2, %v1219_v42 }
 0x113   : > { %1052 = vmatprep.subr.bf16.mxu1 %v1219_v42 }
 0x114   : > { %v1062_v1 = vpop.f32.mrb[12].mxu0 }
 0x115   : > { %v741_v3 = vpop.f32.mrb[13].mxu0  ;;  %v756_v8 = vpack.c.bf16 %v1062_v1, %v1062_v1 }
 0x116   : > { %1053 = vmatpush3.bf16.msra.mxu1 %v637_v2  ;;  %v1063_v5 = vpop.f32.mrb[14].mxu0 }
 0x117   : > { %v744_v6 = vpop.f32.mrb[15].mxu0  ;;  %1064 = vmatprep.subr.bf16.mxu1 %v1219_v42  ;;  %v768_v9 = vsel %vm301_vm0, %v756_v8, 0 }
 0x118   : > { %v755_v7 = vpack.c.bf16 %v744_v6, %v741_v3 }
 0x119   : > { %1055 = vmatmul.mubr.msk.bf16.vlgmr.msra.gmra.mrb[8].mxu1 %vm371_vm3, %v1137_v4 }
 0x11a   : > { %1065 = vmatpush3.bf16.msra.mxu1 %v755_v7  ;;  %1068 = vmatprep.mubr.msk.bf16.mxu1 %vm1220_vm2, %v1219_v42 }
 0x11b   : > { %1066 = vmatprep.subr.bf16.mxu1 %v1219_v42 }
 0x11e   : > { %1067 = vmatpush3.bf16.msra.mxu1 %v768_v9 }
 0x121   : > { %1069 = vmatmul.mubr.msk.bf16.vlgmr.msra.gmra.mrb[12].mxu1 %vm371_vm3, %v1138_v10 }
 0x1dc   : > { %v412_v12 = vpop.f32.mrb[0].mxu1 }
 0x1dd   : > { %v421_v14 = vmul.f32 %v419_v11, %v412_v12  ;;  %v1028_v15 = vpop.f32.mrb[1].mxu1 }
 0x1de   : > { %v415_v16 = vpop.f32.mrb[2].mxu1 }
 0x1df   : > { %424 = vst.msk [vmem:[%s1367_s5] sm:$0xff] %vm423_vm4, %v421_v14  ;;  %v422_v17 = vmul.f32 %v420_v13, %v415_v16  ;;  %v1029_v18 = vpop.f32.mrb[3].mxu1 }
 0x1e1   : > { %425 = vst.msk [vmem:[%s1367_s5 + $0x8] sm:$0xff] %vm423_vm4, %v422_v17 }
 0x1e4   : > { %v542_v20 = vpop.f32.mrb[4].mxu1 }
 0x1e5   : > { %v552_v22 = vmul.f32 %v962_v19, %v542_v20  ;;  %v1042_v23 = vpop.f32.mrb[5].mxu1 }
 0x1e6   : > { %v545_v24 = vpop.f32.mrb[6].mxu1 }
 0x1e7   : > { %964 = vst.msk [vmem:[%s1367_s5 + $0x10] sm:$0xff] %vm423_vm4, %v552_v22  ;;  %v553_v25 = vmul.f32 %v963_v21, %v545_v24  ;;  %v1043_v26 = vpop.f32.mrb[7].mxu1 }
 0x1e9   : > { %965 = vst.msk [vmem:[%s1367_s5 + $0x18] sm:$0xff] %vm423_vm4, %v553_v25 }
 0x1ec   : > { %v673_v28 = vpop.f32.mrb[8].mxu1 }
 0x1ed   : > { %v683_v30 = vmul.f32 %v971_v27, %v673_v28  ;;  %v1056_v31 = vpop.f32.mrb[9].mxu1 }
 0x1ee   : > { %v676_v32 = vpop.f32.mrb[10].mxu1 }
 0x1ef   : > { %973 = vst.msk [vmem:[%s1367_s5 + $0x20] sm:$0xff] %vm423_vm4, %v683_v30  ;;  %v684_v33 = vmul.f32 %v972_v29, %v676_v32  ;;  %v1057_v34 = vpop.f32.mrb[11].mxu1 }
 0x1f1   : > { %974 = vst.msk [vmem:[%s1367_s5 + $0x28] sm:$0xff] %vm423_vm4, %v684_v33 }
 0x1f4   : > { %v804_v36 = vpop.f32.mrb[12].mxu1 }
 0x1f5   : > { %v814_v38 = vmul.f32 %v980_v35, %v804_v36  ;;  %v1070_v39 = vpop.f32.mrb[13].mxu1 }
 0x1f6   : > { %v807_v40 = vpop.f32.mrb[14].mxu1 }
 0x1f7   : > { %982 = vst.msk [vmem:[%s1367_s5 + $0x30] sm:$0xff] %vm423_vm4, %v814_v38  ;;  %v815_v41 = vmul.f32 %v981_v37, %v807_v40  ;;  %v1071_v42 = vpop.f32.mrb[15].mxu1 }
 0x1f9   : > { %983 = vst.msk [vmem:[%s1367_s5 + $0x38] sm:$0xff] %vm423_vm4, %v815_v41 }
 0x1fa   : > { %1152 = shalt.err (!%p1149_p5)
}
 0x1fb   : > { %s1153_s26 = scalar_lea.hbm %s1392_s13, 1024  ;;  %s1157_s6 = scalar_lea.hbm %s1452_s4, 2048 }
 0x1fc   : > { %p1154_p6 = scmp.ne.s32.totalorder %s1392_s13, %s1153_s26  ;;  %p1158_p10 = scmp.lt.u32.totalorder %s1392_s13, %s1452_s4 }
 0x1fd   : > { %p1159_p11 = scmp.lt.u32.totalorder %s1157_s6, %s1153_s26  ;;  %p1161_p13 = scmp.lt.u32.totalorder %s1153_s26, %s1392_s13 }
 0x1fe   : > { %p1155_p7 = pnand %p1154_p6, %p1289_p4 }
 0x1ff   : > { %p1160_p12 = por %p1159_p11, %p1158_p10 }
 0x200   : > { %p1156_p9 = pneg %p1155_p7 }
 0x201   : > { %p1162_p0 = por %p1161_p13, %p1160_p12 }
 0x203   : > { %p1163_p1 = pnand %p1162_p0, %p1156_p9 }
 0x205   : > { %1166 = shalt.err (!%p1163_p1)
}
 0x206   : > { %s1222_s5 = smov 128   ;;  %s1223_s9 = smov 8  }
 0x207   : > { %1076 = dma.vmem_to_hbm [thread:$0]  (%p1289_p4), %s1394_s10, 1024, %s1392_s13, %s1402_s18, %s1222_s5, %s1222_s5, %s1223_s9  }
 0x208 PF: > { %p1082_p2 = scmp.ge.s32.totalorder %s1217_s20, 2  ;;  %s851_s11 = sand.u32 1, %s1197_s15  }
 0x209   : > { %s852_s12 = scalar_lea.sflag [#allocation3], %s851_s11 }
 0x20a   : > { %p1079_p3 = pnand %p1082_p2, %p1296_p8 }
 0x20c   : > { %1192 = dma.done.wait (!%p1079_p3), %s852_s12, 1024  }
 0x20d   : > { %1194 = vsyncadd (!%p1079_p3), %s852_s12, 4294966272  ;;  %s17_s20 = sadd.s32 1, %s1217_s20   ;;  %s1455_s15 = smov %s1201_s16 }
 0x20e   : > { %p14_p5 = scmp.ge.s32.totalorder %s17_s20, 4   ;;  %s1456_s16 = smov %s1205_s17 }
 0x20f   : > { %s1457_s17 = smov %s1302_s28  ;;  %s1458_s18 = smov %s1213_s19 }
 0x210   : > { %s1459_s19 = smov %s1461_s23  ;;  %16 = sbr.rel (!%p14_p5) target bundleno = 4 (0x4), region = 83 }
 0x217   :  { %857 = vsyncpa [#allocation3], 1 }
 0x218   :  { %859 = vsyncpa [#allocation3 + $0x1], 1 }

// kernel: attention_gate_forward.2
= control target key start
LH: loop header
LB: loop body
LE: loop exit
PB: predicated region body
PF: predicated region fallthrough
CT: control target
= control target key end

     0   :  { %s3005_s0 = inlined_call_operand.vmem [shape: f32[2,4,16,128], index: 0, kind: input, shape index: {}]   ;;  %s3006_s1 = inlined_call_operand.vmem [shape: f32[2,8,16,128], index: 1, kind: input, shape index: {}]   ;;  %s3007_s2 = inlined_call_operand.vmem [shape: f32[4,8], index: 2, kind: input, shape index: {}]   ;;  %s3008_s3 = inlined_call_operand.vmem [shape: f32[8,8], index: 3, kind: input, shape index: {}]   ;;  %s3009_s4 = inlined_call_operand.vmem [shape: f32[8,4], index: 4, kind: input, shape index: {}]   ;;  %s3010_s5 = inlined_call_operand.vmem [shape: f32[8], index: 5, kind: input, shape index: {}]   ;;  %s3011_s6 = inlined_call_operand.vmem [shape: f32[4], index: 6, kind: input, shape index: {}]   ;;  %s3012_s7 = inlined_call_operand.vmem [shape: f32[2,4,16,128], index: 7, kind: output, shape index: {}]  }
   0x1   :  { %3022 = sst [smem:[#allocation21_spill]] %s3005_s0 }
   0x2   :  { %3023 = sst [smem:[#allocation22_spill]] %s3006_s1 }
   0x3   :  { %3024 = sst [smem:[#allocation23_spill]] %s3007_s2 }
   0x4   :  { %3025 = sst [smem:[#allocation24_spill]] %s3008_s3 }
   0x5   :  { %3026 = sst [smem:[#allocation25_spill]] %s3009_s4 }
   0x6   :  { %3027 = sst [smem:[#allocation26_spill]] %s3010_s5 }
   0x7   :  { %3028 = sst [smem:[#allocation27_spill]] %s3011_s6 }
   0x8   :  { %12 = vsyncpa [#allocation3], 0 }
   0x9   :  { %13 = vsyncpa [#allocation5], 0 }
   0xa   :  { %14 = vsyncpa [#allocation8], 0  ;;  %s1974_s24 = smov 0   ;;  %s1976_s25 = smov 0  }
   0xb   :  { %s1978_s26 = smov 0  }
   0xc LB: > { %3029 = sst [smem:[#allocation13_spill]] %s1923_s25  ;;  %s3030_s3 = sld [smem:[#allocation24_spill]]  ;;  %s1927_s26 = sphi %s1978_s26, %s20_s26   ;;  %s1923_s25 = sphi %s1976_s25, %s3086_s25   ;;  %s1919_s24 = sphi %s1974_s24, %s3085_s24  }
   0xd   : > { %s1494_s30 = sadd.s32 4294967295, %s1927_s26   ;;  %p1496_p0 = scmp.ge.s32.totalorder %s1927_s26, 1 }
   0xe   : > { %p226_p1 = scmp.lt.s32.totalorder %s1927_s26, 3  ;;  %p1995_p2 = scmp.eq.s32.totalorder %s1494_s30, 0 }
   0xf   : > { %s3033_s5 = sld [smem:[#allocation26_spill]]  ;;  %s32_s14 = sadd.s32 1, %s1923_s25 }
  0x10   : > { %s3031_s8 = scalar_select %p1995_p2, 1, 0 }
  0x11   : > { %p1999_p3 = pnand %p1496_p0, %p226_p1  ;;  %s3035_s2 = sld [smem:[#allocation23_spill]] }
  0x12   : > { %s250_s29 = sshll.u32 %s3030_s3, 4  ;;  %p2018_p6 = scmp.ge.s32.totalorder %s32_s14, 2  ;;  %s251_s29 = int_to_ptr.vmem [resolvable:$true] %s250_s29 }
  0x13   : > { %s3032_s9 = scalar_select %p1999_p3, 1, 0 }
  0x14   : > { %p1709_p4 = pneg %p1999_p3  ;;  %s1818_s19 = scalar_lea.vmem %s251_s29, 128 }
  0x15   : > { %s272_s12 = sshll.u32 %s3033_s5, 4  ;;  %p1819_p7 = scmp.ne.s32.totalorder %s251_s29, %s1818_s19  ;;  %s273_s12 = int_to_ptr.vmem [resolvable:$true] %s272_s12 }
  0x16   : > { %p2010_p5 = pnand %p1995_p2, %p1709_p4  ;;  %p1826_p11 = scmp.lt.s32.totalorder %s251_s29, %s251_s29 }
  0x17   : > { %s239_s17 = sshll.u32 %s3035_s2, 4  ;;  %p1827_p12 = scmp.lt.s32.totalorder %s1818_s19, %s1818_s19  ;;  %s240_s17 = int_to_ptr.vmem [resolvable:$true] %s239_s17 }
  0x18   : > { %s3036_s18 = scalar_select %p2018_p6, 1, 0 }
  0x19   : > { %p2024_p8 = pneg %p2010_p5  ;;  %p1828_p13 = por %p1827_p12, %p1826_p11 }
  0x1b   : > { %p1821_p9 = pnand %p2024_p8, %p1819_p7 }
  0x1d   : > { %p1822_p10 = pneg %p1821_p9 }
  0x1f   : > { %p1829_p0 = pnand %p1828_p13, %p1822_p10 }
  0x21   : > { %1832 = shalt.err (!%p1829_p0)
}
  0x22   : > { %s1929_s21 = smov [#allocation4]   ;;  %s1833_s22 = scalar_lea.vmem %s273_s12, 16 }
  0x23   : > { %1715 = dma.vmem_to_smem (!%p2010_p5), %s251_s29, 128, %s1929_s21, [#allocation5]  }
  0x24   : > { %p1834_p1 = scmp.ne.s32.totalorder %s273_s12, %s1833_s22  ;;  %p1841_p3 = scmp.lt.s32.totalorder %s273_s12, %s273_s12 }
  0x25   : > { %p1842_p6 = scmp.lt.s32.totalorder %s1833_s22, %s1833_s22 }
  0x26   : > { %p1836_p4 = pnand %p1834_p1, %p2024_p8 }
  0x27   : > { %p1843_p7 = por %p1842_p6, %p1841_p3 }
  0x28   : > { %p1837_p2 = pneg %p1836_p4 }
  0x2a   : > { %p1844_p9 = pnand %p1843_p7, %p1837_p2 }
  0x2c   : > { %1847 = shalt.err (!%p1844_p9)
}
  0x2d   : > { %s1930_s23 = smov [#allocation7]   ;;  %p3038_p10 = scmp.ne.s32.totalorder %s3036_s18, 0 }
  0x2e   : > { %1721 = dma.vmem_to_smem (!%p2010_p5), %s273_s12, 16, %s1930_s23, [#allocation8]  }
  0x2f   : > { %s3088_s14 = smov (%p3038_p10, %s32_s14), 0  ;;  %s1848_s27 = scalar_lea.vmem %s240_s17, 64 }
  0x30   : > { %3039 = sst [smem:[#allocation14_spill]] %s3088_s14  ;;  %p1849_p11 = scmp.ne.s32.totalorder %s240_s17, %s1848_s27 }
  0x31   : > { %p1856_p0 = scmp.lt.s32.totalorder %s240_s17, %s240_s17  ;;  %p1857_p1 = scmp.lt.s32.totalorder %s1848_s27, %s1848_s27 }
  0x32   : > { %p1851_p12 = pnand %p1849_p11, %p2024_p8 }
  0x33   : > { %p1858_p3 = por %p1857_p1, %p1856_p0 }
  0x34   : > { %p1852_p13 = pneg %p1851_p12 }
  0x36   : > { %p1859_p2 = pnand %p1858_p3, %p1852_p13 }
  0x38   : > { %1862 = shalt.err (!%p1859_p2)
}
  0x39   : > { %s1931_s28 = smov [#allocation2]   ;;  %s3040_s4 = sld [smem:[#allocation25_spill]] }
  0x3a   : > { %1712 = dma.vmem_to_smem (!%p2010_p5), %s240_s17, 64, %s1931_s28, [#allocation3]  }
  0x3b   : > { %s3041_s6 = sld [smem:[#allocation27_spill]] }
  0x3f   : > { %s261_s10 = sshll.u32 %s3040_s4, 4  ;;  %s262_s10 = int_to_ptr.vmem [resolvable:$true] %s261_s10 }
  0x40   : > { %s1863_s16 = scalar_lea.vmem %s262_s10, 128  ;;  %p1871_p9 = scmp.lt.s32.totalorder %s262_s10, %s262_s10 }
  0x41   : > { %s283_s15 = sshll.u32 %s3041_s6, 4  ;;  %p1864_p6 = scmp.ne.s32.totalorder %s262_s10, %s1863_s16  ;;  %s284_s15 = int_to_ptr.vmem [resolvable:$true] %s283_s15 }
  0x42   : > { %p1872_p10 = scmp.lt.s32.totalorder %s1863_s16, %s1863_s16 }
  0x43   : > { %p1866_p4 = pnand %p1864_p6, %p2024_p8 }
  0x44   : > { %p1873_p11 = por %p1872_p10, %p1871_p9 }
  0x45   : > { %p1867_p7 = pneg %p1866_p4 }
  0x47   : > { %p1874_p12 = pnand %p1873_p11, %p1867_p7 }
  0x49   : > { %1877 = shalt.err (!%p1874_p12)
}
  0x4a   : > { %s1932_s17 = smov [#allocation6]   ;;  %s1878_s18 = scalar_lea.vmem %s284_s15, 16 }
  0x4b   : > { %1718 = dma.vmem_to_smem (!%p2010_p5), %s262_s10, 128, %s1932_s17, [#allocation5]  }
  0x4c   : > { %p1879_p13 = scmp.ne.s32.totalorder %s284_s15, %s1878_s18  ;;  %p1886_p3 = scmp.lt.s32.totalorder %s284_s15, %s284_s15 }
  0x4d   : > { %p1887_p2 = scmp.lt.s32.totalorder %s1878_s18, %s1878_s18 }
  0x4e   : > { %p1881_p0 = pnand %p1879_p13, %p2024_p8 }
  0x4f   : > { %p1888_p6 = por %p1887_p2, %p1886_p3 }
  0x50   : > { %p1882_p1 = pneg %p1881_p0 }
  0x52   : > { %p1889_p4 = pnand %p1888_p6, %p1882_p1 }
  0x54   : > { %1892 = shalt.err (!%p1889_p4)
}
  0x55   : > { %s1933_s19 = smov [#allocation9]   ;;  %p3042_p7 = scmp.ne.s32.totalorder %s3032_s9, 0 }
  0x56   : > { %1724 = dma.vmem_to_smem (!%p2010_p5), %s284_s15, 16, %s1933_s19, [#allocation8]  }
  0x57   : > { %322 = sbr.rel (%p3042_p7) target bundleno = 319 (0x13f), region = 48 }
  0x5e   : > { %p3043_p9 = scmp.ne.s32.totalorder %s3031_s8, 0 }
  0x60   : > { %1906 = dma.done.wait (%p3043_p9), [#allocation3], 64  }
  0x61   : > { %1908 = vsyncadd (%p3043_p9), [#allocation3], 4294967232 }
  0x62   : > { %1910 = dma.done.wait (%p3043_p9), [#allocation5], 256  }
  0x63   : > { %1912 = vsyncadd (%p3043_p9), [#allocation5], 4294967040 }
  0x64   : > { %1914 = dma.done.wait (%p3043_p9), [#allocation8], 32  }
  0x65   : > { %1916 = vsyncadd (%p3043_p9), [#allocation8], 4294967264 }
  0x66   : > { %344 = sfence }
  0x67   : > { %p389_p5 = scmp.lt.s32.totalorder %s1919_s24, 1  ;;  %s418_s9 = sld [smem:[#allocation2]] }
  0x68   : > { %s2076_s13 = sld [smem:[#allocation2 + $0x1]]  ;;  %s2078_s20 = sld [smem:[#allocation2 + $0x80]] }
  0x69   : > { %s3090_s24 = smov (!%p389_p5, %s1919_s24), 1  ;;  %s2081_s22 = sld [smem:[#allocation2 + $0x2]] }
  0x6a   : > { %s3016_s21 = sshll.u32 %s3090_s24, 6  ;;  %s2083_s8 = sld [smem:[#allocation2 + $0x81]] }
  0x6b   : > { %s2085_s23 = sld [smem:[#allocation2 + $0x3]]  ;;  %s2087_s27 = sld [smem:[#allocation2 + $0x82]] }
  0x6c   : > { %s3044_s0 = sld [smem:[#allocation21_spill]]  ;;  %s2096_s10 = sld [smem:[#allocation2 + $0x100]] }
  0x6d   : > { %s2098_s11 = sld [smem:[#allocation2 + $0x4]]  ;;  %s2100_s12 = sld [smem:[#allocation2 + $0x101]]  ;;  %v599_v1 = vstv %s418_s9 }
  0x6e   : > { %s2102_s15 = sld [smem:[#allocation2 + $0x102]]  ;;  %s2107_s16 = sld [smem:[#allocation2 + $0x180]]  ;;  %v602_v4 = vstv %s2078_s20  ;;  %v674_v5 = vstv %s2076_s13 }
  0x6f   : > { %s2120_s17 = sld [smem:[#allocation2 + $0x181]]  ;;  %v757_v9 = vstv %s2081_s22  ;;  %s2125_s18 = sld [smem:[#allocation2 + $0x182]] }
  0x70   : > { %v677_v8 = vstv %s2083_s8  ;;  %s2131_s19 = sld [smem:[#allocation4]]  ;;  %s2140_s9 = sld [smem:[#allocation2 + $0x5]] }
  0x71   : > { %v760_v13 = vstv %s2087_s27  ;;  %v840_v18 = vstv %s2085_s23  ;;  %s1687_s13 = sshll.u32 %s3090_s24, 7  ;;  %s2150_s20 = sld [smem:[#allocation4 + $0x1]] }
  0x72   : > { %s2094_s30 = scalar_lea.vmem %s3044_s0, %s3016_s21  ;;  %v607_v16 = vstv %s2096_s10  ;;  %s2161_s22 = sld [smem:[#allocation4 + $0x2]] }
  0x73   : > { %v2105_v0 = vld [vmem:[%s2094_s30] sm:$0xff]  ;;  %v2110_v2 = vld [vmem:[%s2094_s30 + $0x8] sm:$0xff]  ;;  %v2113_v3 = vld [vmem:[%s2094_s30 + $0x10] sm:$0xff]  ;;  %v682_v24 = vstv %s2100_s12  ;;  %s3045_s1 = sld [smem:[#allocation22_spill]]  ;;  %s2176_s28 = sld [smem:[#allocation4 + $0x80]] }
  0x74   : > { %v2118_v6 = vld [vmem:[%s2094_s30 + $0x18] sm:$0xff]  ;;  %v600_v7 = vmul.f32 %v599_v1, %v2105_v0  ;;  %v601_v10 = vmul.f32 %v599_v1, %v2110_v2  ;;  %v603_v11 = vmul.f32 %v2113_v3, %v602_v4  ;;  %v675_v12 = vmul.f32 %v674_v5, %v2105_v0  ;;  %v2134_v14 = vld [vmem:[%s2094_s30 + $0x20] sm:$0xff]  ;;  %v2143_v19 = vld [vmem:[%s2094_s30 + $0x28] sm:$0xff]  ;;  %s2183_s29 = sld [smem:[#allocation4 + $0x81]]  ;;  %s2190_s10 = sld [smem:[#allocation4 + $0x82]] }
  0x75   : > { %v604_v15 = vmul.f32 %v2118_v6, %v602_v4  ;;  %v676_v17 = vmul.f32 %v674_v5, %v2110_v2  ;;  %v678_v20 = vmul.f32 %v2113_v3, %v677_v8  ;;  %v679_v21 = vmul.f32 %v2118_v6, %v677_v8  ;;  %v2164_v32 = vld [vmem:[%s2094_s30 + $0x30] sm:$0xff]  ;;  %v2179_v37 = vld [vmem:[%s2094_s30 + $0x38] sm:$0xff]  ;;  %s2207_s12 = sld [smem:[#allocation2 + $0x6]]  ;;  %s2271_s8 = sld [smem:[#allocation2 + $0x103]] }
  0x76   : > { %v758_v22 = vmul.f32 %v757_v9, %v2105_v0  ;;  %v759_v23 = vmul.f32 %v757_v9, %v2110_v2  ;;  %v761_v25 = vmul.f32 %v2113_v3, %v760_v13  ;;  %v762_v26 = vmul.f32 %v2118_v6, %v760_v13  ;;  %s2275_s23 = sld [smem:[#allocation4 + $0x202]]  ;;  %s2438_s21 = sld [smem:[#allocation6 + $0x101]] }
  0x77   : > { %v923_v27 = vstv %s2098_s11  ;;  %v605_v28 = vadd.f32 %v603_v11, %v600_v7  ;;  %v608_v29 = vmul.f32 %v2134_v14, %v607_v16  ;;  %v765_v30 = vstv %s2102_s15  ;;  %s2200_s11 = sld [smem:[#allocation4 + $0x100]]  ;;  %s2209_s15 = sld [smem:[#allocation4 + $0x101]] }
  0x78   : > { %v2159_v31 = vmul.f32 %v840_v18, %v2105_v0  ;;  %v606_v33 = vadd.f32 %v604_v15, %v601_v10  ;;  %v609_v34 = vmul.f32 %v2143_v19, %v607_v16  ;;  %v612_v35 = vstv %s2107_s16  ;;  %s2216_s16 = sld [smem:[#allocation4 + $0x102]]  ;;  %s2445_s0 = sld [smem:[#allocation7]] }
  0x79   : > { %v2169_v36 = vmul.f32 %v840_v18, %v2110_v2  ;;  %s2174_s27 = scalar_lea.vmem %s3045_s1, %s1687_s13  ;;  %v680_v38 = vadd.f32 %v678_v20, %v675_v12  ;;  %v681_v39 = vadd.f32 %v679_v21, %v676_v17  ;;  %v683_v40 = vmul.f32 %v2134_v14, %v682_v24  ;;  %s2246_s13 = sld [smem:[#allocation4 + $0x182]] }
  0x7a   : > { %v684_v41 = vmul.f32 %v2143_v19, %v682_v24  ;;  %v687_v42 = vstv %s2120_s17  ;;  %v763_v43 = vadd.f32 %v761_v25, %v758_v22  ;;  %v764_v44 = vadd.f32 %v762_v26, %v759_v23  ;;  %v2193_v50 = vld [vmem:[%s2174_s27] sm:$0xff]  ;;  %v2203_v55 = vld [vmem:[%s2174_s27 + $0x8] sm:$0xff]  ;;  %s2223_s17 = sld [smem:[#allocation4 + $0x180]]  ;;  %v2226_v12 = vld [vmem:[%s2174_s27 + $0x10] sm:$0xff]  ;;  %s2457_s1 = sld [smem:[#allocation6 + $0x103]] }
  0x7b   : > { %v766_v45 = vmul.f32 %v2134_v14, %v765_v30  ;;  %v610_v46 = vadd.f32 %v608_v29, %v605_v28  ;;  %v613_v47 = vmul.f32 %v2164_v32, %v612_v35  ;;  %v767_v48 = vmul.f32 %v2143_v19, %v765_v30  ;;  %v2229_v13 = vld [vmem:[%s2174_s27 + $0x18] sm:$0xff]  ;;  %s2459_s2 = sld [smem:[#allocation7 + $0x1]]  ;;  %s2471_s3 = sld [smem:[#allocation6 + $0x180]] }
  0x7c   : > { %v770_v49 = vstv %s2125_s18  ;;  %v611_v51 = vadd.f32 %v609_v34, %v606_v33  ;;  %v614_v52 = vmul.f32 %v2179_v37, %v612_v35  ;;  %v617_v53 = vstv %s2131_s19  ;;  %s2236_s18 = sld [smem:[#allocation2 + $0x7]]  ;;  %s2238_s19 = sld [smem:[#allocation2 + $0x83]]  ;;  %v2252_v34 = vld [vmem:[%s2174_s27 + $0x20] sm:$0xff] }
  0x7d   : > { %v2198_v54 = vmul.f32 %v923_v27, %v2105_v0  ;;  %v685_v56 = vadd.f32 %v683_v40, %v680_v38  ;;  %v686_v57 = vadd.f32 %v684_v41, %v681_v39  ;;  %v688_v58 = vmul.f32 %v2164_v32, %v687_v42  ;;  %v2262_v41 = vld [vmem:[%s2174_s27 + $0x28] sm:$0xff]  ;;  %s2477_s4 = sld [smem:[#allocation6 + $0x181]]  ;;  %s2479_s5 = sld [smem:[#allocation6 + $0x182]] }
  0x7e   : > { %v1006_v59 = vstv %s2140_s9  ;;  %v689_v60 = vmul.f32 %v2179_v37, %v687_v42  ;;  %v692_v61 = vstv %s2150_s20  ;;  %v768_v62 = vadd.f32 %v766_v45, %v763_v43  ;;  %s2242_s9 = sld [smem:[#allocation4 + $0x181]]  ;;  %s2259_s20 = sld [smem:[#allocation4 + $0x200]] }
  0x7f   : > { %v771_v63 = vmul.f32 %v2164_v32, %v770_v49  ;;  %v615_v1 = vadd.f32 %v613_v47, %v610_v46  ;;  %v618_v4 = vmul.f32 %v617_v53, %v2193_v50  ;;  %v769_v5 = vadd.f32 %v767_v48, %v764_v44  ;;  %s2487_s6 = sld [smem:[#allocation2 + $0x184]]  ;;  %s2489_s14 = sld [smem:[#allocation6 + $0x183]] }
  0x80   : > { %v772_v7 = vmul.f32 %v2179_v37, %v770_v49  ;;  %v616_v8 = vadd.f32 %v614_v52, %v611_v51  ;;  %v619_v9 = vmul.f32 %v617_v53, %v2203_v55  ;;  %v775_v10 = vstv %s2161_s22  ;;  %s2267_s22 = sld [smem:[#allocation4 + $0x201]]  ;;  %s2501_s25 = sld [smem:[#allocation7 + $0x3]] }
  0x81   : > { %v2221_v11 = vmul.f32 %v923_v27, %v2110_v2  ;;  %v622_v15 = vstv %s2176_s28  ;;  %v690_v16 = vadd.f32 %v688_v58, %v685_v56  ;;  %v693_v17 = vmul.f32 %v692_v61, %v2193_v50  ;;  %s2289_s28 = sld [smem:[#allocation4 + $0x280]] }
  0x82   : > { %v2234_v18 = vmul.f32 %v1006_v59, %v2105_v0  ;;  %v691_v20 = vadd.f32 %v689_v60, %v686_v57  ;;  %v694_v21 = vmul.f32 %v692_v61, %v2203_v55  ;;  %v697_v22 = vstv %s2183_s29  ;;  %v2278_v57 = vld [vmem:[%s2174_s27 + $0x30] sm:$0xff]  ;;  %s2293_s29 = sld [smem:[#allocation4 + $0x281]] }
  0x83   : > { %v773_v23 = vadd.f32 %v771_v63, %v768_v62  ;;  %v620_v24 = vadd.f32 %v618_v4, %v615_v1  ;;  %v774_v25 = vadd.f32 %v772_v7, %v769_v5  ;;  %v776_v26 = vmul.f32 %v775_v10, %v2193_v50  ;;  %v2284_v62 = vld [vmem:[%s2174_s27 + $0x38] sm:$0xff] }
  0x84   : > { %v777_v27 = vmul.f32 %v775_v10, %v2203_v55  ;;  %v621_v28 = vadd.f32 %v619_v9, %v616_v8  ;;  %v623_v29 = vmul.f32 %v2226_v12, %v622_v15  ;;  %v624_v30 = vmul.f32 %v2229_v13, %v622_v15 }
  0x85   : > { %v780_v33 = vstv %s2190_s10  ;;  %v627_v35 = vstv %s2200_s11  ;;  %v695_v38 = vadd.f32 %v693_v17, %v690_v16  ;;  %v698_v39 = vmul.f32 %v2226_v12, %v697_v22  ;;  %s2300_s10 = sld [smem:[#allocation4 + $0x282]]  ;;  %s2311_s11 = sld [smem:[#allocation4 + $0x300]] }
  0x86   : > { %v2257_v40 = vmul.f32 %v1006_v59, %v2110_v2  ;;  %v696_v42 = vadd.f32 %v694_v21, %v691_v20  ;;  %v699_v43 = vmul.f32 %v2229_v13, %v697_v22  ;;  %v702_v44 = vstv %s2209_s15  ;;  %s2316_s15 = sld [smem:[#allocation2 + $0x183]] }
  0x87   : > { %v1089_v45 = vstv %s2207_s12  ;;  %v778_v46 = vadd.f32 %v776_v26, %v773_v23  ;;  %v779_v47 = vadd.f32 %v777_v27, %v774_v25  ;;  %v781_v48 = vmul.f32 %v2226_v12, %v780_v33  ;;  %v2303_v25 = vld [vmem:[%s2174_s27 + $0x40] sm:$0xff]  ;;  %v2306_v26 = vld [vmem:[%s2174_s27 + $0x48] sm:$0xff]  ;;  %s2389_s12 = sld [smem:[#allocation4 + $0x203]] }
  0x88   : > { %v782_v49 = vmul.f32 %v2229_v13, %v780_v33  ;;  %v625_v51 = vadd.f32 %v623_v29, %v620_v24  ;;  %v626_v52 = vadd.f32 %v624_v30, %v621_v28  ;;  %v628_v53 = vmul.f32 %v2252_v34, %v627_v35 }
  0x89   : > { %v785_v56 = vstv %s2216_s16  ;;  %v629_v58 = vmul.f32 %v2262_v41, %v627_v35  ;;  %v632_v59 = vstv %s2223_s17  ;;  %v700_v60 = vadd.f32 %v698_v39, %v695_v38  ;;  %s2320_s16 = sld [smem:[#allocation4 + $0x301]]  ;;  %s2339_s17 = sld [smem:[#allocation4 + $0x3]] }
  0x8a   : > { %v703_v61 = vmul.f32 %v2252_v34, %v702_v44  ;;  %v701_v63 = vadd.f32 %v699_v43, %v696_v42  ;;  %v704_v1 = vmul.f32 %v2262_v41, %v702_v44  ;;  %v843_v4 = vstv %s2238_s19  ;;  %s2343_s19 = sld [smem:[#allocation4 + $0x83]] }
  0x8b   : > { %v1172_v5 = vstv %s2236_s18  ;;  %v707_v7 = vstv %s2242_s9  ;;  %v783_v8 = vadd.f32 %v781_v48, %v778_v46  ;;  %v784_v9 = vadd.f32 %v782_v49, %v779_v47  ;;  %s2345_s9 = sld [smem:[#allocation4 + $0x302]]  ;;  %s2469_s18 = sld [smem:[#allocation2 + $0x104]] }
  0x8c   : > { %v786_v10 = vmul.f32 %v2252_v34, %v785_v56  ;;  %v630_v15 = vadd.f32 %v628_v53, %v625_v51  ;;  %v633_v16 = vmul.f32 %v2278_v57, %v632_v59  ;;  %v787_v17 = vmul.f32 %v2262_v41, %v785_v56 }
  0x8d   : > { %v790_v20 = vstv %s2246_s13  ;;  %v631_v21 = vadd.f32 %v629_v58, %v626_v52  ;;  %v634_v22 = vmul.f32 %v2284_v62, %v632_v59  ;;  %v705_v23 = vadd.f32 %v703_v61, %v700_v60  ;;  %v2328_v59 = vld [vmem:[%s2174_s27 + $0x50] sm:$0xff]  ;;  %s2349_s13 = sld [smem:[#allocation4 + $0x380]] }
  0x8e   : > { %v844_v24 = vmul.f32 %v2113_v3, %v843_v4  ;;  %v637_v27 = vstv %s2259_s20  ;;  %v706_v28 = vadd.f32 %v704_v1, %v701_v63  ;;  %v708_v29 = vmul.f32 %v2278_v57, %v707_v7  ;;  %s2358_s20 = sld [smem:[#allocation4 + $0x103]] }
  0x8f   : > { %v709_v30 = vmul.f32 %v2284_v62, %v707_v7  ;;  %v712_v33 = vstv %s2267_s22  ;;  %v788_v35 = vadd.f32 %v786_v10, %v783_v8  ;;  %v791_v38 = vmul.f32 %v2278_v57, %v790_v20  ;;  %s2360_s22 = sld [smem:[#allocation4 + $0x381]] }
  0x90   : > { %v845_v39 = vmul.f32 %v2118_v6, %v843_v4  ;;  %v635_v42 = vadd.f32 %v633_v16, %v630_v15  ;;  %v789_v43 = vadd.f32 %v787_v17, %v784_v9  ;;  %v792_v44 = vmul.f32 %v2284_v62, %v790_v20  ;;  %v2334_v4 = vld [vmem:[%s2174_s27 + $0x58] sm:$0xff] }
  0x91   : > { %v848_v46 = vstv %s2271_s8  ;;  %v636_v47 = vadd.f32 %v634_v22, %v631_v21  ;;  %v638_v48 = vmul.f32 %v2303_v25, %v637_v27  ;;  %v639_v49 = vmul.f32 %v2306_v26, %v637_v27  ;;  %s2369_s8 = sld [smem:[#allocation4 + $0x382]] }
  0x92   : > { %v795_v51 = vstv %s2275_s23  ;;  %v710_v52 = vadd.f32 %v708_v29, %v705_v23  ;;  %v711_v53 = vadd.f32 %v709_v30, %v706_v28  ;;  %v713_v56 = vmul.f32 %v2303_v25, %v712_v33  ;;  %v2363_v30 = vld [vmem:[%s2174_s27 + $0x68] sm:$0xff]  ;;  %s2385_s23 = sld [smem:[#allocation4 + $0x183]] }
  0x93   : > { %v714_v58 = vmul.f32 %v2306_v26, %v712_v33  ;;  %v642_v60 = vstv %s2289_s28  ;;  %v793_v61 = vadd.f32 %v791_v38, %v788_v35  ;;  %v846_v63 = vadd.f32 %v844_v24, %v2159_v31  ;;  %v2352_v24 = vld [vmem:[%s2174_s27 + $0x60] sm:$0xff]  ;;  %s2391_s28 = sld [smem:[#allocation4 + $0x283]] }
  0x94   : > { %v849_v1 = vmul.f32 %v2134_v14, %v848_v46  ;;  %v717_v7 = vstv %s2293_s29  ;;  %v794_v8 = vadd.f32 %v792_v44, %v789_v43  ;;  %v796_v9 = vmul.f32 %v2303_v25, %v795_v51  ;;  %s2396_s29 = sld [smem:[#allocation4 + $0x303]] }
  0x95   : > { %v797_v10 = vmul.f32 %v2306_v26, %v795_v51  ;;  %v640_v15 = vadd.f32 %v638_v48, %v635_v42  ;;  %v641_v16 = vadd.f32 %v639_v49, %v636_v47  ;;  %v847_v17 = vadd.f32 %v845_v39, %v2169_v36 }
  0x96   : > { %v850_v31 = vmul.f32 %v2143_v19, %v848_v46  ;;  %v643_v20 = vmul.f32 %v2328_v59, %v642_v60  ;;  %v715_v21 = vadd.f32 %v713_v56, %v710_v52  ;;  %v716_v22 = vadd.f32 %v714_v58, %v711_v53 }
  0x97   : > { %v800_v23 = vstv %s2300_s10  ;;  %v644_v36 = vmul.f32 %v2334_v4, %v642_v60  ;;  %v647_v27 = vstv %s2311_s11  ;;  %v718_v28 = vmul.f32 %v2328_v59, %v717_v7  ;;  %s2398_s10 = sld [smem:[#allocation6]]  ;;  %s2409_s11 = sld [smem:[#allocation6 + $0x1]] }
  0x98   : > { %v719_v29 = vmul.f32 %v2334_v4, %v717_v7  ;;  %v798_v33 = vadd.f32 %v796_v9, %v793_v61  ;;  %v799_v35 = vadd.f32 %v797_v10, %v794_v8  ;;  %v851_v38 = vadd.f32 %v849_v1, %v846_v63 }
  0x99   : > { %v853_v39 = vstv %s2316_s15  ;;  %v722_v42 = vstv %s2320_s16  ;;  %v801_v43 = vmul.f32 %v2328_v59, %v800_v23  ;;  %v802_v44 = vmul.f32 %v2334_v4, %v800_v23  ;;  %s2411_s15 = sld [smem:[#allocation6 + $0x2]]  ;;  %s2417_s16 = sld [smem:[#allocation6 + $0x3]] }
  0x9a   : > { %v852_v46 = vadd.f32 %v850_v31, %v847_v17  ;;  %v645_v47 = vadd.f32 %v643_v20, %v640_v15  ;;  %v648_v48 = vmul.f32 %v2352_v24, %v647_v27  ;;  %v2375_v49 = vmul.f32 %v1089_v45, %v2105_v0  ;;  %v2401_v31 = vld [vmem:[%s2174_s27 + $0x70] sm:$0xff]  ;;  %v2404_v20 = vld [vmem:[%s2174_s27 + $0x78] sm:$0xff] }
  0x9b   : > { %v2380_v51 = vmul.f32 %v1089_v45, %v2110_v2  ;;  %v646_v52 = vadd.f32 %v644_v36, %v641_v16  ;;  %v649_v53 = vmul.f32 %v2363_v30, %v647_v27  ;;  %v854_v56 = vmul.f32 %v2164_v32, %v853_v39  ;;  %3048 = vst [vmem:[#allocation17_spill] sm:$0xff] %v2401_v31 }
  0x9c   : > { %3046 = vst [vmem:[#allocation15_spill] sm:$0xff] %v2375_v49  ;;  %v855_v58 = vmul.f32 %v2179_v37, %v853_v39  ;;  %v720_v60 = vadd.f32 %v718_v28, %v715_v21  ;;  %v721_v61 = vadd.f32 %v719_v29, %v716_v22  ;;  %v723_v63 = vmul.f32 %v2352_v24, %v722_v42 }
  0x9d   : > { %3047 = vst [vmem:[#allocation16_spill] sm:$0xff] %v2380_v51  ;;  %v724_v45 = vmul.f32 %v2363_v30, %v722_v42  ;;  %v803_v1 = vadd.f32 %v801_v43, %v798_v33  ;;  %v804_v7 = vadd.f32 %v802_v44, %v799_v35  ;;  %v856_v8 = vadd.f32 %v854_v56, %v851_v38 }
  0x9e   : > { %v857_v9 = vadd.f32 %v855_v58, %v852_v46  ;;  %v650_v10 = vadd.f32 %v648_v48, %v645_v47  ;;  %v805_v15 = vstv %s2345_s9  ;;  %v858_v16 = vstv %s2339_s17  ;;  %3049 = vst [vmem:[#allocation18_spill] sm:$0xff] %v2404_v20  ;;  %s2419_s17 = sld [smem:[#allocation6 + $0x80]]  ;;  %s2425_s9 = sld [smem:[#allocation6 + $0x81]] }
  0x9f   : > { %v863_v17 = vstv %s2343_s19  ;;  %v651_v21 = vadd.f32 %v649_v53, %v646_v52  ;;  %v652_v22 = vstv %s2349_s13  ;;  %v859_v23 = vmul.f32 %v858_v16, %v2193_v50  ;;  %s2423_s19 = sld [smem:[#allocation4 + $0x383]]  ;;  %s2430_s13 = sld [smem:[#allocation6 + $0x82]] }
  0xa0   : > { %v860_v36 = vmul.f32 %v858_v16, %v2203_v55  ;;  %v727_v27 = vstv %s2360_s22  ;;  %v864_v28 = vmul.f32 %v2226_v12, %v863_v17  ;;  %v865_v29 = vmul.f32 %v2229_v13, %v863_v17  ;;  %s2436_s22 = sld [smem:[#allocation6 + $0x100]] }
  0xa1   : > { %v868_v33 = vstv %s2358_s20  ;;  %v806_v35 = vmul.f32 %v2352_v24, %v805_v15  ;;  %v807_v38 = vmul.f32 %v2363_v30, %v805_v15  ;;  %v861_v39 = vadd.f32 %v859_v23, %v856_v8  ;;  %s2432_s20 = sld [smem:[#allocation6 + $0x83]] }
  0xa2   : > { %v862_v42 = vadd.f32 %v860_v36, %v857_v9  ;;  %v653_v43 = vmul.f32 %v2401_v31, %v652_v22  ;;  %v654_v44 = vmul.f32 %v2404_v20, %v652_v22  ;;  %v725_v46 = vadd.f32 %v723_v63, %v720_v60 }
  0xa3   : > { %v810_v47 = vstv %s2369_s8  ;;  %v866_v48 = vadd.f32 %v864_v28, %v861_v39  ;;  %v869_v53 = vmul.f32 %v2252_v34, %v868_v33  ;;  %v870_v56 = vmul.f32 %v2262_v41, %v868_v33  ;;  %s2443_s8 = sld [smem:[#allocation6 + $0x102]] }
  0xa4   : > { %v867_v52 = vadd.f32 %v865_v29, %v862_v42  ;;  %v726_v58 = vadd.f32 %v724_v45, %v721_v61  ;;  %v728_v60 = vmul.f32 %v2401_v31, %v727_v27  ;;  %v729_v63 = vmul.f32 %v2404_v20, %v727_v27 }
  0xa5   : > { %v873_v8 = vstv %s2385_s23  ;;  %v808_v9 = vadd.f32 %v806_v35, %v803_v1  ;;  %v809_v15 = vadd.f32 %v807_v38, %v804_v7  ;;  %v2450_v16 = vmul.f32 %v1172_v5, %v2105_v0  ;;  %s2463_s23 = sld [smem:[#allocation2 + $0x84]] }
  0xa6   : > { %v2455_v61 = vmul.f32 %v1172_v5, %v2110_v2  ;;  %v655_v45 = vadd.f32 %v653_v43, %v650_v10  ;;  %v656_v17 = vadd.f32 %v654_v44, %v651_v21  ;;  %v811_v1 = vmul.f32 %v2401_v31, %v810_v47 }
  0xa7   : > { %3050 = vst [vmem:[#allocation19_spill] sm:$0xff] %v2450_v16  ;;  %v812_v0 = vmul.f32 %v2404_v20, %v810_v47  ;;  %v871_v7 = vadd.f32 %v869_v53, %v866_v48  ;;  %v872_v2 = vadd.f32 %v870_v56, %v867_v52  ;;  %v874_v5 = vmul.f32 %v2278_v57, %v873_v8 }
  0xa8   : > { %3051 = vst [vmem:[#allocation20_spill] sm:$0xff] %v2455_v61  ;;  %v875_v22 = vmul.f32 %v2284_v62, %v873_v8  ;;  %v662_v23 = vstv %s2398_s10  ;;  %v730_v10 = vadd.f32 %v728_v60, %v725_v46  ;;  %v731_v36 = vadd.f32 %v729_v63, %v726_v58  ;;  %s2575_s10 = sld [smem:[#allocation4 + $0x284]] }
  0xa9   : > { %v878_v21 = vstv %s2389_s12  ;;  %v665_v27 = vstv %s2409_s11  ;;  %v737_v33 = vstv %s2419_s17  ;;  %v742_v35 = vstv %s2425_s9  ;;  %s2483_s12 = sld [smem:[#allocation7 + $0x2]]  ;;  %s2587_s11 = sld [smem:[#allocation2 + $0x85]] }
  0xaa   : > { %v813_v38 = vadd.f32 %v811_v1, %v808_v9  ;;  %v814_v39 = vadd.f32 %v812_v0, %v809_v15  ;;  %v883_v42 = vstv %s2391_s28  ;;  %v876_v43 = vadd.f32 %v874_v5, %v871_v7  ;;  %s2495_s28 = sld [smem:[#allocation4 + $0x4]]  ;;  %s2597_s17 = sld [smem:[#allocation2 + $0x185]] }
  0xab   : > { %v877_v44 = vadd.f32 %v875_v22, %v872_v2  ;;  %v879_v46 = vmul.f32 %v2303_v25, %v878_v21  ;;  %v880_v47 = vmul.f32 %v2306_v26, %v878_v21  ;;  %v888_v56 = vstv %s2396_s29  ;;  %s2563_s29 = sld [smem:[#allocation4 + $0x204]]  ;;  %s2651_s9 = sld [smem:[#allocation4 + $0x105]] }
  0xac   : > { %v657_v58 = vstv %s2445_s0  ;;  %v893_v8 = vstv %s2423_s19  ;;  %v732_v9 = vstv %s2459_s2  ;;  %v884_v1 = vmul.f32 %v2328_v59, %v883_v42  ;;  %s2527_s0 = sld [smem:[#allocation4 + $0x84]]  ;;  %s2606_s19 = sld [smem:[#allocation4 + $0x5]] }
  0xad   : > { %v885_v0 = vmul.f32 %v2334_v4, %v883_v42  ;;  %v881_v7 = vadd.f32 %v879_v46, %v876_v43  ;;  %v882_v2 = vadd.f32 %v880_v47, %v877_v44  ;;  %v889_v5 = vmul.f32 %v2352_v24, %v888_v56  ;;  %s2531_s2 = sld [smem:[#allocation4 + $0x104]] }
  0xae   : > { %v926_v22 = vstv %s2463_s23  ;;  %v658_v21 = vadd.f32 %v657_v58, %v655_v45  ;;  %v659_v63 = vadd.f32 %v657_v58, %v656_v17  ;;  %v890_v60 = vmul.f32 %v2363_v30, %v888_v56  ;;  %s2696_s23 = sld [smem:[#allocation2 + $0x106]] }
  0xaf   : > { %v2511_v53 = vmul.f32 %v2401_v31, %v893_v8  ;;  %v733_v15 = vadd.f32 %v732_v9, %v730_v10  ;;  %v734_v52 = vadd.f32 %v732_v9, %v731_v36  ;;  %v2514_v42 = vmul.f32 %v2404_v20, %v893_v8 }
  0xb0   : > { %v927_v47 = vmul.f32 %v2113_v3, %v926_v22  ;;  %v931_v45 = vstv %s2469_s18  ;;  %v815_v17 = vstv %s2483_s12  ;;  %v886_v56 = vadd.f32 %v884_v1, %v881_v7  ;;  %s2698_s18 = sld [smem:[#allocation2 + $0x186]] }
  0xb1   : > { %v887_v58 = vadd.f32 %v885_v0, %v882_v2  ;;  %v928_v48 = vmul.f32 %v2118_v6, %v926_v22  ;;  %v660_v29 = vmax.f32 %v658_v21, 0.0  ;;  %v661_v28 = vmax.f32 %v659_v63, 0.0  ;;  %s2707_s12 = sld [smem:[#allocation4 + $0x6]] }
  0xb2   : > { %v936_v36 = vstv %s2487_s6  ;;  %v735_v8 = vmax.f32 %v733_v15, 0.0  ;;  %v736_v9 = vmax.f32 %v734_v52, 0.0  ;;  %v932_v46 = vmul.f32 %v2134_v14, %v931_v45  ;;  %s2559_s6 = sld [smem:[#allocation4 + $0x184]] }
  0xb3   : > { %v941_v44 = vstv %s2495_s28  ;;  %v816_v1 = vadd.f32 %v815_v17, %v813_v38  ;;  %v817_v0 = vadd.f32 %v815_v17, %v814_v39  ;;  %v933_v7 = vmul.f32 %v2143_v19, %v931_v45  ;;  %s2745_s28 = sld [smem:[#allocation4 + $0x385]] }
  0xb4   : > { %v891_v52 = vadd.f32 %v889_v5, %v886_v56  ;;  %v892_v15 = vadd.f32 %v890_v60, %v887_v58  ;;  %v929_v2 = vadd.f32 %v927_v47, %v2198_v54  ;;  %v930_v22 = vadd.f32 %v928_v48, %v2221_v11 }
  0xb5   : > { %v663_v21 = vmul.f32 %v662_v23, %v660_v29  ;;  %v664_v38 = vmul.f32 %v662_v23, %v661_v28  ;;  %v666_v39 = vmul.f32 %v665_v27, %v660_v29  ;;  %v667_v17 = vmul.f32 %v665_v27, %v661_v28 }
  0xb6   : > { %v738_v45 = vmul.f32 %v737_v33, %v735_v8  ;;  %v739_v5 = vmul.f32 %v737_v33, %v736_v9  ;;  %v743_v54 = vmul.f32 %v742_v35, %v735_v8  ;;  %v744_v11 = vmul.f32 %v742_v35, %v736_v9 }
  0xb7   : > { %v3052_v48 = vstv %s2411_s15  ;;  %v3054_v56 = vstv %s2417_s16  ;;  %v934_v27 = vadd.f32 %v932_v46, %v929_v2  ;;  %v935_v63 = vadd.f32 %v933_v7, %v930_v22  ;;  %s2589_s15 = sld [smem:[#allocation4 + $0x304]]  ;;  %s2595_s16 = sld [smem:[#allocation2 + $0x105]] }
  0xb8   : > { %v669_v60 = vmul.f32 %v3052_v48, %v660_v29  ;;  %v3053_v47 = vmov %v3052_v48  ;;  %v672_v58 = vmul.f32 %v3054_v56, %v660_v29  ;;  %v3055_v10 = vmov %v3054_v56 }
  0xb9   : > { %v670_v23 = vmul.f32 %v3053_v47, %v661_v28  ;;  %v673_v43 = vmul.f32 %v3055_v10, %v661_v28  ;;  %v937_v33 = vmul.f32 %v2164_v32, %v936_v36  ;;  %v938_v61 = vmul.f32 %v2179_v37, %v936_v36 }
  0xba   : > { %v3056_v35 = vstv %s2430_s13  ;;  %v3058_v51 = vstv %s2432_s20  ;;  %v740_v10 = vadd.f32 %v738_v45, %v663_v21  ;;  %v741_v49 = vadd.f32 %v739_v5, %v664_v38  ;;  %s2668_s13 = sld [smem:[#allocation4 + $0x205]]  ;;  %s2671_s20 = sld [smem:[#allocation7 + $0x4]] }
  0xbb   : > { %v748_v16 = vmul.f32 %v3056_v35, %v735_v8  ;;  %v3057_v48 = vmov %v3056_v35  ;;  %v753_v29 = vmul.f32 %v3058_v51, %v735_v8  ;;  %v3059_v56 = vmov %v3058_v51 }
  0xbc   : > { %v749_v47 = vmul.f32 %v3057_v48, %v736_v9  ;;  %v754_v28 = vmul.f32 %v3059_v56, %v736_v9  ;;  %v745_v46 = vadd.f32 %v743_v54, %v666_v39  ;;  %v746_v2 = vadd.f32 %v744_v11, %v667_v17 }
  0xbd   : > { %v818_v7 = vmax.f32 %v816_v1, 0.0  ;;  %v819_v22 = vmax.f32 %v817_v0, 0.0  ;;  %v942_v20 = vmul.f32 %v941_v44, %v2193_v50  ;;  %v946_v36 = vstv %s2527_s0  ;;  %s2747_s0 = sld [smem:[#allocation6 + $0x202]] }
  0xbe   : > { %v939_v31 = vadd.f32 %v937_v33, %v934_v27  ;;  %v940_v35 = vadd.f32 %v938_v61, %v935_v63  ;;  %v943_v48 = vmul.f32 %v941_v44, %v2203_v55  ;;  %v951_v51 = vstv %s2531_s2  ;;  %s2749_s2 = sld [smem:[#allocation6 + $0x203]] }
  0xbf   : > { %v2579_v8 = vadd.f32 %v748_v16, %v669_v60  ;;  %v2581_v9 = vadd.f32 %v749_v47, %v670_v23  ;;  %v2583_v21 = vadd.f32 %v753_v29, %v672_v58  ;;  %v2585_v1 = vadd.f32 %v754_v28, %v673_v43 }
  0xc0   : > { %v896_v61 = vadd.f32 %v2511_v53, %v891_v52  ;;  %v897_v44 = vadd.f32 %v2514_v42, %v892_v15  ;;  %v947_v16 = vmul.f32 %v2226_v12, %v946_v36  ;;  %v948_v0 = vmul.f32 %v2229_v13, %v946_v36 }
  0xc1   : > { %v3060_v43 = vstv %s2436_s22  ;;  %v3062_v17 = vstv %s2438_s21  ;;  %v952_v53 = vmul.f32 %v2252_v34, %v951_v51  ;;  %v944_v42 = vadd.f32 %v942_v20, %v939_v31  ;;  %s2630_s21 = sld [smem:[#allocation4 + $0x85]] }
  0xc2   : > { %v821_v63 = vmul.f32 %v3060_v43, %v818_v7  ;;  %v3061_v38 = vmov %v3060_v43  ;;  %v826_v45 = vmul.f32 %v3062_v17, %v818_v7  ;;  %v945_v52 = vadd.f32 %v943_v48, %v940_v35  ;;  %s2679_s22 = sld [smem:[#allocation4 + $0x285]] }
  0xc3   : > { %v822_v39 = vmul.f32 %v3061_v38, %v819_v22  ;;  %v953_v15 = vmul.f32 %v2262_v41, %v951_v51  ;;  %v956_v5 = vstv %s2559_s6  ;;  %v3063_v54 = vmov %v3062_v17  ;;  %s2765_s6 = sld [smem:[#allocation4 + $0x106]] }
  0xc4   : > { %v827_v11 = vmul.f32 %v3063_v54, %v819_v22  ;;  %v3064_v60 = vstv %s2443_s8  ;;  %v961_v33 = vstv %s2563_s29  ;;  %v949_v47 = vadd.f32 %v947_v16, %v944_v42  ;;  %s2683_s8 = sld [smem:[#allocation4 + $0x305]]  ;;  %s2785_s29 = sld [smem:[#allocation4 + $0x186]] }
  0xc5   : > { %v831_v23 = vmul.f32 %v3064_v60, %v818_v7  ;;  %v3065_v58 = vmov %v3064_v60  ;;  %v950_v29 = vadd.f32 %v948_v0, %v945_v52  ;;  %v957_v56 = vmul.f32 %v2278_v57, %v956_v5 }
  0xc6   : > { %v832_v27 = vmul.f32 %v3065_v58, %v819_v22  ;;  %v958_v31 = vmul.f32 %v2284_v62, %v956_v5  ;;  %v2619_v20 = vadd.f32 %v821_v63, %v740_v10  ;;  %v2621_v28 = vadd.f32 %v822_v39, %v741_v49 }
  0xc7   : > { %v3066_v36 = vstv %s2457_s1  ;;  %v2627_v43 = vadd.f32 %v826_v45, %v745_v46  ;;  %v954_v16 = vadd.f32 %v952_v53, %v949_v47  ;;  %v955_v0 = vadd.f32 %v953_v15, %v950_v29  ;;  %s2638_s1 = sld [smem:[#allocation4 + $0x384]] }
  0xc8   : > { %v836_v35 = vmul.f32 %v3066_v36, %v818_v7  ;;  %v3067_v48 = vmov %v3066_v36  ;;  %v966_v38 = vstv %s2575_s10  ;;  %v2632_v17 = vadd.f32 %v827_v11, %v746_v2  ;;  %s2799_s10 = sld [smem:[#allocation7 + $0x5]] }
  0xc9   : > { %v837_v51 = vmul.f32 %v3067_v48, %v819_v22  ;;  %v3068_v10 = vstv %s2501_s25  ;;  %v962_v63 = vmul.f32 %v2303_v25, %v961_v33  ;;  %v963_v7 = vmul.f32 %v2306_v26, %v961_v33  ;;  %s2659_s25 = sld [smem:[#allocation4 + $0x185]] }
  0xca   : > { %v899_v49 = vadd.f32 %v3068_v10, %v896_v61  ;;  %v3069_v46 = vmov %v3068_v10  ;;  %v959_v39 = vadd.f32 %v957_v56, %v954_v16  ;;  %v960_v45 = vadd.f32 %v958_v31, %v955_v0 }
  0xcb   : > { %v900_v22 = vadd.f32 %v3069_v46, %v897_v44  ;;  %v971_v53 = vstv %s2589_s15  ;;  %v967_v42 = vmul.f32 %v2328_v59, %v966_v38  ;;  %v1009_v52 = vstv %s2587_s11  ;;  %s2802_s11 = sld [smem:[#allocation4 + $0x286]] }
  0xcc   : > { %v1014_v15 = vstv %s2595_s16  ;;  %v1019_v2 = vstv %s2597_s17  ;;  %v968_v5 = vmul.f32 %v2334_v4, %v966_v38  ;;  %v1010_v61 = vmul.f32 %v2113_v3, %v1009_v52  ;;  %s2808_s15 = sld [smem:[#allocation4 + $0x306]]  ;;  %s2812_s16 = sld [smem:[#allocation2 + $0x87]] }
  0xcd   : > { %v1011_v54 = vmul.f32 %v2118_v6, %v1009_v52  ;;  %v1024_v11 = vstv %s2606_s19  ;;  %v964_v60 = vadd.f32 %v962_v63, %v959_v39  ;;  %v965_v58 = vadd.f32 %v963_v7, %v960_v45  ;;  %s2815_s17 = sld [smem:[#allocation2 + $0x107]] }
  0xce   : > { %v1015_v44 = vmul.f32 %v2134_v14, %v1014_v15  ;;  %v1016_v33 = vmul.f32 %v2143_v19, %v1014_v15  ;;  %v1012_v47 = vadd.f32 %v1010_v61, %v2234_v18  ;;  %v1020_v56 = vmul.f32 %v2164_v32, %v1019_v2  ;;  %s2817_s19 = sld [smem:[#allocation2 + $0x187]] }
  0xcf   : > { %v1013_v29 = vadd.f32 %v1011_v54, %v2257_v40  ;;  %v1021_v3 = vmul.f32 %v2179_v37, %v1019_v2  ;;  %v833_v6 = vadd.f32 %v831_v23, %v2579_v8  ;;  %v834_v31 = vadd.f32 %v832_v27, %v2581_v9  ;;  %v3076_v54 = vld [vmem:[#allocation18_spill] sm:$0xff] }
  0xd0   : > { %v901_v36 = vmax.f32 %v899_v49, 0.0  ;;  %v902_v14 = vmax.f32 %v900_v22, 0.0  ;;  %v1017_v48 = vadd.f32 %v1015_v44, %v1012_v47  ;;  %v1025_v18 = vmul.f32 %v1024_v11, %v2193_v50 }
  0xd1   : > { %v1018_v19 = vadd.f32 %v1016_v33, %v1013_v29  ;;  %v1026_v40 = vmul.f32 %v1024_v11, %v2203_v55  ;;  %v969_v32 = vadd.f32 %v967_v42, %v964_v60  ;;  %v972_v37 = vmul.f32 %v2352_v24, %v971_v53 }
  0xd2   : > { %v973_v16 = vmul.f32 %v2363_v30, %v971_v53  ;;  %v1029_v0 = vstv %s2630_s21  ;;  %v970_v8 = vadd.f32 %v968_v5, %v965_v58  ;;  %v976_v9 = vstv %s2638_s1  ;;  %s2824_s21 = sld [smem:[#allocation4 + $0x7]]  ;;  %s2836_s1 = sld [smem:[#allocation4 + $0x386]] }
  0xd3   : > { %v1022_v23 = vadd.f32 %v1020_v56, %v1017_v48  ;;  %v1023_v27 = vadd.f32 %v1021_v3, %v1018_v19  ;;  %v838_v50 = vadd.f32 %v836_v35, %v2583_v21  ;;  %v839_v38 = vadd.f32 %v837_v51, %v2585_v1  ;;  %v3073_v51 = vld [vmem:[#allocation17_spill] sm:$0xff] }
  0xd4   : > { %v3070_v10 = vstv %s2471_s3  ;;  %v1030_v39 = vmul.f32 %v2226_v12, %v1029_v0  ;;  %v1031_v45 = vmul.f32 %v2229_v13, %v1029_v0  ;;  %v3072_v21 = vstv %s2477_s4  ;;  %s2689_s3 = sld [smem:[#allocation2 + $0x86]]  ;;  %s2723_s4 = sld [smem:[#allocation6 + $0x200]] }
  0xd5   : > { %v904_v49 = vmul.f32 %v3070_v10, %v901_v36  ;;  %v3071_v63 = vmov %v3070_v10  ;;  %v1027_v46 = vadd.f32 %v1025_v18, %v1022_v23  ;;  %v1028_v22 = vadd.f32 %v1026_v40, %v1023_v27 }
  0xd6   : > { %v905_v7 = vmul.f32 %v3071_v63, %v902_v14  ;;  %v909_v1 = vmul.f32 %v3072_v21, %v901_v36  ;;  %v974_v35 = vadd.f32 %v972_v37, %v969_v32  ;;  %v977_v53 = vmul.f32 %v3073_v51, %v976_v9 }
  0xd7   : > { %v1034_v42 = vstv %s2651_s9  ;;  %v3074_v52 = vmov %v3072_v21  ;;  %v3075_v2 = vstv %s2479_s5  ;;  %v975_v61 = vadd.f32 %v973_v16, %v970_v8  ;;  %s2725_s5 = sld [smem:[#allocation6 + $0x201]]  ;;  %s2848_s9 = sld [smem:[#allocation4 + $0x87]] }
  0xd8   : > { %v910_v15 = vmul.f32 %v3074_v52, %v902_v14  ;;  %v914_v5 = vmul.f32 %v3075_v2, %v901_v36  ;;  %v978_v11 = vmul.f32 %v3076_v54, %v976_v9  ;;  %v3077_v60 = vmov %v3075_v2 }
  0xd9   : > { %v915_v58 = vmul.f32 %v3077_v60, %v902_v14  ;;  %v3078_v44 = vstv %s2489_s14  ;;  %v1039_v56 = vstv %s2659_s25  ;;  %v1032_v3 = vadd.f32 %v1030_v39, %v1027_v46  ;;  %s2738_s14 = sld [smem:[#allocation4 + $0x86]]  ;;  %v2772_v60 = vld [vmem:[%s2094_s30 + $0x28] sm:$0xff]  ;;  %s2852_s25 = sld [smem:[#allocation6 + $0x280]] }
  0xda   : > { %v919_v33 = vmul.f32 %v3078_v44, %v901_v36  ;;  %v3079_v47 = vmov %v3078_v44  ;;  %v1033_v48 = vadd.f32 %v1031_v45, %v1028_v22  ;;  %v1035_v19 = vmul.f32 %v2252_v34, %v1034_v42  ;;  %v3080_v44 = vld [vmem:[#allocation15_spill] sm:$0xff] }
  0xdb   : > { %v920_v29 = vmul.f32 %v3079_v47, %v902_v14  ;;  %v1036_v18 = vmul.f32 %v2262_v41, %v1034_v42  ;;  %v2712_v40 = vadd.f32 %v904_v49, %v2619_v20  ;;  %v2715_v32 = vadd.f32 %v905_v7, %v2621_v28  ;;  %v2761_v42 = vld [vmem:[%s2094_s30 + $0x18] sm:$0xff]  ;;  %v3081_v47 = vld [vmem:[#allocation16_spill] sm:$0xff] }
  0xdc   : > { %v2718_v36 = vadd.f32 %v909_v1, %v2627_v43  ;;  %v979_v14 = vadd.f32 %v977_v53, %v974_v35  ;;  %v980_v37 = vadd.f32 %v978_v11, %v975_v61  ;;  %v1040_v16 = vmul.f32 %v2278_v57, %v1039_v56  ;;  %v2757_v35 = vld [vmem:[%s2094_s30 + $0x10] sm:$0xff]  ;;  %v2768_v61 = vld [vmem:[%s2094_s30 + $0x20] sm:$0xff] }
  0xdd   : > { %v1041_v0 = vmul.f32 %v2284_v62, %v1039_v56  ;;  %v1044_v8 = vstv %s2668_s13  ;;  %v2728_v20 = vadd.f32 %v910_v15, %v2632_v17  ;;  %v2730_v28 = vadd.f32 %v914_v5, %v833_v6  ;;  %v2778_v56 = vld [vmem:[%s2094_s30 + $0x30] sm:$0xff]  ;;  %s2854_s13 = sld [smem:[#allocation6 + $0x281]] }
  0xde   : > { %v2732_v9 = vadd.f32 %v915_v58, %v834_v31  ;;  %v981_v43 = vstv %s2671_s20  ;;  %v2735_v23 = vadd.f32 %v919_v33, %v838_v50  ;;  %v1037_v27 = vadd.f32 %v1035_v19, %v1032_v3  ;;  %s2863_s20 = sld [smem:[#allocation6 + $0x282]] }
  0xdf   : > { %v1038_v10 = vadd.f32 %v1036_v18, %v1033_v48  ;;  %v1049_v49 = vstv %s2679_s22  ;;  %v2740_v63 = vadd.f32 %v920_v29, %v839_v38  ;;  %v1045_v17 = vmul.f32 %v2303_v25, %v1044_v8  ;;  %v2782_v48 = vld [vmem:[%s2094_s30 + $0x38] sm:$0xff]  ;;  %s2794_s30 = sld [smem:[#allocation4 + $0x206]]  ;;  %s2872_s22 = sld [smem:[#allocation4 + $0x107]] }
  0xe0   : > { %v1046_v6 = vmul.f32 %v2306_v26, %v1044_v8  ;;  %v1054_v31 = vstv %s2683_s8  ;;  %v982_v50 = vadd.f32 %v981_v43, %v979_v14  ;;  %v983_v7 = vadd.f32 %v981_v43, %v980_v37  ;;  %v2790_v43 = vld [vmem:[%s2174_s27] sm:$0xff]  ;;  %s2874_s8 = sld [smem:[#allocation6 + $0x283]] }
  0xe1   : > { %v1042_v46 = vadd.f32 %v1040_v16, %v1037_v27  ;;  %v1043_v22 = vadd.f32 %v1041_v0, %v1038_v10  ;;  %v1050_v38 = vmul.f32 %v2328_v59, %v1049_v49  ;;  %v1092_v39 = vstv %s2689_s3  ;;  %s2884_s3 = sld [smem:[#allocation4 + $0x187]] }
  0xe2   : > { %v1097_v45 = vstv %s2696_s23  ;;  %v1102_v21 = vstv %s2698_s18  ;;  %v1051_v1 = vmul.f32 %v2334_v4, %v1049_v49  ;;  %v1093_v53 = vmul.f32 %v2757_v35, %v1092_v39  ;;  %s2886_s23 = sld [smem:[#allocation7 + $0x6]]  ;;  %s2892_s18 = sld [smem:[#allocation4 + $0x207]] }
  0xe3   : > { %v1094_v52 = vmul.f32 %v2761_v42, %v1092_v39  ;;  %v1107_v15 = vstv %s2707_s12  ;;  %v1047_v2 = vadd.f32 %v1045_v17, %v1042_v46  ;;  %v1048_v5 = vadd.f32 %v1046_v6, %v1043_v22  ;;  %s2898_s12 = sld [smem:[#allocation4 + $0x287]] }
  0xe4   : > { %v1098_v11 = vmul.f32 %v2768_v61, %v1097_v45  ;;  %v1099_v58 = vmul.f32 %v2772_v60, %v1097_v45  ;;  %v1095_v33 = vadd.f32 %v1093_v53, %v3080_v44  ;;  %v1103_v3 = vmul.f32 %v2778_v56, %v1102_v21 }
  0xe5   : > { %v1096_v29 = vadd.f32 %v1094_v52, %v3081_v47  ;;  %v1104_v19 = vmul.f32 %v2782_v48, %v1102_v21  ;;  %v984_v18 = vmax.f32 %v982_v50, 0.0  ;;  %v985_v14 = vmax.f32 %v983_v7, 0.0 }
  0xe6   : > { %v986_v37 = vstv %s2723_s4  ;;  %v991_v16 = vstv %s2725_s5  ;;  %v1100_v0 = vadd.f32 %v1098_v11, %v1095_v33  ;;  %v1108_v27 = vmul.f32 %v2790_v43, %v1107_v15  ;;  %s2904_s4 = sld [smem:[#allocation4 + $0x307]]  ;;  %s2906_s5 = sld [smem:[#allocation6 + $0x300]] }
  0xe7   : > { %v1101_v8 = vadd.f32 %v1099_v58, %v1096_v29  ;;  %v1109_v10 = vmul.f32 %v1107_v15, %v2203_v55  ;;  %v1052_v49 = vadd.f32 %v1050_v38, %v1047_v2  ;;  %v1055_v17 = vmul.f32 %v2352_v24, %v1054_v31 }
  0xe8   : > { %v1056_v6 = vmul.f32 %v2363_v30, %v1054_v31  ;;  %v1112_v50 = vstv %s2738_s14  ;;  %v1053_v7 = vadd.f32 %v1051_v1, %v1048_v5  ;;  %v1059_v46 = vstv %s2745_s28  ;;  %s2914_s14 = sld [smem:[#allocation4 + $0x387]]  ;;  %s2916_s28 = sld [smem:[#allocation6 + $0x301]] }
  0xe9   : > { %v1105_v22 = vadd.f32 %v1103_v3, %v1100_v0  ;;  %v1106_v39 = vadd.f32 %v1104_v19, %v1101_v8  ;;  %v987_v45 = vmul.f32 %v986_v37, %v984_v18  ;;  %v988_v21 = vmul.f32 %v986_v37, %v985_v14 }
  0xea   : > { %v996_v55 = vstv %s2747_s0  ;;  %v1001_v53 = vstv %s2749_s2  ;;  %v1113_v15 = vmul.f32 %v2226_v12, %v1112_v50  ;;  %v1114_v31 = vmul.f32 %v2229_v13, %v1112_v50  ;;  %s2922_s0 = sld [smem:[#allocation6 + $0x302]]  ;;  %s2924_s2 = sld [smem:[#allocation6 + $0x303]] }
  0xeb   : > { %v1110_v52 = vadd.f32 %v1108_v27, %v1105_v22  ;;  %v1111_v38 = vadd.f32 %v1109_v10, %v1106_v39  ;;  %v992_v1 = vmul.f32 %v991_v16, %v984_v18  ;;  %v1057_v2 = vadd.f32 %v1055_v17, %v1052_v49 }
  0xec   : > { %v1060_v5 = vmul.f32 %v3073_v51, %v1059_v46  ;;  %v1117_v11 = vstv %s2765_s6  ;;  %v993_v58 = vmul.f32 %v991_v16, %v985_v14  ;;  %v997_v44 = vmul.f32 %v996_v55, %v984_v18  ;;  %s2943_s6 = sld [smem:[#allocation7 + $0x7]] }
  0xed   : > { %v1058_v33 = vadd.f32 %v1056_v6, %v1053_v7  ;;  %v1061_v47 = vmul.f32 %v3076_v54, %v1059_v46  ;;  %v998_v12 = vmul.f32 %v996_v55, %v985_v14  ;;  %v1002_v13 = vmul.f32 %v1001_v53, %v984_v18 }
  0xee   : > { %v2819_v29 = vmul.f32 %v1001_v53, %v985_v14  ;;  %v1122_v3 = vstv %s2785_s29  ;;  %v1115_v19 = vadd.f32 %v1113_v15, %v1110_v52  ;;  %v1116_v37 = vadd.f32 %v1114_v31, %v1111_v38  ;;  %s2953_s29 = sld [smem:[#allocation6 + $0x380]] }
  0xef   : > { %v1118_v16 = vmul.f32 %v2252_v34, %v1117_v11  ;;  %v1119_v0 = vmul.f32 %v2262_v41, %v1117_v11  ;;  %v2827_v8 = vadd.f32 %v987_v45, %v2712_v40  ;;  %v2830_v27 = vadd.f32 %v988_v21, %v2715_v32 }
  0xf0   : > { %v1062_v10 = vadd.f32 %v1060_v5, %v1057_v2  ;;  %v1127_v18 = vstv %s2794_s30  ;;  %v1063_v14 = vadd.f32 %v1061_v47, %v1058_v33  ;;  %v1064_v49 = vstv %s2799_s10  ;;  %v3083_v5 = vld [vmem:[#allocation20_spill] sm:$0xff]  ;;  %s2955_s30 = sld [smem:[#allocation6 + $0x381]]  ;;  %s2959_s10 = sld [smem:[#allocation6 + $0x382]] }
  0xf1   : > { %v1123_v17 = vmul.f32 %v2278_v57, %v1122_v3  ;;  %v1124_v6 = vmul.f32 %v2284_v62, %v1122_v3  ;;  %v2839_v34 = vadd.f32 %v992_v1, %v2718_v36  ;;  %v2842_v41 = vadd.f32 %v993_v58, %v2728_v20  ;;  %v3082_v1 = vld [vmem:[#allocation19_spill] sm:$0xff] }
  0xf2   : > { %v2845_v40 = vadd.f32 %v997_v44, %v2730_v28  ;;  %v1132_v32 = vstv %s2802_s11  ;;  %v1120_v50 = vadd.f32 %v1118_v16, %v1115_v19  ;;  %v1121_v57 = vadd.f32 %v1119_v0, %v1116_v37  ;;  %s2961_s11 = sld [smem:[#allocation6 + $0x383]] }
  0xf3   : > { %v1128_v62 = vmul.f32 %v2303_v25, %v1127_v18  ;;  %v1129_v7 = vmul.f32 %v2306_v26, %v1127_v18  ;;  %v2857_v36 = vadd.f32 %v998_v12, %v2732_v9  ;;  %v2860_v20 = vadd.f32 %v1002_v13, %v2735_v23  ;;  %v1803_v12 = vld [vmem:[%s2174_s27 + $0x8] sm:$0xff] }
  0xf4   : > { %v1065_v28 = vadd.f32 %v1064_v49, %v1062_v10  ;;  %v1137_v46 = vstv %s2808_s15  ;;  %v1066_v22 = vadd.f32 %v1064_v49, %v1063_v14  ;;  %v1125_v39 = vadd.f32 %v1123_v17, %v1120_v50  ;;  %v1805_v50 = vld [vmem:[%s2174_s27 + $0x18] sm:$0xff]  ;;  %s2967_s15 = sld [smem:[#allocation9]] }
  0xf5   : > { %v1126_v25 = vadd.f32 %v1124_v6, %v1121_v57  ;;  %v1133_v26 = vmul.f32 %v2328_v59, %v1132_v32  ;;  %v1134_v45 = vmul.f32 %v2334_v4, %v1132_v32  ;;  %v1175_v21 = vstv %s2812_s16  ;;  %v1804_v6 = vld [vmem:[%s2174_s27 + $0x10] sm:$0xff]  ;;  %s2969_s16 = sld [smem:[#allocation9 + $0x1]] }
  0xf6   : > { %v1180_v55 = vstv %s2815_s17  ;;  %v1185_v53 = vstv %s2817_s19  ;;  %v1130_v9 = vadd.f32 %v1128_v62, %v1125_v39  ;;  %v1176_v23 = vmul.f32 %v2757_v35, %v1175_v21  ;;  %s2973_s17 = sld [smem:[#allocation9 + $0x2]]  ;;  %s2975_s19 = sld [smem:[#allocation9 + $0x3]] }
  0xf7   : > { %v1131_v52 = vadd.f32 %v1129_v7, %v1126_v25  ;;  %v1177_v38 = vmul.f32 %v2761_v42, %v1175_v21  ;;  %v1138_v15 = vmul.f32 %v2352_v24, %v1137_v46  ;;  %v1181_v59 = vmul.f32 %v2768_v61, %v1180_v55 }
  0xf8   : > { %v1182_v4 = vmul.f32 %v2772_v60, %v1180_v55  ;;  %v1190_v31 = vstv %s2824_s21  ;;  %v1178_v2 = vadd.f32 %v1176_v23, %v3082_v1  ;;  %v1186_v35 = vmul.f32 %v2778_v56, %v1185_v53  ;;  %v1806_v55 = vld [vmem:[%s2174_s27 + $0x20] sm:$0xff]  ;;  %v1808_v1 = vld [vmem:[%s2174_s27 + $0x30] sm:$0xff] }
  0xf9   : > { %v1179_v11 = vadd.f32 %v1177_v38, %v3083_v5  ;;  %v1187_v42 = vmul.f32 %v2782_v48, %v1185_v53  ;;  %v1135_v24 = vadd.f32 %v1133_v26, %v1130_v9  ;;  %v1136_v61 = vadd.f32 %v1134_v45, %v1131_v52  ;;  %v1807_v9 = vld [vmem:[%s2174_s27 + $0x28] sm:$0xff]  ;;  %v1809_v5 = vld [vmem:[%s2174_s27 + $0x38] sm:$0xff] }
  0xfa   : > { %v1139_v60 = vmul.f32 %v2363_v30, %v1137_v46  ;;  %v1142_v58 = vstv %s2836_s1  ;;  %v1183_v44 = vadd.f32 %v1181_v59, %v1178_v2  ;;  %v1191_v47 = vmul.f32 %v2790_v43, %v1190_v31 }
  0xfb   : > { %v1184_v33 = vadd.f32 %v1182_v4, %v1179_v11  ;;  %v1192_v56 = vmul.f32 %v1803_v12, %v1190_v31  ;;  %v1067_v48 = vmax.f32 %v1065_v28, 0.0  ;;  %v1069_v13 = vstv %s2852_s25 }
  0xfc   : > { %v1074_v3 = vstv %s2854_s13  ;;  %v1195_v19 = vstv %s2848_s9  ;;  %v1068_v37 = vmax.f32 %v1066_v22, 0.0  ;;  %v1079_v16 = vstv %s2863_s20 }
  0xfd   : > { %v1188_v0 = vadd.f32 %v1186_v35, %v1183_v44  ;;  %v1189_v10 = vadd.f32 %v1187_v42, %v1184_v33  ;;  %v1140_v30 = vadd.f32 %v1138_v15, %v1135_v24  ;;  %v1141_v43 = vadd.f32 %v1139_v60, %v1136_v61 }
  0xfe   : > { %v1143_v18 = vmul.f32 %v3073_v51, %v1142_v58  ;;  %v1144_v14 = vmul.f32 %v3076_v54, %v1142_v58  ;;  %v1196_v32 = vmul.f32 %v1804_v6, %v1195_v19  ;;  %v1197_v57 = vmul.f32 %v1805_v50, %v1195_v19  ;;  %v1810_v58 = vld [vmem:[%s2174_s27 + $0x40] sm:$0xff] }
  0xff   : > { %v1193_v49 = vadd.f32 %v1191_v47, %v1188_v0  ;;  %v1194_v17 = vadd.f32 %v1192_v56, %v1189_v10  ;;  %v2910_v62 = vadd.f32 %v2819_v29, %v2740_v63  ;;  %v1070_v51 = vmul.f32 %v1069_v13, %v1067_v48 }
 0x100   : > { %v1084_v7 = vstv %s2874_s8  ;;  %v1200_v54 = vstv %s2872_s22  ;;  %v1071_v28 = vmul.f32 %v1069_v13, %v1068_v37  ;;  %v1075_v46 = vmul.f32 %v1074_v3, %v1067_v48 }
 0x101   : > { %v1076_v22 = vmul.f32 %v1074_v3, %v1068_v37  ;;  %v1080_v39 = vmul.f32 %v1079_v16, %v1067_v48  ;;  %v1145_v25 = vadd.f32 %v1143_v18, %v1140_v30  ;;  %v1146_v26 = vadd.f32 %v1144_v14, %v1141_v43  ;;  %v1812_v3 = vld [vmem:[%s2174_s27 + $0x50] sm:$0xff]  ;;  %v1814_v18 = vld [vmem:[%s2174_s27 + $0x60] sm:$0xff] }
 0x102   : > { %v1147_v45 = vstv %s2886_s23  ;;  %v1205_v63 = vstv %s2884_s3  ;;  %v1198_v29 = vadd.f32 %v1196_v32, %v1193_v49  ;;  %v1199_v21 = vadd.f32 %v1197_v57, %v1194_v17  ;;  %v1815_v49 = vld [vmem:[%s2174_s27 + $0x68] sm:$0xff] }
 0x103   : > { %v1201_v53 = vmul.f32 %v1806_v55, %v1200_v54  ;;  %v1202_v52 = vmul.f32 %v1807_v9, %v1200_v54  ;;  %v1081_v23 = vmul.f32 %v1079_v16, %v1068_v37  ;;  %v1085_v38 = vmul.f32 %v1084_v7, %v1067_v48  ;;  %v1816_v54 = vld [vmem:[%s2174_s27 + $0x70] sm:$0xff] }
 0x104   : > { %v2926_v15 = vmul.f32 %v1084_v7, %v1068_v37  ;;  %v1210_v59 = vstv %s2892_s18  ;;  %v2930_v4 = vadd.f32 %v1070_v51, %v2827_v8  ;;  %v2933_v31 = vadd.f32 %v1071_v28, %v2830_v27  ;;  %v1811_v27 = vld [vmem:[%s2174_s27 + $0x48] sm:$0xff]  ;;  %v1813_v37 = vld [vmem:[%s2174_s27 + $0x58] sm:$0xff] }
 0x105   : > { %v1206_v2 = vmul.f32 %v1808_v1, %v1205_v63  ;;  %v1207_v11 = vmul.f32 %v1809_v5, %v1205_v63  ;;  %v2938_v35 = vadd.f32 %v1075_v46, %v2839_v34  ;;  %v1148_v42 = vadd.f32 %v1147_v45, %v1145_v25  ;;  %v1817_v46 = vld [vmem:[%s2174_s27 + $0x78] sm:$0xff]  ;;  %s3084_s27 = sshll.u32 %s3090_s24, 6 }
 0x106   : > { %v1149_v24 = vadd.f32 %v1147_v45, %v1146_v26  ;;  %v1215_v61 = vstv %s2898_s12  ;;  %v1203_v60 = vadd.f32 %v1201_v53, %v1198_v29  ;;  %v1204_v8 = vadd.f32 %v1202_v52, %v1199_v21  ;;  %s416_s9 = scalar_lea.vmem %s3012_s7, %s3084_s27 }
 0x107   : > { %v1211_v44 = vmul.f32 %v1810_v58, %v1210_v59  ;;  %v1212_v33 = vmul.f32 %v1811_v27, %v1210_v59  ;;  %v1078_v47 = vadd.f32 %v1076_v22, %v2842_v41  ;;  %v1082_v34 = vadd.f32 %v1080_v39, %v2845_v40 }
 0x108   : > { %v1152_v12 = vstv %s2906_s5  ;;  %v1220_v56 = vstv %s2904_s4  ;;  %v1208_v48 = vadd.f32 %v1206_v2, %v1203_v60  ;;  %v1209_v13 = vadd.f32 %v1207_v11, %v1204_v8 }
 0x109   : > { %v1216_v19 = vmul.f32 %v1812_v3, %v1215_v61  ;;  %v1217_v16 = vmul.f32 %v1813_v37, %v1215_v61  ;;  %v1150_v0 = vmax.f32 %v1148_v42, 0.0  ;;  %v1151_v10 = vmax.f32 %v1149_v24, 0.0 }
 0x10a   : > { %v1157_v30 = vstv %s2916_s28  ;;  %v1225_v43 = vstv %s2914_s14  ;;  %v1213_v41 = vadd.f32 %v1211_v44, %v1208_v48  ;;  %v1214_v40 = vadd.f32 %v1212_v33, %v1209_v13 }
 0x10b   : > { %v1221_v14 = vmul.f32 %v1814_v18, %v1220_v56  ;;  %v1222_v17 = vmul.f32 %v1815_v49, %v1220_v56  ;;  %v1083_v6 = vadd.f32 %v1081_v23, %v2857_v36  ;;  %v1087_v32 = vadd.f32 %v1085_v38, %v2860_v20 }
 0x10c   : > { %v1162_v50 = vstv %s2922_s0  ;;  %v1167_v57 = vstv %s2924_s2  ;;  %v1218_v51 = vadd.f32 %v1216_v19, %v1213_v41  ;;  %v1219_v7 = vadd.f32 %v1217_v16, %v1214_v40 }
 0x10d   : > { %v1226_v28 = vmul.f32 %v1816_v54, %v1225_v43  ;;  %v1227_v22 = vmul.f32 %v1817_v46, %v1225_v43  ;;  %v1153_v36 = vmul.f32 %v1152_v12, %v1150_v0  ;;  %v1154_v39 = vmul.f32 %v1152_v12, %v1151_v10 }
 0x10e   : > { %v1158_v20 = vmul.f32 %v1157_v30, %v1150_v0  ;;  %v1159_v25 = vmul.f32 %v1157_v30, %v1151_v10  ;;  %v1163_v26 = vmul.f32 %v1162_v50, %v1150_v0  ;;  %v1164_v45 = vmul.f32 %v1162_v50, %v1151_v10 }
 0x10f   : > { %v1223_v63 = vadd.f32 %v1221_v14, %v1218_v51  ;;  %v1224_v29 = vadd.f32 %v1222_v17, %v1219_v7  ;;  %v1088_v21 = vadd.f32 %v2926_v15, %v2910_v62  ;;  %v1168_v55 = vmul.f32 %v1167_v57, %v1150_v0 }
 0x110   : > { %v1169_v53 = vmul.f32 %v1167_v57, %v1151_v10  ;;  %v1230_v9 = vstv %s2943_s6  ;;  %v1155_v38 = vadd.f32 %v1153_v36, %v2930_v4  ;;  %v1156_v59 = vadd.f32 %v1154_v39, %v2933_v31 }
 0x111   : > { %v1228_v52 = vadd.f32 %v1226_v28, %v1223_v63  ;;  %v1229_v23 = vadd.f32 %v1227_v22, %v1224_v29  ;;  %v1160_v1 = vadd.f32 %v1158_v20, %v2938_v35  ;;  %v1161_v2 = vadd.f32 %v1159_v25, %v1078_v47 }
 0x112   : > { %v1165_v62 = vadd.f32 %v1163_v26, %v1082_v34  ;;  %v1166_v15 = vadd.f32 %v1164_v45, %v1083_v6  ;;  %v1170_v42 = vadd.f32 %v1168_v55, %v1087_v32  ;;  %v1171_v24 = vadd.f32 %v1169_v53, %v1088_v21 }
 0x113   : > { %v1231_v5 = vadd.f32 %v1230_v9, %v1228_v52  ;;  %v1232_v11 = vadd.f32 %v1230_v9, %v1229_v23  ;;  %v1235_v61 = vstv %s2953_s29  ;;  %v1240_v60 = vstv %s2955_s30 }
 0x114   : > { %v1245_v4 = vstv %s2959_s10  ;;  %v1250_v44 = vstv %s2961_s11  ;;  %v1255_v27 = vstv %s2967_s15  ;;  %v1272_v31 = vstv %s2969_s16 }
 0x115   : > { %v1233_v8 = vmax.f32 %v1231_v5, 0.0  ;;  %v1234_v58 = vmax.f32 %v1232_v11, 0.0  ;;  %v1290_v33 = vstv %s2973_s17  ;;  %v1308_v12 = vstv %s2975_s19 }
 0x117   : > { %v1236_v35 = vmul.f32 %v1235_v61, %v1233_v8  ;;  %v1237_v56 = vmul.f32 %v1235_v61, %v1234_v58  ;;  %v1241_v47 = vmul.f32 %v1240_v60, %v1233_v8  ;;  %v1242_v48 = vmul.f32 %v1240_v60, %v1234_v58 }
 0x118   : > { %v1246_v34 = vmul.f32 %v1245_v4, %v1233_v8  ;;  %v1247_v13 = vmul.f32 %v1245_v4, %v1234_v58  ;;  %v1251_v3 = vmul.f32 %v1250_v44, %v1233_v8  ;;  %v1252_v19 = vmul.f32 %v1250_v44, %v1234_v58 }
 0x119   : > { %v1238_v37 = vadd.f32 %v1236_v35, %v1155_v38  ;;  %v1239_v16 = vadd.f32 %v1237_v56, %v1156_v59  ;;  %v1243_v0 = vadd.f32 %v1241_v47, %v1160_v1  ;;  %v1244_v10 = vadd.f32 %v1242_v48, %v1161_v2 }
 0x11a   : > { %v1248_v30 = vadd.f32 %v1246_v34, %v1165_v62  ;;  %v1249_v43 = vadd.f32 %v1247_v13, %v1166_v15  ;;  %v1253_v41 = vadd.f32 %v1251_v3, %v1170_v42  ;;  %v1254_v40 = vadd.f32 %v1252_v19, %v1171_v24 }
 0x11b   : > { %v1256_v18 = vadd.f32 %v1255_v27, %v1238_v37  ;;  %v1257_v14 = vadd.f32 %v1255_v27, %v1239_v16  ;;  %v1273_v49 = vadd.f32 %v1272_v31, %v1243_v0  ;;  %v1274_v17 = vadd.f32 %v1272_v31, %v1244_v10 }
 0x11c   : > { %v1291_v6 = vadd.f32 %v1290_v33, %v1248_v30  ;;  %v1292_v32 = vadd.f32 %v1290_v33, %v1249_v43  ;;  %v1309_v7 = vadd.f32 %v1308_v12, %v1253_v41  ;;  %v1310_v28 = vadd.f32 %v1308_v12, %v1254_v40 }
 0x11d   : > { %v1670_v50 = vmul.f32 -1.442695, %v1256_v18  ;;  %v1671_v57 = vmul.f32 -1.442695, %v1257_v14  ;;  %v1672_v51 = vmul.f32 -1.442695, %v1273_v49 }
 0x11e   : > { %v1673_v54 = vmul.f32 -1.442695, %v1274_v17  ;;  %v1676_v46 = vmul.f32 -1.442695, %v1291_v6  ;;  %v1677_v22 = vmul.f32 -1.442695, %v1292_v32 }
 0x11f   : > { %1764 = vpow2.f32 %v1670_v50  ;;  %v1680_v36 = vmul.f32 -1.442695, %v1309_v7  ;;  %v1681_v39 = vmul.f32 -1.442695, %v1310_v28 }
 0x120   : > { %1766 = vpow2.f32 %v1671_v57 }
 0x121   : > { %1768 = vpow2.f32 %v1672_v51 }
 0x122   : > { %1770 = vpow2.f32 %v1673_v54 }
 0x123   : > { %1772 = vpow2.f32 %v1676_v46 }
 0x124   : > { %1774 = vpow2.f32 %v1677_v22 }
 0x125   : > { %1776 = vpow2.f32 %v1680_v36 }
 0x126   : > { %1778 = vpow2.f32 %v1681_v39 }
 0x129   : > { %v1765_v20 = vpop.eup %1764 }
 0x12a   : > { %v1767_v25 = vpop.eup %1766  ;;  %v1264_v26 = vadd.f32 1.0, %v1765_v20 }
 0x12b   : > { %v1769_v45 = vpop.eup %1768  ;;  %v1265_v63 = vadd.f32 1.0, %v1767_v25 }
 0x12c   : > { %v1771_v29 = vpop.eup %1770  ;;  %1780 = vrcp.f32 %v1264_v26  ;;  %v1281_v21 = vadd.f32 1.0, %v1769_v45 }
 0x12d   : > { %v1773_v55 = vpop.eup %1772  ;;  %1782 = vrcp.f32 %v1265_v63  ;;  %v1282_v53 = vadd.f32 1.0, %v1771_v29 }
 0x12e   : > { %v1775_v9 = vpop.eup %1774  ;;  %1784 = vrcp.f32 %v1281_v21  ;;  %v1299_v52 = vadd.f32 1.0, %v1773_v55 }
 0x12f   : > { %v1777_v23 = vpop.eup %1776  ;;  %1786 = vrcp.f32 %v1282_v53  ;;  %v1300_v38 = vadd.f32 1.0, %v1775_v9 }
 0x130   : > { %v1779_v59 = vpop.eup %1778  ;;  %1788 = vrcp.f32 %v1299_v52  ;;  %v1317_v1 = vadd.f32 1.0, %v1777_v23 }
 0x131   : > { %1790 = vrcp.f32 %v1300_v38  ;;  %v1318_v2 = vadd.f32 1.0, %v1779_v59 }
 0x132   : > { %1792 = vrcp.f32 %v1317_v1 }
 0x133   : > { %1794 = vrcp.f32 %v1318_v2 }
 0x136   : > { %v1781_v62 = vpop.eup %1780 }
 0x137   : > { %v1783_v15 = vpop.eup %1782  ;;  %1270 = vst [vmem:[%s416_s9] sm:$0xff] %v1781_v62 }
 0x138   : > { %v1785_v5 = vpop.eup %1784  ;;  %1271 = vst [vmem:[%s416_s9 + $0x8] sm:$0xff] %v1783_v15 }
 0x139   : > { %v1787_v11 = vpop.eup %1786  ;;  %1674 = vst [vmem:[%s416_s9 + $0x10] sm:$0xff] %v1785_v5 }
 0x13a   : > { %v1789_v42 = vpop.eup %1788  ;;  %1675 = vst [vmem:[%s416_s9 + $0x18] sm:$0xff] %v1787_v11 }
 0x13b   : > { %v1791_v24 = vpop.eup %1790  ;;  %1678 = vst [vmem:[%s416_s9 + $0x20] sm:$0xff] %v1789_v42 }
 0x13c   : > { %v1793_v61 = vpop.eup %1792  ;;  %1679 = vst [vmem:[%s416_s9 + $0x28] sm:$0xff] %v1791_v24 }
 0x13d   : > { %v1795_v60 = vpop.eup %1794  ;;  %1682 = vst [vmem:[%s416_s9 + $0x30] sm:$0xff] %v1793_v61 }
 0x13e   : > { %1683 = vst [vmem:[%s416_s9 + $0x38] sm:$0xff] %v1795_v60 }
 0x13f PF: > { %s20_s26 = sadd.s32 1, %s1927_s26   ;;  %s3085_s24 = sld [smem:[#allocation13_spill]] }
 0x140   : > { %p17_p8 = scmp.ge.s32.totalorder %s20_s26, 4   ;;  %s3086_s25 = sld [smem:[#allocation14_spill]] }
 0x142   :  { %19 = sbr.rel (!%p17_p8) target bundleno = 12 (0xc), region = 115 }
 0x149   :  { %1356 = vsyncpa [#allocation3], 1 }
 0x14a   :  { %1358 = vsyncpa [#allocation3 + $0x1], 1 }
 0x14b   :  { %1359 = vsyncpa [#allocation5], 1 }
 0x14c   :  { %1360 = vsyncpa [#allocation8], 1 }

</bundles_post_ra>
